<compile_context>
chip_gen: v6e
topology: v6e:2x2x1
jax: 0.10.0
libtpu: 0.0.40
codegen_flags: <defaults>
</compile_context>

<pallas_src>
import functools

import jax
import jax.numpy as jnp
from jax import lax
from jax.experimental import pallas as pl
from jax.experimental.pallas import tpu as pltpu

NEG = -1e30           # sentinel for suppressed / below-threshold candidates
VALID_CUTOFF = -1e29  # anything above this is a real (unsuppressed) score


def _batched_nms_kernel(sthr_ref, ithr_ref, in_ref, out_ref, act_ref, *,
                        num_classes, max_dets, batch_block, unroll):
    """Matrix-free greedy per-class NMS with per-class cached maxima.

    in_ref  : (bb, 4+C, N)  rows 0..3 = x1,y1,x2,y2 ; rows 4.. = class scores
    out_ref : (bb, 8, K)    rows = x1,y1,x2,y2,score,class,valid,num_det
    act_ref : (C, N) VMEM scratch — live activation map (suppressed -> NEG)
    """
    C = num_classes
    K = max_dets
    N = in_ref.shape[2]

    sthr = sthr_ref[0]
    ithr = ithr_ref[0]

    c_iota = lax.broadcasted_iota(jnp.int32, (C, 1), 0)   # class index column
    n_row = lax.broadcasted_iota(jnp.int32, (1, N), 1)    # box index (lane) row
    n_col = lax.broadcasted_iota(jnp.int32, (N, 1), 0)    # box index column (one-hot matvec)
    k_iota = lax.broadcasted_iota(jnp.int32, (1, K), 1)   # detection slot index

    # Static small loop: several batch elements per grid step amortize the
    # ~0.35 us per-grid-step overhead; act scratch is reused sequentially.
    for bi in range(batch_block):
        boxes = in_ref[bi, pl.ds(0, 4), :]                 # [4, N] lane-dense coords
        scores = in_ref[bi, pl.ds(4, C), :]                # [C, N] class scores

        x1 = boxes[0:1, :]
        y1 = boxes[1:2, :]
        x2 = boxes[2:3, :]
        y2 = boxes[3:4, :]
        area = (x2 - x1) * (y2 - y1)                       # [1, N]

        # Score-threshold gate; live map lives in VMEM scratch, NOT the carry.
        act0 = jnp.where(scores > sthr, scores, NEG)       # [C, N]
        act_ref[...] = act0
        cmax0 = jnp.max(act0, axis=1, keepdims=True)       # [C, 1] per-class maxima

        def body(k, carry):
            cmax, ob, osc, ocl, ovl = carry

            # Global pick from the tiny per-class max cache.
            best = jnp.max(cmax)                                       # scalar
            valid = best > VALID_CUTOFF
            sel_c = jnp.min(jnp.where(cmax >= best, c_iota, C))        # scalar int32

            # Argmax restricted to the winning class row (single [1,N] reduce).
            row = act_ref[pl.ds(sel_c, 1), :]                          # [1, N]
            sel_n = jnp.min(jnp.where(row >= best, n_row, N))          # scalar int32

            # Picked-box gather: one-hot matvec on the (otherwise idle) MXU.
            onehot = (n_col == sel_n).astype(jnp.float32)              # [N, 1]
            sel = jnp.dot(boxes, onehot,
                          preferred_element_type=jnp.float32)          # [4, 1]
            sx1 = sel[0:1, :]
            sy1 = sel[1:2, :]
            sx2 = sel[2:3, :]
            sy2 = sel[3:4, :]

            # One [1, N] IoU row vs the picked box; divide-free exact compare.
            ix1 = jnp.maximum(x1, sx1)
            iy1 = jnp.maximum(y1, sy1)
            ix2 = jnp.minimum(x2, sx2)
            iy2 = jnp.minimum(y2, sy2)
            inter = jnp.maximum(ix2 - ix1, 0.0) * jnp.maximum(iy2 - iy1, 0.0)
            union = area + (sx2 - sx1) * (sy2 - sy1) - inter           # [1, N]
            suppress = inter > ithr * union                            # [1, N]

            # Row-only suppression, written straight back to the VMEM scratch,
            # then refresh only this class's cached maximum.
            new_row = jnp.where(jnp.logical_or(suppress, n_row == sel_n),
                                NEG, row)
            act_ref[pl.ds(sel_c, 1), :] = new_row
            cmax = jnp.where(c_iota == sel_c, jnp.max(new_row), cmax)  # [C, 1]

            # Record detection k (tiny one-hot updates on [*, K] accumulators).
            slot = jnp.logical_and(k_iota == k, valid)                 # [1, K]
            ob = jnp.where(slot, sel, ob)                              # [4, K]
            osc = jnp.where(slot, best, osc)                           # [1, K]
            ocl = jnp.where(slot, sel_c.astype(jnp.float32), ocl)      # [1, K]
            ovl = jnp.where(slot, 1.0, ovl)                            # [1, K]
            return cmax, ob, osc, ocl, ovl

        carry0 = (cmax0,
                  jnp.zeros((4, K), jnp.float32),
                  jnp.zeros((1, K), jnp.float32),
                  jnp.full((1, K), -1.0, jnp.float32),
                  jnp.zeros((1, K), jnp.float32))
        _, ob, osc, ocl, ovl = lax.fori_loop(0, K, body, carry0, unroll=unroll)

        # Single merged output slab (one output array -> one DMA per grid step).
        out_ref[bi, 0:4, :] = ob
        out_ref[bi, 4:5, :] = osc
        out_ref[bi, 5:6, :] = ocl
        out_ref[bi, 6:7, :] = ovl
        out_ref[bi, 7:8, :] = jnp.full((1, K), jnp.sum(ovl))   # num_detections


def _pick_batch_block(batch):
    # Amortize per-grid-step overhead when B is large, but keep the grid
    # length >= 2 so both v7x TensorCores stay busy under "parallel".
    for cand in (8, 4, 2):
        if batch % cand == 0 and batch // cand >= 2:
            return cand
    return 1


def batched_nms_postprocess(inp, score_threshold, iou_threshold, *, max_dets=8):
    """JAX wrapper == Wrapper(pp)(input, score_threshold, iou_threshold).

    inp: [B, N, 4 + C] float32.
    Returns (num_detections [B] int32, nmsed_boxes [B,K,4] f32,
             nmsed_scores [B,K] f32, nmsed_classes [B,K] int32).
    """
    B, N, D = inp.shape
    C = D - 4
    K = max_dets
    bb = _pick_batch_block(B)

    # Single transposed input [B, 4+C, N]: one HBM transpose pass, one input
    # DMA stream per grid step; boxes/scores sliced in-kernel.
    inp_t = jnp.transpose(inp, (0, 2, 1))

    sthr = jnp.asarray([score_threshold], jnp.float32)
    ithr = jnp.asarray([iou_threshold], jnp.float32)

    kernel = functools.partial(_batched_nms_kernel, num_classes=C, max_dets=K,
                               batch_block=bb, unroll=min(8, K))
    smem_spec = pl.BlockSpec(memory_space=pltpu.MemorySpace.SMEM)

    # Explicit VMEM budget: double-buffered input + output blocks + act scratch,
    # with headroom; capped well under v7x's 64 MiB physical VMEM.
    need = 2 * (bb * D * N + bb * 8 * K) * 4 + C * N * 4
    vmem_limit = int(min(48 << 20, max(4 * need + (4 << 20), 16 << 20)))

    out = pl.pallas_call(
        kernel,
        grid=(B // bb,),
        in_specs=[
            smem_spec,                                        # score_threshold
            smem_spec,                                        # iou_threshold
            pl.BlockSpec((bb, D, N), lambda g: (g, 0, 0)),    # merged input
        ],
        out_specs=pl.BlockSpec((bb, 8, K), lambda g: (g, 0, 0)),
        out_shape=jax.ShapeDtypeStruct((B, 8, K), jnp.float32),
        scratch_shapes=[pltpu.VMEM((C, N), jnp.float32)],     # activation map
        compiler_params=pltpu.CompilerParams(
            dimension_semantics=("parallel",),
            vmem_limit_bytes=vmem_limit),
    )(sthr, ithr, inp_t)

    nmsed_boxes = jnp.transpose(out[:, 0:4, :], (0, 2, 1))    # [B, K, 4]
    nmsed_scores = out[:, 4, :]                               # [B, K]
    nmsed_classes = out[:, 5, :].astype(jnp.int32)            # [B, K], -1 = pad
    num_detections = out[:, 7, 0].astype(jnp.int32)           # [B]
    return num_detections, nmsed_boxes, nmsed_scores, nmsed_classes


# `Wrapper` has no learnable parameters; it just forwards to `pp`.
class Wrapper:
    def __init__(self, pp):
        self.pp = pp

    def __call__(self, input, score_threshold, iou_threshold):
        return self.pp(input, score_threshold, iou_threshold)


if __name__ == "__main__":
    # Small deterministic inputs: batch=4, boxes=16, classes=4 -> input [4, 16, 8]
    # (B=4 also exercises the batch_block=2 in-kernel batch loop, grid=(2,)).
    B, N, C = 4, 16, 4
    key = jax.random.PRNGKey(0)
    k_xy, k_wh, k_sc = jax.random.split(key, 3)

    centers = jax.random.uniform(k_xy, (B, N, 2), jnp.float32, 0.2, 0.8)
    sizes = jax.random.uniform(k_wh, (B, N, 2), jnp.float32, 0.05, 0.3)
    x1y1 = centers - 0.5 * sizes
    x2y2 = centers + 0.5 * sizes
    boxes = jnp.concatenate([x1y1, x2y2], axis=-1)                   # [B, N, 4]
    class_scores = jax.random.uniform(k_sc, (B, N, C), jnp.float32)  # [B, N, C]
    inp = jnp.concatenate([boxes, class_scores], axis=-1)            # [B, N, 4+C]

    model = Wrapper(jax.jit(
        functools.partial(batched_nms_postprocess, max_dets=8)))

    num_det, nms_boxes, nms_scores, nms_classes = model(inp, 0.25, 0.5)
    jax.block_until_ready((num_det, nms_boxes, nms_scores, nms_classes))

    assert nms_boxes.shape == (B, 8, 4)
    assert nms_scores.shape == (B, 8)
    assert nms_classes.shape == (B, 8)
    assert num_det.shape == (B,)
    print("KERNEL_OK")
</pallas_src>

<mosaic_0001>
module attributes {stable_mosaic.version = 11 : i64} {
  func.func @_batched_nms_kernel(%arg0: i32, %arg1: memref<1xf32, #tpu.memory_space<smem>>, %arg2: memref<1xf32, #tpu.memory_space<smem>>, %arg3: memref<2x8x16xf32, #tpu.memory_space<vmem>>, %arg4: memref<2x8x8xf32, #tpu.memory_space<vmem>>, %arg5: memref<4x16xf32, #tpu.memory_space<vmem>>) attributes {dimension_semantics = [#tpu.dimension_semantics<parallel>], iteration_bounds = array<i64: 2>, scalar_prefetch = 0 : i64, scratch_operands = 1 : i64, tpu.core_type = #tpu.core_type<tc>, window_params = [{transform_indices = @transform_0, window_bounds = array<i64: 1>}, {transform_indices = @transform_1, window_bounds = array<i64: 1>}, {transform_indices = @transform_2, window_bounds = array<i64: 2, 8, 16>}, {transform_indices = @transform_3, window_bounds = array<i64: 2, 8, 8>}]} {
    %c0 = arith.constant 0 : index
    %0 = memref.load %arg1[%c0] : memref<1xf32, #tpu.memory_space<smem>>
    %c0_0 = arith.constant 0 : index
    %1 = memref.load %arg2[%c0_0] : memref<1xf32, #tpu.memory_space<smem>>
    %2 = tpu.iota {dimensions = array<i32: 0>} : vector<4x1xi32>
    %3 = tpu.iota {dimensions = array<i32: 1>} : vector<1x16xi32>
    %4 = tpu.iota {dimensions = array<i32: 0>} : vector<16x1xi32>
    %5 = tpu.iota {dimensions = array<i32: 1>} : vector<1x8xi32>
    %c0_1 = arith.constant 0 : index
    %c0_2 = arith.constant 0 : index
    %c0_3 = arith.constant 0 : index
    %6 = vector.load %arg3[%c0_1, %c0_2, %c0_3] : memref<2x8x16xf32, #tpu.memory_space<vmem>>, vector<1x4x16xf32>
    %7 = vector.shape_cast %6 : vector<1x4x16xf32> to vector<4x16xf32>
    %c0_4 = arith.constant 0 : index
    %c4 = arith.constant 4 : index
    %c0_5 = arith.constant 0 : index
    %8 = vector.load %arg3[%c0_4, %c4, %c0_5] : memref<2x8x16xf32, #tpu.memory_space<vmem>>, vector<1x4x16xf32>
    %9 = vector.shape_cast %8 : vector<1x4x16xf32> to vector<4x16xf32>
    %10 = vector.extract_strided_slice %7 {offsets = [0, 0], sizes = [1, 16], strides = [1, 1]} : vector<4x16xf32> to vector<1x16xf32>
    %11 = vector.extract_strided_slice %7 {offsets = [1, 0], sizes = [1, 16], strides = [1, 1]} : vector<4x16xf32> to vector<1x16xf32>
    %12 = vector.extract_strided_slice %7 {offsets = [2, 0], sizes = [1, 16], strides = [1, 1]} : vector<4x16xf32> to vector<1x16xf32>
    %13 = vector.extract_strided_slice %7 {offsets = [3, 0], sizes = [1, 16], strides = [1, 1]} : vector<4x16xf32> to vector<1x16xf32>
    %14 = arith.subf %12, %10 : vector<1x16xf32>
    %15 = arith.subf %13, %11 : vector<1x16xf32>
    %16 = arith.mulf %14, %15 : vector<1x16xf32>
    %17 = vector.broadcast %0 : f32 to vector<4x16xf32>
    %18 = arith.cmpf ogt, %9, %17 : vector<4x16xf32>
    %cst = arith.constant -1.000000e+30 : f32
    %19 = vector.broadcast %cst : f32 to vector<4x16xf32>
    %20 = arith.select %18, %9, %19 : vector<4x16xi1>, vector<4x16xf32>
    %c0_6 = arith.constant 0 : index
    %c0_7 = arith.constant 0 : index
    %21 = vector.load %arg5[%c0_6, %c0_7] : memref<4x16xf32, #tpu.memory_space<vmem>>, vector<4x16xf32>
    tpu.vector_store %arg5[%c0_6, %c0_7], %20 {strides = array<i32>} : memref<4x16xf32, #tpu.memory_space<vmem>>, vector<4x16xf32>,
    %cst_8 = arith.constant dense<0xFF800000> : vector<4xf32>
    %22 = vector.multi_reduction <maximumf>, %20, %cst_8 [1] : vector<4x16xf32> to vector<4xf32>
    %23 = vector.shape_cast %22 : vector<4xf32> to vector<4x1xf32>
    %cst_9 = arith.constant 0.000000e+00 : f32
    %24 = vector.broadcast %cst_9 : f32 to vector<4x8xf32>
    %cst_10 = arith.constant 0.000000e+00 : f32
    %25 = vector.broadcast %cst_10 : f32 to vector<1x8xf32>
    %cst_11 = arith.constant -1.000000e+00 : f32
    %26 = vector.broadcast %cst_11 : f32 to vector<1x8xf32>
    %cst_12 = arith.constant 0.000000e+00 : f32
    %27 = vector.broadcast %cst_12 : f32 to vector<1x8xf32>
    %c0_i32 = arith.constant 0 : i32
    %28 = vector.shape_cast %23 : vector<4x1xf32> to vector<1x4x1xf32>
    %cst_13 = arith.constant dense<0xFF800000> : vector<1xf32>
    %29 = vector.multi_reduction <maximumf>, %28, %cst_13 [1, 2] : vector<1x4x1xf32> to vector<1xf32>
    %30 = vector.shape_cast %29 : vector<1xf32> to vector<1x1x1xf32>
    %31 = vector.extract %30[0, 0, 0] : f32 from vector<1x1x1xf32>
    %cst_14 = arith.constant -1.000000e+29 : f32
    %32 = arith.cmpf ogt, %31, %cst_14 : f32
    %33 = vector.broadcast %31 : f32 to vector<4x1xf32>
    %34 = arith.cmpf oge, %23, %33 : vector<4x1xf32>
    %c4_i32 = arith.constant 4 : i32
    %35 = vector.broadcast %c4_i32 : i32 to vector<4x1xi32>
    %36 = arith.select %34, %2, %35 : vector<4x1xi1>, vector<4x1xi32>
    %37 = vector.shape_cast %36 : vector<4x1xi32> to vector<1x4x1xi32>
    %cst_15 = arith.constant dense<2147483647> : vector<1xi32>
    %38 = vector.multi_reduction <minsi>, %37, %cst_15 [1, 2] : vector<1x4x1xi32> to vector<1xi32>
    %39 = vector.shape_cast %38 : vector<1xi32> to vector<1x1x1xi32>
    %40 = vector.extract %39[0, 0, 0] : i32 from vector<1x1x1xi32>
    %41 = arith.index_cast %40 : i32 to index
    %c0_16 = arith.constant 0 : index
    %42 = vector.load %arg5[%41, %c0_16] : memref<4x16xf32, #tpu.memory_space<vmem>>, vector<1x16xf32>
    %43 = vector.broadcast %31 : f32 to vector<1x16xf32>
    %44 = arith.cmpf oge, %42, %43 : vector<1x16xf32>
    %c16_i32 = arith.constant 16 : i32
    %45 = vector.broadcast %c16_i32 : i32 to vector<1x16xi32>
    %46 = arith.select %44, %3, %45 : vector<1x16xi1>, vector<1x16xi32>
    %47 = vector.shape_cast %46 : vector<1x16xi32> to vector<1x1x16xi32>
    %cst_17 = arith.constant dense<2147483647> : vector<1xi32>
    %48 = vector.multi_reduction <minsi>, %47, %cst_17 [1, 2] : vector<1x1x16xi32> to vector<1xi32>
    %49 = vector.shape_cast %48 : vector<1xi32> to vector<1x1x1xi32>
    %50 = vector.extract %49[0, 0, 0] : i32 from vector<1x1x1xi32>
    %51 = vector.broadcast %50 : i32 to vector<16x1xi32>
    %52 = arith.cmpi eq, %4, %51 : vector<16x1xi32>
    %53 = arith.extui %52 : vector<16x1xi1> to vector<16x1xi32>
    %54 = arith.sitofp %53 : vector<16x1xi32> to vector<16x1xf32>
    %cst_18 = arith.constant dense<0.000000e+00> : vector<4x1xf32>
    %55 = tpu.matmul %7, %54, %cst_18 {dimension_numbers = #tpu.dot_dimension_numbers<[1], [0], [0], [1], [0, 0, 1, 1], [], []>} : vector<4x16xf32>, vector<16x1xf32>, vector<4x1xf32> -> vector<4x1xf32>
    %56 = vector.extract_strided_slice %55 {offsets = [0, 0], sizes = [1, 1], strides = [1, 1]} : vector<4x1xf32> to vector<1x1xf32>
    %57 = vector.extract_strided_slice %55 {offsets = [1, 0], sizes = [1, 1], strides = [1, 1]} : vector<4x1xf32> to vector<1x1xf32>
    %58 = vector.extract_strided_slice %55 {offsets = [2, 0], sizes = [1, 1], strides = [1, 1]} : vector<4x1xf32> to vector<1x1xf32>
    %59 = vector.extract_strided_slice %55 {offsets = [3, 0], sizes = [1, 1], strides = [1, 1]} : vector<4x1xf32> to vector<1x1xf32>
    %60 = vector.broadcast %56 : vector<1x1xf32> to vector<1x16xf32>
    %61 = arith.maximumf %10, %60 : vector<1x16xf32>
    %62 = vector.broadcast %57 : vector<1x1xf32> to vector<1x16xf32>
    %63 = arith.maximumf %11, %62 : vector<1x16xf32>
    %64 = vector.broadcast %58 : vector<1x1xf32> to vector<1x16xf32>
    %65 = arith.minimumf %12, %64 : vector<1x16xf32>
    %66 = vector.broadcast %59 : vector<1x1xf32> to vector<1x16xf32>
    %67 = arith.minimumf %13, %66 : vector<1x16xf32>
    %68 = arith.subf %65, %61 : vector<1x16xf32>
    %cst_19 = arith.constant 0.000000e+00 : f32
    %69 = vector.broadcast %cst_19 : f32 to vector<1x16xf32>
    %70 = arith.maximumf %68, %69 : vector<1x16xf32>
    %71 = arith.subf %67, %63 : vector<1x16xf32>
    %cst_20 = arith.constant 0.000000e+00 : f32
    %72 = vector.broadcast %cst_20 : f32 to vector<1x16xf32>
    %73 = arith.maximumf %71, %72 : vector<1x16xf32>
    %74 = arith.mulf %70, %73 : vector<1x16xf32>
    %75 = arith.subf %58, %56 : vector<1x1xf32>
    %76 = arith.subf %59, %57 : vector<1x1xf32>
    %77 = arith.mulf %75, %76 : vector<1x1xf32>
    %78 = vector.broadcast %77 : vector<1x1xf32> to vector<1x16xf32>
    %79 = arith.addf %16, %78 : vector<1x16xf32>
    %80 = arith.subf %79, %74 : vector<1x16xf32>
    %81 = vector.broadcast %1 : f32 to vector<1x16xf32>
    %82 = arith.mulf %81, %80 : vector<1x16xf32>
    %83 = arith.cmpf ogt, %74, %82 : vector<1x16xf32>
    %84 = vector.broadcast %50 : i32 to vector<1x16xi32>
    %85 = arith.cmpi eq, %3, %84 : vector<1x16xi32>
    %86 = arith.ori %83, %85 : vector<1x16xi1>
    %cst_21 = arith.constant -1.000000e+30 : f32
    %87 = vector.broadcast %cst_21 : f32 to vector<1x16xf32>
    %88 = arith.select %86, %87, %42 : vector<1x16xi1>, vector<1x16xf32>
    %89 = arith.index_cast %40 : i32 to index
    %c0_22 = arith.constant 0 : index
    %90 = vector.load %arg5[%89, %c0_22] : memref<4x16xf32, #tpu.memory_space<vmem>>, vector<1x16xf32>
    tpu.vector_store %arg5[%89, %c0_22], %88 {strides = array<i32>} : memref<4x16xf32, #tpu.memory_space<vmem>>, vector<1x16xf32>,
    %91 = vector.broadcast %40 : i32 to vector<4x1xi32>
    %92 = arith.cmpi eq, %2, %91 : vector<4x1xi32>
    %93 = vector.shape_cast %88 : vector<1x16xf32> to vector<1x1x16xf32>
    %cst_23 = arith.constant dense<0xFF800000> : vector<1xf32>
    %94 = vector.multi_reduction <maximumf>, %93, %cst_23 [1, 2] : vector<1x1x16xf32> to vector<1xf32>
    %95 = vector.shape_cast %94 : vector<1xf32> to vector<1x1x1xf32>
    %96 = vector.extract %95[0, 0, 0] : f32 from vector<1x1x1xf32>
    %97 = vector.broadcast %96 : f32 to vector<4x1xf32>
    %98 = arith.select %92, %97, %23 : vector<4x1xi1>, vector<4x1xf32>
    %99 = vector.broadcast %c0_i32 : i32 to vector<1x8xi32>
    %100 = arith.cmpi eq, %5, %99 : vector<1x8xi32>
    %101 = vector.broadcast %32 : i1 to vector<1x8xi1>
    %102 = arith.andi %100, %101 : vector<1x8xi1>
    %103 = vector.shape_cast %102 : vector<1x8xi1> to vector<1x8xi1>
    %104 = vector.broadcast %103 : vector<1x8xi1> to vector<4x8xi1>
    %105 = vector.shape_cast %55 : vector<4x1xf32> to vector<4x1xf32>
    %106 = vector.broadcast %105 : vector<4x1xf32> to vector<4x8xf32>
    %107 = arith.select %104, %106, %24 : vector<4x8xi1>, vector<4x8xf32>
    %108 = vector.broadcast %31 : f32 to vector<1x8xf32>
    %109 = arith.select %102, %108, %25 : vector<1x8xi1>, vector<1x8xf32>
    %110 = arith.sitofp %40 : i32 to f32
    %111 = vector.broadcast %110 : f32 to vector<1x8xf32>
    %112 = arith.select %102, %111, %26 : vector<1x8xi1>, vector<1x8xf32>
    %cst_24 = arith.constant 1.000000e+00 : f32
    %113 = vector.broadcast %cst_24 : f32 to vector<1x8xf32>
    %114 = arith.select %102, %113, %27 : vector<1x8xi1>, vector<1x8xf32>
    %c1_i32 = arith.constant 1 : i32
    %115 = vector.shape_cast %98 : vector<4x1xf32> to vector<1x4x1xf32>
    %cst_25 = arith.constant dense<0xFF800000> : vector<1xf32>
    %116 = vector.multi_reduction <maximumf>, %115, %cst_25 [1, 2] : vector<1x4x1xf32> to vector<1xf32>
    %117 = vector.shape_cast %116 : vector<1xf32> to vector<1x1x1xf32>
    %118 = vector.extract %117[0, 0, 0] : f32 from vector<1x1x1xf32>
    %cst_26 = arith.constant -1.000000e+29 : f32
    %119 = arith.cmpf ogt, %118, %cst_26 : f32
    %120 = vector.broadcast %118 : f32 to vector<4x1xf32>
    %121 = arith.cmpf oge, %98, %120 : vector<4x1xf32>
    %c4_i32_27 = arith.constant 4 : i32
    %122 = vector.broadcast %c4_i32_27 : i32 to vector<4x1xi32>
    %123 = arith.select %121, %2, %122 : vector<4x1xi1>, vector<4x1xi32>
    %124 = vector.shape_cast %123 : vector<4x1xi32> to vector<1x4x1xi32>
    %cst_28 = arith.constant dense<2147483647> : vector<1xi32>
    %125 = vector.multi_reduction <minsi>, %124, %cst_28 [1, 2] : vector<1x4x1xi32> to vector<1xi32>
    %126 = vector.shape_cast %125 : vector<1xi32> to vector<1x1x1xi32>
    %127 = vector.extract %126[0, 0, 0] : i32 from vector<1x1x1xi32>
    %128 = arith.index_cast %127 : i32 to index
    %c0_29 = arith.constant 0 : index
    %129 = vector.load %arg5[%128, %c0_29] : memref<4x16xf32, #tpu.memory_space<vmem>>, vector<1x16xf32>
    %130 = vector.broadcast %118 : f32 to vector<1x16xf32>
    %131 = arith.cmpf oge, %129, %130 : vector<1x16xf32>
    %c16_i32_30 = arith.constant 16 : i32
    %132 = vector.broadcast %c16_i32_30 : i32 to vector<1x16xi32>
    %133 = arith.select %131, %3, %132 : vector<1x16xi1>, vector<1x16xi32>
    %134 = vector.shape_cast %133 : vector<1x16xi32> to vector<1x1x16xi32>
    %cst_31 = arith.constant dense<2147483647> : vector<1xi32>
    %135 = vector.multi_reduction <minsi>, %134, %cst_31 [1, 2] : vector<1x1x16xi32> to vector<1xi32>
    %136 = vector.shape_cast %135 : vector<1xi32> to vector<1x1x1xi32>
    %137 = vector.extract %136[0, 0, 0] : i32 from vector<1x1x1xi32>
    %138 = vector.broadcast %137 : i32 to vector<16x1xi32>
    %139 = arith.cmpi eq, %4, %138 : vector<16x1xi32>
    %140 = arith.extui %139 : vector<16x1xi1> to vector<16x1xi32>
    %141 = arith.sitofp %140 : vector<16x1xi32> to vector<16x1xf32>
    %cst_32 = arith.constant dense<0.000000e+00> : vector<4x1xf32>
    %142 = tpu.matmul %7, %141, %cst_32 {dimension_numbers = #tpu.dot_dimension_numbers<[1], [0], [0], [1], [0, 0, 1, 1], [], []>} : vector<4x16xf32>, vector<16x1xf32>, vector<4x1xf32> -> vector<4x1xf32>
    %143 = vector.extract_strided_slice %142 {offsets = [0, 0], sizes = [1, 1], strides = [1, 1]} : vector<4x1xf32> to vector<1x1xf32>
    %144 = vector.extract_strided_slice %142 {offsets = [1, 0], sizes = [1, 1], strides = [1, 1]} : vector<4x1xf32> to vector<1x1xf32>
    %145 = vector.extract_strided_slice %142 {offsets = [2, 0], sizes = [1, 1], strides = [1, 1]} : vector<4x1xf32> to vector<1x1xf32>
    %146 = vector.extract_strided_slice %142 {offsets = [3, 0], sizes = [1, 1], strides = [1, 1]} : vector<4x1xf32> to vector<1x1xf32>
    %147 = vector.broadcast %143 : vector<1x1xf32> to vector<1x16xf32>
    %148 = arith.maximumf %10, %147 : vector<1x16xf32>
    %149 = vector.broadcast %144 : vector<1x1xf32> to vector<1x16xf32>
    %150 = arith.maximumf %11, %149 : vector<1x16xf32>
    %151 = vector.broadcast %145 : vector<1x1xf32> to vector<1x16xf32>
    %152 = arith.minimumf %12, %151 : vector<1x16xf32>
    %153 = vector.broadcast %146 : vector<1x1xf32> to vector<1x16xf32>
    %154 = arith.minimumf %13, %153 : vector<1x16xf32>
    %155 = arith.subf %152, %148 : vector<1x16xf32>
    %cst_33 = arith.constant 0.000000e+00 : f32
    %156 = vector.broadcast %cst_33 : f32 to vector<1x16xf32>
    %157 = arith.maximumf %155, %156 : vector<1x16xf32>
    %158 = arith.subf %154, %150 : vector<1x16xf32>
    %cst_34 = arith.constant 0.000000e+00 : f32
    %159 = vector.broadcast %cst_34 : f32 to vector<1x16xf32>
    %160 = arith.maximumf %158, %159 : vector<1x16xf32>
    %161 = arith.mulf %157, %160 : vector<1x16xf32>
    %162 = arith.subf %145, %143 : vector<1x1xf32>
    %163 = arith.subf %146, %144 : vector<1x1xf32>
    %164 = arith.mulf %162, %163 : vector<1x1xf32>
    %165 = vector.broadcast %164 : vector<1x1xf32> to vector<1x16xf32>
    %166 = arith.addf %16, %165 : vector<1x16xf32>
    %167 = arith.subf %166, %161 : vector<1x16xf32>
    %168 = vector.broadcast %1 : f32 to vector<1x16xf32>
    %169 = arith.mulf %168, %167 : vector<1x16xf32>
    %170 = arith.cmpf ogt, %161, %169 : vector<1x16xf32>
    %171 = vector.broadcast %137 : i32 to vector<1x16xi32>
    %172 = arith.cmpi eq, %3, %171 : vector<1x16xi32>
    %173 = arith.ori %170, %172 : vector<1x16xi1>
    %cst_35 = arith.constant -1.000000e+30 : f32
    %174 = vector.broadcast %cst_35 : f32 to vector<1x16xf32>
    %175 = arith.select %173, %174, %129 : vector<1x16xi1>, vector<1x16xf32>
    %176 = arith.index_cast %127 : i32 to index
    %c0_36 = arith.constant 0 : index
    %177 = vector.load %arg5[%176, %c0_36] : memref<4x16xf32, #tpu.memory_space<vmem>>, vector<1x16xf32>
    tpu.vector_store %arg5[%176, %c0_36], %175 {strides = array<i32>} : memref<4x16xf32, #tpu.memory_space<vmem>>, vector<1x16xf32>,
    %178 = vector.broadcast %127 : i32 to vector<4x1xi32>
    %179 = arith.cmpi eq, %2, %178 : vector<4x1xi32>
    %180 = vector.shape_cast %175 : vector<1x16xf32> to vector<1x1x16xf32>
    %cst_37 = arith.constant dense<0xFF800000> : vector<1xf32>
    %181 = vector.multi_reduction <maximumf>, %180, %cst_37 [1, 2] : vector<1x1x16xf32> to vector<1xf32>
    %182 = vector.shape_cast %181 : vector<1xf32> to vector<1x1x1xf32>
    %183 = vector.extract %182[0, 0, 0] : f32 from vector<1x1x1xf32>
    %184 = vector.broadcast %183 : f32 to vector<4x1xf32>
    %185 = arith.select %179, %184, %98 : vector<4x1xi1>, vector<4x1xf32>
    %186 = vector.broadcast %c1_i32 : i32 to vector<1x8xi32>
    %187 = arith.cmpi eq, %5, %186 : vector<1x8xi32>
    %188 = vector.broadcast %119 : i1 to vector<1x8xi1>
    %189 = arith.andi %187, %188 : vector<1x8xi1>
    %190 = vector.shape_cast %189 : vector<1x8xi1> to vector<1x8xi1>
    %191 = vector.broadcast %190 : vector<1x8xi1> to vector<4x8xi1>
    %192 = vector.shape_cast %142 : vector<4x1xf32> to vector<4x1xf32>
    %193 = vector.broadcast %192 : vector<4x1xf32> to vector<4x8xf32>
    %194 = arith.select %191, %193, %107 : vector<4x8xi1>, vector<4x8xf32>
    %195 = vector.broadcast %118 : f32 to vector<1x8xf32>
    %196 = arith.select %189, %195, %109 : vector<1x8xi1>, vector<1x8xf32>
    %197 = arith.sitofp %127 : i32 to f32
    %198 = vector.broadcast %197 : f32 to vector<1x8xf32>
    %199 = arith.select %189, %198, %112 : vector<1x8xi1>, vector<1x8xf32>
    %cst_38 = arith.constant 1.000000e+00 : f32
    %200 = vector.broadcast %cst_38 : f32 to vector<1x8xf32>
    %201 = arith.select %189, %200, %114 : vector<1x8xi1>, vector<1x8xf32>
    %c2_i32 = arith.constant 2 : i32
    %202 = vector.shape_cast %185 : vector<4x1xf32> to vector<1x4x1xf32>
    %cst_39 = arith.constant dense<0xFF800000> : vector<1xf32>
    %203 = vector.multi_reduction <maximumf>, %202, %cst_39 [1, 2] : vector<1x4x1xf32> to vector<1xf32>
    %204 = vector.shape_cast %203 : vector<1xf32> to vector<1x1x1xf32>
    %205 = vector.extract %204[0, 0, 0] : f32 from vector<1x1x1xf32>
    %cst_40 = arith.constant -1.000000e+29 : f32
    %206 = arith.cmpf ogt, %205, %cst_40 : f32
    %207 = vector.broadcast %205 : f32 to vector<4x1xf32>
    %208 = arith.cmpf oge, %185, %207 : vector<4x1xf32>
    %c4_i32_41 = arith.constant 4 : i32
    %209 = vector.broadcast %c4_i32_41 : i32 to vector<4x1xi32>
    %210 = arith.select %208, %2, %209 : vector<4x1xi1>, vector<4x1xi32>
    %211 = vector.shape_cast %210 : vector<4x1xi32> to vector<1x4x1xi32>
    %cst_42 = arith.constant dense<2147483647> : vector<1xi32>
    %212 = vector.multi_reduction <minsi>, %211, %cst_42 [1, 2] : vector<1x4x1xi32> to vector<1xi32>
    %213 = vector.shape_cast %212 : vector<1xi32> to vector<1x1x1xi32>
    %214 = vector.extract %213[0, 0, 0] : i32 from vector<1x1x1xi32>
    %215 = arith.index_cast %214 : i32 to index
    %c0_43 = arith.constant 0 : index
    %216 = vector.load %arg5[%215, %c0_43] : memref<4x16xf32, #tpu.memory_space<vmem>>, vector<1x16xf32>
    %217 = vector.broadcast %205 : f32 to vector<1x16xf32>
    %218 = arith.cmpf oge, %216, %217 : vector<1x16xf32>
    %c16_i32_44 = arith.constant 16 : i32
    %219 = vector.broadcast %c16_i32_44 : i32 to vector<1x16xi32>
    %220 = arith.select %218, %3, %219 : vector<1x16xi1>, vector<1x16xi32>
    %221 = vector.shape_cast %220 : vector<1x16xi32> to vector<1x1x16xi32>
    %cst_45 = arith.constant dense<2147483647> : vector<1xi32>
    %222 = vector.multi_reduction <minsi>, %221, %cst_45 [1, 2] : vector<1x1x16xi32> to vector<1xi32>
    %223 = vector.shape_cast %222 : vector<1xi32> to vector<1x1x1xi32>
    %224 = vector.extract %223[0, 0, 0] : i32 from vector<1x1x1xi32>
    %225 = vector.broadcast %224 : i32 to vector<16x1xi32>
    %226 = arith.cmpi eq, %4, %225 : vector<16x1xi32>
    %227 = arith.extui %226 : vector<16x1xi1> to vector<16x1xi32>
    %228 = arith.sitofp %227 : vector<16x1xi32> to vector<16x1xf32>
    %cst_46 = arith.constant dense<0.000000e+00> : vector<4x1xf32>
    %229 = tpu.matmul %7, %228, %cst_46 {dimension_numbers = #tpu.dot_dimension_numbers<[1], [0], [0], [1], [0, 0, 1, 1], [], []>} : vector<4x16xf32>, vector<16x1xf32>, vector<4x1xf32> -> vector<4x1xf32>
    %230 = vector.extract_strided_slice %229 {offsets = [0, 0], sizes = [1, 1], strides = [1, 1]} : vector<4x1xf32> to vector<1x1xf32>
    %231 = vector.extract_strided_slice %229 {offsets = [1, 0], sizes = [1, 1], strides = [1, 1]} : vector<4x1xf32> to vector<1x1xf32>
    %232 = vector.extract_strided_slice %229 {offsets = [2, 0], sizes = [1, 1], strides = [1, 1]} : vector<4x1xf32> to vector<1x1xf32>
    %233 = vector.extract_strided_slice %229 {offsets = [3, 0], sizes = [1, 1], strides = [1, 1]} : vector<4x1xf32> to vector<1x1xf32>
    %234 = vector.broadcast %230 : vector<1x1xf32> to vector<1x16xf32>
    %235 = arith.maximumf %10, %234 : vector<1x16xf32>
    %236 = vector.broadcast %231 : vector<1x1xf32> to vector<1x16xf32>
    %237 = arith.maximumf %11, %236 : vector<1x16xf32>
    %238 = vector.broadcast %232 : vector<1x1xf32> to vector<1x16xf32>
    %239 = arith.minimumf %12, %238 : vector<1x16xf32>
    %240 = vector.broadcast %233 : vector<1x1xf32> to vector<1x16xf32>
    %241 = arith.minimumf %13, %240 : vector<1x16xf32>
    %242 = arith.subf %239, %235 : vector<1x16xf32>
    %cst_47 = arith.constant 0.000000e+00 : f32
    %243 = vector.broadcast %cst_47 : f32 to vector<1x16xf32>
    %244 = arith.maximumf %242, %243 : vector<1x16xf32>
    %245 = arith.subf %241, %237 : vector<1x16xf32>
    %cst_48 = arith.constant 0.000000e+00 : f32
    %246 = vector.broadcast %cst_48 : f32 to vector<1x16xf32>
    %247 = arith.maximumf %245, %246 : vector<1x16xf32>
    %248 = arith.mulf %244, %247 : vector<1x16xf32>
    %249 = arith.subf %232, %230 : vector<1x1xf32>
    %250 = arith.subf %233, %231 : vector<1x1xf32>
    %251 = arith.mulf %249, %250 : vector<1x1xf32>
    %252 = vector.broadcast %251 : vector<1x1xf32> to vector<1x16xf32>
    %253 = arith.addf %16, %252 : vector<1x16xf32>
    %254 = arith.subf %253, %248 : vector<1x16xf32>
    %255 = vector.broadcast %1 : f32 to vector<1x16xf32>
    %256 = arith.mulf %255, %254 : vector<1x16xf32>
    %257 = arith.cmpf ogt, %248, %256 : vector<1x16xf32>
    %258 = vector.broadcast %224 : i32 to vector<1x16xi32>
    %259 = arith.cmpi eq, %3, %258 : vector<1x16xi32>
    %260 = arith.ori %257, %259 : vector<1x16xi1>
    %cst_49 = arith.constant -1.000000e+30 : f32
    %261 = vector.broadcast %cst_49 : f32 to vector<1x16xf32>
    %262 = arith.select %260, %261, %216 : vector<1x16xi1>, vector<1x16xf32>
    %263 = arith.index_cast %214 : i32 to index
    %c0_50 = arith.constant 0 : index
    %264 = vector.load %arg5[%263, %c0_50] : memref<4x16xf32, #tpu.memory_space<vmem>>, vector<1x16xf32>
    tpu.vector_store %arg5[%263, %c0_50], %262 {strides = array<i32>} : memref<4x16xf32, #tpu.memory_space<vmem>>, vector<1x16xf32>,
    %265 = vector.broadcast %214 : i32 to vector<4x1xi32>
    %266 = arith.cmpi eq, %2, %265 : vector<4x1xi32>
    %267 = vector.shape_cast %262 : vector<1x16xf32> to vector<1x1x16xf32>
    %cst_51 = arith.constant dense<0xFF800000> : vector<1xf32>
    %268 = vector.multi_reduction <maximumf>, %267, %cst_51 [1, 2] : vector<1x1x16xf32> to vector<1xf32>
    %269 = vector.shape_cast %268 : vector<1xf32> to vector<1x1x1xf32>
    %270 = vector.extract %269[0, 0, 0] : f32 from vector<1x1x1xf32>
    %271 = vector.broadcast %270 : f32 to vector<4x1xf32>
    %272 = arith.select %266, %271, %185 : vector<4x1xi1>, vector<4x1xf32>
    %273 = vector.broadcast %c2_i32 : i32 to vector<1x8xi32>
    %274 = arith.cmpi eq, %5, %273 : vector<1x8xi32>
    %275 = vector.broadcast %206 : i1 to vector<1x8xi1>
    %276 = arith.andi %274, %275 : vector<1x8xi1>
    %277 = vector.shape_cast %276 : vector<1x8xi1> to vector<1x8xi1>
    %278 = vector.broadcast %277 : vector<1x8xi1> to vector<4x8xi1>
    %279 = vector.shape_cast %229 : vector<4x1xf32> to vector<4x1xf32>
    %280 = vector.broadcast %279 : vector<4x1xf32> to vector<4x8xf32>
    %281 = arith.select %278, %280, %194 : vector<4x8xi1>, vector<4x8xf32>
    %282 = vector.broadcast %205 : f32 to vector<1x8xf32>
    %283 = arith.select %276, %282, %196 : vector<1x8xi1>, vector<1x8xf32>
    %284 = arith.sitofp %214 : i32 to f32
    %285 = vector.broadcast %284 : f32 to vector<1x8xf32>
    %286 = arith.select %276, %285, %199 : vector<1x8xi1>, vector<1x8xf32>
    %cst_52 = arith.constant 1.000000e+00 : f32
    %287 = vector.broadcast %cst_52 : f32 to vector<1x8xf32>
    %288 = arith.select %276, %287, %201 : vector<1x8xi1>, vector<1x8xf32>
    %c3_i32 = arith.constant 3 : i32
    %289 = vector.shape_cast %272 : vector<4x1xf32> to vector<1x4x1xf32>
    %cst_53 = arith.constant dense<0xFF800000> : vector<1xf32>
    %290 = vector.multi_reduction <maximumf>, %289, %cst_53 [1, 2] : vector<1x4x1xf32> to vector<1xf32>
    %291 = vector.shape_cast %290 : vector<1xf32> to vector<1x1x1xf32>
    %292 = vector.extract %291[0, 0, 0] : f32 from vector<1x1x1xf32>
    %cst_54 = arith.constant -1.000000e+29 : f32
    %293 = arith.cmpf ogt, %292, %cst_54 : f32
    %294 = vector.broadcast %292 : f32 to vector<4x1xf32>
    %295 = arith.cmpf oge, %272, %294 : vector<4x1xf32>
    %c4_i32_55 = arith.constant 4 : i32
    %296 = vector.broadcast %c4_i32_55 : i32 to vector<4x1xi32>
    %297 = arith.select %295, %2, %296 : vector<4x1xi1>, vector<4x1xi32>
    %298 = vector.shape_cast %297 : vector<4x1xi32> to vector<1x4x1xi32>
    %cst_56 = arith.constant dense<2147483647> : vector<1xi32>
    %299 = vector.multi_reduction <minsi>, %298, %cst_56 [1, 2] : vector<1x4x1xi32> to vector<1xi32>
    %300 = vector.shape_cast %299 : vector<1xi32> to vector<1x1x1xi32>
    %301 = vector.extract %300[0, 0, 0] : i32 from vector<1x1x1xi32>
    %302 = arith.index_cast %301 : i32 to index
    %c0_57 = arith.constant 0 : index
    %303 = vector.load %arg5[%302, %c0_57] : memref<4x16xf32, #tpu.memory_space<vmem>>, vector<1x16xf32>
    %304 = vector.broadcast %292 : f32 to vector<1x16xf32>
    %305 = arith.cmpf oge, %303, %304 : vector<1x16xf32>
    %c16_i32_58 = arith.constant 16 : i32
    %306 = vector.broadcast %c16_i32_58 : i32 to vector<1x16xi32>
    %307 = arith.select %305, %3, %306 : vector<1x16xi1>, vector<1x16xi32>
    %308 = vector.shape_cast %307 : vector<1x16xi32> to vector<1x1x16xi32>
    %cst_59 = arith.constant dense<2147483647> : vector<1xi32>
    %309 = vector.multi_reduction <minsi>, %308, %cst_59 [1, 2] : vector<1x1x16xi32> to vector<1xi32>
    %310 = vector.shape_cast %309 : vector<1xi32> to vector<1x1x1xi32>
    %311 = vector.extract %310[0, 0, 0] : i32 from vector<1x1x1xi32>
    %312 = vector.broadcast %311 : i32 to vector<16x1xi32>
    %313 = arith.cmpi eq, %4, %312 : vector<16x1xi32>
    %314 = arith.extui %313 : vector<16x1xi1> to vector<16x1xi32>
    %315 = arith.sitofp %314 : vector<16x1xi32> to vector<16x1xf32>
    %cst_60 = arith.constant dense<0.000000e+00> : vector<4x1xf32>
    %316 = tpu.matmul %7, %315, %cst_60 {dimension_numbers = #tpu.dot_dimension_numbers<[1], [0], [0], [1], [0, 0, 1, 1], [], []>} : vector<4x16xf32>, vector<16x1xf32>, vector<4x1xf32> -> vector<4x1xf32>
    %317 = vector.extract_strided_slice %316 {offsets = [0, 0], sizes = [1, 1], strides = [1, 1]} : vector<4x1xf32> to vector<1x1xf32>
    %318 = vector.extract_strided_slice %316 {offsets = [1, 0], sizes = [1, 1], strides = [1, 1]} : vector<4x1xf32> to vector<1x1xf32>
    %319 = vector.extract_strided_slice %316 {offsets = [2, 0], sizes = [1, 1], strides = [1, 1]} : vector<4x1xf32> to vector<1x1xf32>
    %320 = vector.extract_strided_slice %316 {offsets = [3, 0], sizes = [1, 1], strides = [1, 1]} : vector<4x1xf32> to vector<1x1xf32>
    %321 = vector.broadcast %317 : vector<1x1xf32> to vector<1x16xf32>
    %322 = arith.maximumf %10, %321 : vector<1x16xf32>
    %323 = vector.broadcast %318 : vector<1x1xf32> to vector<1x16xf32>
    %324 = arith.maximumf %11, %323 : vector<1x16xf32>
    %325 = vector.broadcast %319 : vector<1x1xf32> to vector<1x16xf32>
    %326 = arith.minimumf %12, %325 : vector<1x16xf32>
    %327 = vector.broadcast %320 : vector<1x1xf32> to vector<1x16xf32>
    %328 = arith.minimumf %13, %327 : vector<1x16xf32>
    %329 = arith.subf %326, %322 : vector<1x16xf32>
    %cst_61 = arith.constant 0.000000e+00 : f32
    %330 = vector.broadcast %cst_61 : f32 to vector<1x16xf32>
    %331 = arith.maximumf %329, %330 : vector<1x16xf32>
    %332 = arith.subf %328, %324 : vector<1x16xf32>
    %cst_62 = arith.constant 0.000000e+00 : f32
    %333 = vector.broadcast %cst_62 : f32 to vector<1x16xf32>
    %334 = arith.maximumf %332, %333 : vector<1x16xf32>
    %335 = arith.mulf %331, %334 : vector<1x16xf32>
    %336 = arith.subf %319, %317 : vector<1x1xf32>
    %337 = arith.subf %320, %318 : vector<1x1xf32>
    %338 = arith.mulf %336, %337 : vector<1x1xf32>
    %339 = vector.broadcast %338 : vector<1x1xf32> to vector<1x16xf32>
    %340 = arith.addf %16, %339 : vector<1x16xf32>
    %341 = arith.subf %340, %335 : vector<1x16xf32>
    %342 = vector.broadcast %1 : f32 to vector<1x16xf32>
    %343 = arith.mulf %342, %341 : vector<1x16xf32>
    %344 = arith.cmpf ogt, %335, %343 : vector<1x16xf32>
    %345 = vector.broadcast %311 : i32 to vector<1x16xi32>
    %346 = arith.cmpi eq, %3, %345 : vector<1x16xi32>
    %347 = arith.ori %344, %346 : vector<1x16xi1>
    %cst_63 = arith.constant -1.000000e+30 : f32
    %348 = vector.broadcast %cst_63 : f32 to vector<1x16xf32>
    %349 = arith.select %347, %348, %303 : vector<1x16xi1>, vector<1x16xf32>
    %350 = arith.index_cast %301 : i32 to index
    %c0_64 = arith.constant 0 : index
    %351 = vector.load %arg5[%350, %c0_64] : memref<4x16xf32, #tpu.memory_space<vmem>>, vector<1x16xf32>
    tpu.vector_store %arg5[%350, %c0_64], %349 {strides = array<i32>} : memref<4x16xf32, #tpu.memory_space<vmem>>, vector<1x16xf32>,
    %352 = vector.broadcast %301 : i32 to vector<4x1xi32>
    %353 = arith.cmpi eq, %2, %352 : vector<4x1xi32>
    %354 = vector.shape_cast %349 : vector<1x16xf32> to vector<1x1x16xf32>
    %cst_65 = arith.constant dense<0xFF800000> : vector<1xf32>
    %355 = vector.multi_reduction <maximumf>, %354, %cst_65 [1, 2] : vector<1x1x16xf32> to vector<1xf32>
    %356 = vector.shape_cast %355 : vector<1xf32> to vector<1x1x1xf32>
    %357 = vector.extract %356[0, 0, 0] : f32 from vector<1x1x1xf32>
    %358 = vector.broadcast %357 : f32 to vector<4x1xf32>
    %359 = arith.select %353, %358, %272 : vector<4x1xi1>, vector<4x1xf32>
    %360 = vector.broadcast %c3_i32 : i32 to vector<1x8xi32>
    %361 = arith.cmpi eq, %5, %360 : vector<1x8xi32>
    %362 = vector.broadcast %293 : i1 to vector<1x8xi1>
    %363 = arith.andi %361, %362 : vector<1x8xi1>
    %364 = vector.shape_cast %363 : vector<1x8xi1> to vector<1x8xi1>
    %365 = vector.broadcast %364 : vector<1x8xi1> to vector<4x8xi1>
    %366 = vector.shape_cast %316 : vector<4x1xf32> to vector<4x1xf32>
    %367 = vector.broadcast %366 : vector<4x1xf32> to vector<4x8xf32>
    %368 = arith.select %365, %367, %281 : vector<4x8xi1>, vector<4x8xf32>
    %369 = vector.broadcast %292 : f32 to vector<1x8xf32>
    %370 = arith.select %363, %369, %283 : vector<1x8xi1>, vector<1x8xf32>
    %371 = arith.sitofp %301 : i32 to f32
    %372 = vector.broadcast %371 : f32 to vector<1x8xf32>
    %373 = arith.select %363, %372, %286 : vector<1x8xi1>, vector<1x8xf32>
    %cst_66 = arith.constant 1.000000e+00 : f32
    %374 = vector.broadcast %cst_66 : f32 to vector<1x8xf32>
    %375 = arith.select %363, %374, %288 : vector<1x8xi1>, vector<1x8xf32>
    %c4_i32_67 = arith.constant 4 : i32
    %376 = vector.shape_cast %359 : vector<4x1xf32> to vector<1x4x1xf32>
    %cst_68 = arith.constant dense<0xFF800000> : vector<1xf32>
    %377 = vector.multi_reduction <maximumf>, %376, %cst_68 [1, 2] : vector<1x4x1xf32> to vector<1xf32>
    %378 = vector.shape_cast %377 : vector<1xf32> to vector<1x1x1xf32>
    %379 = vector.extract %378[0, 0, 0] : f32 from vector<1x1x1xf32>
    %cst_69 = arith.constant -1.000000e+29 : f32
    %380 = arith.cmpf ogt, %379, %cst_69 : f32
    %381 = vector.broadcast %379 : f32 to vector<4x1xf32>
    %382 = arith.cmpf oge, %359, %381 : vector<4x1xf32>
    %c4_i32_70 = arith.constant 4 : i32
    %383 = vector.broadcast %c4_i32_70 : i32 to vector<4x1xi32>
    %384 = arith.select %382, %2, %383 : vector<4x1xi1>, vector<4x1xi32>
    %385 = vector.shape_cast %384 : vector<4x1xi32> to vector<1x4x1xi32>
    %cst_71 = arith.constant dense<2147483647> : vector<1xi32>
    %386 = vector.multi_reduction <minsi>, %385, %cst_71 [1, 2] : vector<1x4x1xi32> to vector<1xi32>
    %387 = vector.shape_cast %386 : vector<1xi32> to vector<1x1x1xi32>
    %388 = vector.extract %387[0, 0, 0] : i32 from vector<1x1x1xi32>
    %389 = arith.index_cast %388 : i32 to index
    %c0_72 = arith.constant 0 : index
    %390 = vector.load %arg5[%389, %c0_72] : memref<4x16xf32, #tpu.memory_space<vmem>>, vector<1x16xf32>
    %391 = vector.broadcast %379 : f32 to vector<1x16xf32>
    %392 = arith.cmpf oge, %390, %391 : vector<1x16xf32>
    %c16_i32_73 = arith.constant 16 : i32
    %393 = vector.broadcast %c16_i32_73 : i32 to vector<1x16xi32>
    %394 = arith.select %392, %3, %393 : vector<1x16xi1>, vector<1x16xi32>
    %395 = vector.shape_cast %394 : vector<1x16xi32> to vector<1x1x16xi32>
    %cst_74 = arith.constant dense<2147483647> : vector<1xi32>
    %396 = vector.multi_reduction <minsi>, %395, %cst_74 [1, 2] : vector<1x1x16xi32> to vector<1xi32>
    %397 = vector.shape_cast %396 : vector<1xi32> to vector<1x1x1xi32>
    %398 = vector.extract %397[0, 0, 0] : i32 from vector<1x1x1xi32>
    %399 = vector.broadcast %398 : i32 to vector<16x1xi32>
    %400 = arith.cmpi eq, %4, %399 : vector<16x1xi32>
    %401 = arith.extui %400 : vector<16x1xi1> to vector<16x1xi32>
    %402 = arith.sitofp %401 : vector<16x1xi32> to vector<16x1xf32>
    %cst_75 = arith.constant dense<0.000000e+00> : vector<4x1xf32>
    %403 = tpu.matmul %7, %402, %cst_75 {dimension_numbers = #tpu.dot_dimension_numbers<[1], [0], [0], [1], [0, 0, 1, 1], [], []>} : vector<4x16xf32>, vector<16x1xf32>, vector<4x1xf32> -> vector<4x1xf32>
    %404 = vector.extract_strided_slice %403 {offsets = [0, 0], sizes = [1, 1], strides = [1, 1]} : vector<4x1xf32> to vector<1x1xf32>
    %405 = vector.extract_strided_slice %403 {offsets = [1, 0], sizes = [1, 1], strides = [1, 1]} : vector<4x1xf32> to vector<1x1xf32>
    %406 = vector.extract_strided_slice %403 {offsets = [2, 0], sizes = [1, 1], strides = [1, 1]} : vector<4x1xf32> to vector<1x1xf32>
    %407 = vector.extract_strided_slice %403 {offsets = [3, 0], sizes = [1, 1], strides = [1, 1]} : vector<4x1xf32> to vector<1x1xf32>
    %408 = vector.broadcast %404 : vector<1x1xf32> to vector<1x16xf32>
    %409 = arith.maximumf %10, %408 : vector<1x16xf32>
    %410 = vector.broadcast %405 : vector<1x1xf32> to vector<1x16xf32>
    %411 = arith.maximumf %11, %410 : vector<1x16xf32>
    %412 = vector.broadcast %406 : vector<1x1xf32> to vector<1x16xf32>
    %413 = arith.minimumf %12, %412 : vector<1x16xf32>
    %414 = vector.broadcast %407 : vector<1x1xf32> to vector<1x16xf32>
    %415 = arith.minimumf %13, %414 : vector<1x16xf32>
    %416 = arith.subf %413, %409 : vector<1x16xf32>
    %cst_76 = arith.constant 0.000000e+00 : f32
    %417 = vector.broadcast %cst_76 : f32 to vector<1x16xf32>
    %418 = arith.maximumf %416, %417 : vector<1x16xf32>
    %419 = arith.subf %415, %411 : vector<1x16xf32>
    %cst_77 = arith.constant 0.000000e+00 : f32
    %420 = vector.broadcast %cst_77 : f32 to vector<1x16xf32>
    %421 = arith.maximumf %419, %420 : vector<1x16xf32>
    %422 = arith.mulf %418, %421 : vector<1x16xf32>
    %423 = arith.subf %406, %404 : vector<1x1xf32>
    %424 = arith.subf %407, %405 : vector<1x1xf32>
    %425 = arith.mulf %423, %424 : vector<1x1xf32>
    %426 = vector.broadcast %425 : vector<1x1xf32> to vector<1x16xf32>
    %427 = arith.addf %16, %426 : vector<1x16xf32>
    %428 = arith.subf %427, %422 : vector<1x16xf32>
    %429 = vector.broadcast %1 : f32 to vector<1x16xf32>
    %430 = arith.mulf %429, %428 : vector<1x16xf32>
    %431 = arith.cmpf ogt, %422, %430 : vector<1x16xf32>
    %432 = vector.broadcast %398 : i32 to vector<1x16xi32>
    %433 = arith.cmpi eq, %3, %432 : vector<1x16xi32>
    %434 = arith.ori %431, %433 : vector<1x16xi1>
    %cst_78 = arith.constant -1.000000e+30 : f32
    %435 = vector.broadcast %cst_78 : f32 to vector<1x16xf32>
    %436 = arith.select %434, %435, %390 : vector<1x16xi1>, vector<1x16xf32>
    %437 = arith.index_cast %388 : i32 to index
    %c0_79 = arith.constant 0 : index
    %438 = vector.load %arg5[%437, %c0_79] : memref<4x16xf32, #tpu.memory_space<vmem>>, vector<1x16xf32>
    tpu.vector_store %arg5[%437, %c0_79], %436 {strides = array<i32>} : memref<4x16xf32, #tpu.memory_space<vmem>>, vector<1x16xf32>,
    %439 = vector.broadcast %388 : i32 to vector<4x1xi32>
    %440 = arith.cmpi eq, %2, %439 : vector<4x1xi32>
    %441 = vector.shape_cast %436 : vector<1x16xf32> to vector<1x1x16xf32>
    %cst_80 = arith.constant dense<0xFF800000> : vector<1xf32>
    %442 = vector.multi_reduction <maximumf>, %441, %cst_80 [1, 2] : vector<1x1x16xf32> to vector<1xf32>
    %443 = vector.shape_cast %442 : vector<1xf32> to vector<1x1x1xf32>
    %444 = vector.extract %443[0, 0, 0] : f32 from vector<1x1x1xf32>
    %445 = vector.broadcast %444 : f32 to vector<4x1xf32>
    %446 = arith.select %440, %445, %359 : vector<4x1xi1>, vector<4x1xf32>
    %447 = vector.broadcast %c4_i32_67 : i32 to vector<1x8xi32>
    %448 = arith.cmpi eq, %5, %447 : vector<1x8xi32>
    %449 = vector.broadcast %380 : i1 to vector<1x8xi1>
    %450 = arith.andi %448, %449 : vector<1x8xi1>
    %451 = vector.shape_cast %450 : vector<1x8xi1> to vector<1x8xi1>
    %452 = vector.broadcast %451 : vector<1x8xi1> to vector<4x8xi1>
    %453 = vector.shape_cast %403 : vector<4x1xf32> to vector<4x1xf32>
    %454 = vector.broadcast %453 : vector<4x1xf32> to vector<4x8xf32>
    %455 = arith.select %452, %454, %368 : vector<4x8xi1>, vector<4x8xf32>
    %456 = vector.broadcast %379 : f32 to vector<1x8xf32>
    %457 = arith.select %450, %456, %370 : vector<1x8xi1>, vector<1x8xf32>
    %458 = arith.sitofp %388 : i32 to f32
    %459 = vector.broadcast %458 : f32 to vector<1x8xf32>
    %460 = arith.select %450, %459, %373 : vector<1x8xi1>, vector<1x8xf32>
    %cst_81 = arith.constant 1.000000e+00 : f32
    %461 = vector.broadcast %cst_81 : f32 to vector<1x8xf32>
    %462 = arith.select %450, %461, %375 : vector<1x8xi1>, vector<1x8xf32>
    %c5_i32 = arith.constant 5 : i32
    %463 = vector.shape_cast %446 : vector<4x1xf32> to vector<1x4x1xf32>
    %cst_82 = arith.constant dense<0xFF800000> : vector<1xf32>
    %464 = vector.multi_reduction <maximumf>, %463, %cst_82 [1, 2] : vector<1x4x1xf32> to vector<1xf32>
    %465 = vector.shape_cast %464 : vector<1xf32> to vector<1x1x1xf32>
    %466 = vector.extract %465[0, 0, 0] : f32 from vector<1x1x1xf32>
    %cst_83 = arith.constant -1.000000e+29 : f32
    %467 = arith.cmpf ogt, %466, %cst_83 : f32
    %468 = vector.broadcast %466 : f32 to vector<4x1xf32>
    %469 = arith.cmpf oge, %446, %468 : vector<4x1xf32>
    %c4_i32_84 = arith.constant 4 : i32
    %470 = vector.broadcast %c4_i32_84 : i32 to vector<4x1xi32>
    %471 = arith.select %469, %2, %470 : vector<4x1xi1>, vector<4x1xi32>
    %472 = vector.shape_cast %471 : vector<4x1xi32> to vector<1x4x1xi32>
    %cst_85 = arith.constant dense<2147483647> : vector<1xi32>
    %473 = vector.multi_reduction <minsi>, %472, %cst_85 [1, 2] : vector<1x4x1xi32> to vector<1xi32>
    %474 = vector.shape_cast %473 : vector<1xi32> to vector<1x1x1xi32>
    %475 = vector.extract %474[0, 0, 0] : i32 from vector<1x1x1xi32>
    %476 = arith.index_cast %475 : i32 to index
    %c0_86 = arith.constant 0 : index
    %477 = vector.load %arg5[%476, %c0_86] : memref<4x16xf32, #tpu.memory_space<vmem>>, vector<1x16xf32>
    %478 = vector.broadcast %466 : f32 to vector<1x16xf32>
    %479 = arith.cmpf oge, %477, %478 : vector<1x16xf32>
    %c16_i32_87 = arith.constant 16 : i32
    %480 = vector.broadcast %c16_i32_87 : i32 to vector<1x16xi32>
    %481 = arith.select %479, %3, %480 : vector<1x16xi1>, vector<1x16xi32>
    %482 = vector.shape_cast %481 : vector<1x16xi32> to vector<1x1x16xi32>
    %cst_88 = arith.constant dense<2147483647> : vector<1xi32>
    %483 = vector.multi_reduction <minsi>, %482, %cst_88 [1, 2] : vector<1x1x16xi32> to vector<1xi32>
    %484 = vector.shape_cast %483 : vector<1xi32> to vector<1x1x1xi32>
    %485 = vector.extract %484[0, 0, 0] : i32 from vector<1x1x1xi32>
    %486 = vector.broadcast %485 : i32 to vector<16x1xi32>
    %487 = arith.cmpi eq, %4, %486 : vector<16x1xi32>
    %488 = arith.extui %487 : vector<16x1xi1> to vector<16x1xi32>
    %489 = arith.sitofp %488 : vector<16x1xi32> to vector<16x1xf32>
    %cst_89 = arith.constant dense<0.000000e+00> : vector<4x1xf32>
    %490 = tpu.matmul %7, %489, %cst_89 {dimension_numbers = #tpu.dot_dimension_numbers<[1], [0], [0], [1], [0, 0, 1, 1], [], []>} : vector<4x16xf32>, vector<16x1xf32>, vector<4x1xf32> -> vector<4x1xf32>
    %491 = vector.extract_strided_slice %490 {offsets = [0, 0], sizes = [1, 1], strides = [1, 1]} : vector<4x1xf32> to vector<1x1xf32>
    %492 = vector.extract_strided_slice %490 {offsets = [1, 0], sizes = [1, 1], strides = [1, 1]} : vector<4x1xf32> to vector<1x1xf32>
    %493 = vector.extract_strided_slice %490 {offsets = [2, 0], sizes = [1, 1], strides = [1, 1]} : vector<4x1xf32> to vector<1x1xf32>
    %494 = vector.extract_strided_slice %490 {offsets = [3, 0], sizes = [1, 1], strides = [1, 1]} : vector<4x1xf32> to vector<1x1xf32>
    %495 = vector.broadcast %491 : vector<1x1xf32> to vector<1x16xf32>
    %496 = arith.maximumf %10, %495 : vector<1x16xf32>
    %497 = vector.broadcast %492 : vector<1x1xf32> to vector<1x16xf32>
    %498 = arith.maximumf %11, %497 : vector<1x16xf32>
    %499 = vector.broadcast %493 : vector<1x1xf32> to vector<1x16xf32>
    %500 = arith.minimumf %12, %499 : vector<1x16xf32>
    %501 = vector.broadcast %494 : vector<1x1xf32> to vector<1x16xf32>
    %502 = arith.minimumf %13, %501 : vector<1x16xf32>
    %503 = arith.subf %500, %496 : vector<1x16xf32>
    %cst_90 = arith.constant 0.000000e+00 : f32
    %504 = vector.broadcast %cst_90 : f32 to vector<1x16xf32>
    %505 = arith.maximumf %503, %504 : vector<1x16xf32>
    %506 = arith.subf %502, %498 : vector<1x16xf32>
    %cst_91 = arith.constant 0.000000e+00 : f32
    %507 = vector.broadcast %cst_91 : f32 to vector<1x16xf32>
    %508 = arith.maximumf %506, %507 : vector<1x16xf32>
    %509 = arith.mulf %505, %508 : vector<1x16xf32>
    %510 = arith.subf %493, %491 : vector<1x1xf32>
    %511 = arith.subf %494, %492 : vector<1x1xf32>
    %512 = arith.mulf %510, %511 : vector<1x1xf32>
    %513 = vector.broadcast %512 : vector<1x1xf32> to vector<1x16xf32>
    %514 = arith.addf %16, %513 : vector<1x16xf32>
    %515 = arith.subf %514, %509 : vector<1x16xf32>
    %516 = vector.broadcast %1 : f32 to vector<1x16xf32>
    %517 = arith.mulf %516, %515 : vector<1x16xf32>
    %518 = arith.cmpf ogt, %509, %517 : vector<1x16xf32>
    %519 = vector.broadcast %485 : i32 to vector<1x16xi32>
    %520 = arith.cmpi eq, %3, %519 : vector<1x16xi32>
    %521 = arith.ori %518, %520 : vector<1x16xi1>
    %cst_92 = arith.constant -1.000000e+30 : f32
    %522 = vector.broadcast %cst_92 : f32 to vector<1x16xf32>
    %523 = arith.select %521, %522, %477 : vector<1x16xi1>, vector<1x16xf32>
    %524 = arith.index_cast %475 : i32 to index
    %c0_93 = arith.constant 0 : index
    %525 = vector.load %arg5[%524, %c0_93] : memref<4x16xf32, #tpu.memory_space<vmem>>, vector<1x16xf32>
    tpu.vector_store %arg5[%524, %c0_93], %523 {strides = array<i32>} : memref<4x16xf32, #tpu.memory_space<vmem>>, vector<1x16xf32>,
    %526 = vector.broadcast %475 : i32 to vector<4x1xi32>
    %527 = arith.cmpi eq, %2, %526 : vector<4x1xi32>
    %528 = vector.shape_cast %523 : vector<1x16xf32> to vector<1x1x16xf32>
    %cst_94 = arith.constant dense<0xFF800000> : vector<1xf32>
    %529 = vector.multi_reduction <maximumf>, %528, %cst_94 [1, 2] : vector<1x1x16xf32> to vector<1xf32>
    %530 = vector.shape_cast %529 : vector<1xf32> to vector<1x1x1xf32>
    %531 = vector.extract %530[0, 0, 0] : f32 from vector<1x1x1xf32>
    %532 = vector.broadcast %531 : f32 to vector<4x1xf32>
    %533 = arith.select %527, %532, %446 : vector<4x1xi1>, vector<4x1xf32>
    %534 = vector.broadcast %c5_i32 : i32 to vector<1x8xi32>
    %535 = arith.cmpi eq, %5, %534 : vector<1x8xi32>
    %536 = vector.broadcast %467 : i1 to vector<1x8xi1>
    %537 = arith.andi %535, %536 : vector<1x8xi1>
    %538 = vector.shape_cast %537 : vector<1x8xi1> to vector<1x8xi1>
    %539 = vector.broadcast %538 : vector<1x8xi1> to vector<4x8xi1>
    %540 = vector.shape_cast %490 : vector<4x1xf32> to vector<4x1xf32>
    %541 = vector.broadcast %540 : vector<4x1xf32> to vector<4x8xf32>
    %542 = arith.select %539, %541, %455 : vector<4x8xi1>, vector<4x8xf32>
    %543 = vector.broadcast %466 : f32 to vector<1x8xf32>
    %544 = arith.select %537, %543, %457 : vector<1x8xi1>, vector<1x8xf32>
    %545 = arith.sitofp %475 : i32 to f32
    %546 = vector.broadcast %545 : f32 to vector<1x8xf32>
    %547 = arith.select %537, %546, %460 : vector<1x8xi1>, vector<1x8xf32>
    %cst_95 = arith.constant 1.000000e+00 : f32
    %548 = vector.broadcast %cst_95 : f32 to vector<1x8xf32>
    %549 = arith.select %537, %548, %462 : vector<1x8xi1>, vector<1x8xf32>
    %c6_i32 = arith.constant 6 : i32
    %550 = vector.shape_cast %533 : vector<4x1xf32> to vector<1x4x1xf32>
    %cst_96 = arith.constant dense<0xFF800000> : vector<1xf32>
    %551 = vector.multi_reduction <maximumf>, %550, %cst_96 [1, 2] : vector<1x4x1xf32> to vector<1xf32>
    %552 = vector.shape_cast %551 : vector<1xf32> to vector<1x1x1xf32>
    %553 = vector.extract %552[0, 0, 0] : f32 from vector<1x1x1xf32>
    %cst_97 = arith.constant -1.000000e+29 : f32
    %554 = arith.cmpf ogt, %553, %cst_97 : f32
    %555 = vector.broadcast %553 : f32 to vector<4x1xf32>
    %556 = arith.cmpf oge, %533, %555 : vector<4x1xf32>
    %c4_i32_98 = arith.constant 4 : i32
    %557 = vector.broadcast %c4_i32_98 : i32 to vector<4x1xi32>
    %558 = arith.select %556, %2, %557 : vector<4x1xi1>, vector<4x1xi32>
    %559 = vector.shape_cast %558 : vector<4x1xi32> to vector<1x4x1xi32>
    %cst_99 = arith.constant dense<2147483647> : vector<1xi32>
    %560 = vector.multi_reduction <minsi>, %559, %cst_99 [1, 2] : vector<1x4x1xi32> to vector<1xi32>
    %561 = vector.shape_cast %560 : vector<1xi32> to vector<1x1x1xi32>
    %562 = vector.extract %561[0, 0, 0] : i32 from vector<1x1x1xi32>
    %563 = arith.index_cast %562 : i32 to index
    %c0_100 = arith.constant 0 : index
    %564 = vector.load %arg5[%563, %c0_100] : memref<4x16xf32, #tpu.memory_space<vmem>>, vector<1x16xf32>
    %565 = vector.broadcast %553 : f32 to vector<1x16xf32>
    %566 = arith.cmpf oge, %564, %565 : vector<1x16xf32>
    %c16_i32_101 = arith.constant 16 : i32
    %567 = vector.broadcast %c16_i32_101 : i32 to vector<1x16xi32>
    %568 = arith.select %566, %3, %567 : vector<1x16xi1>, vector<1x16xi32>
    %569 = vector.shape_cast %568 : vector<1x16xi32> to vector<1x1x16xi32>
    %cst_102 = arith.constant dense<2147483647> : vector<1xi32>
    %570 = vector.multi_reduction <minsi>, %569, %cst_102 [1, 2] : vector<1x1x16xi32> to vector<1xi32>
    %571 = vector.shape_cast %570 : vector<1xi32> to vector<1x1x1xi32>
    %572 = vector.extract %571[0, 0, 0] : i32 from vector<1x1x1xi32>
    %573 = vector.broadcast %572 : i32 to vector<16x1xi32>
    %574 = arith.cmpi eq, %4, %573 : vector<16x1xi32>
    %575 = arith.extui %574 : vector<16x1xi1> to vector<16x1xi32>
    %576 = arith.sitofp %575 : vector<16x1xi32> to vector<16x1xf32>
    %cst_103 = arith.constant dense<0.000000e+00> : vector<4x1xf32>
    %577 = tpu.matmul %7, %576, %cst_103 {dimension_numbers = #tpu.dot_dimension_numbers<[1], [0], [0], [1], [0, 0, 1, 1], [], []>} : vector<4x16xf32>, vector<16x1xf32>, vector<4x1xf32> -> vector<4x1xf32>
    %578 = vector.extract_strided_slice %577 {offsets = [0, 0], sizes = [1, 1], strides = [1, 1]} : vector<4x1xf32> to vector<1x1xf32>
    %579 = vector.extract_strided_slice %577 {offsets = [1, 0], sizes = [1, 1], strides = [1, 1]} : vector<4x1xf32> to vector<1x1xf32>
    %580 = vector.extract_strided_slice %577 {offsets = [2, 0], sizes = [1, 1], strides = [1, 1]} : vector<4x1xf32> to vector<1x1xf32>
    %581 = vector.extract_strided_slice %577 {offsets = [3, 0], sizes = [1, 1], strides = [1, 1]} : vector<4x1xf32> to vector<1x1xf32>
    %582 = vector.broadcast %578 : vector<1x1xf32> to vector<1x16xf32>
    %583 = arith.maximumf %10, %582 : vector<1x16xf32>
    %584 = vector.broadcast %579 : vector<1x1xf32> to vector<1x16xf32>
    %585 = arith.maximumf %11, %584 : vector<1x16xf32>
    %586 = vector.broadcast %580 : vector<1x1xf32> to vector<1x16xf32>
    %587 = arith.minimumf %12, %586 : vector<1x16xf32>
    %588 = vector.broadcast %581 : vector<1x1xf32> to vector<1x16xf32>
    %589 = arith.minimumf %13, %588 : vector<1x16xf32>
    %590 = arith.subf %587, %583 : vector<1x16xf32>
    %cst_104 = arith.constant 0.000000e+00 : f32
    %591 = vector.broadcast %cst_104 : f32 to vector<1x16xf32>
    %592 = arith.maximumf %590, %591 : vector<1x16xf32>
    %593 = arith.subf %589, %585 : vector<1x16xf32>
    %cst_105 = arith.constant 0.000000e+00 : f32
    %594 = vector.broadcast %cst_105 : f32 to vector<1x16xf32>
    %595 = arith.maximumf %593, %594 : vector<1x16xf32>
    %596 = arith.mulf %592, %595 : vector<1x16xf32>
    %597 = arith.subf %580, %578 : vector<1x1xf32>
    %598 = arith.subf %581, %579 : vector<1x1xf32>
    %599 = arith.mulf %597, %598 : vector<1x1xf32>
    %600 = vector.broadcast %599 : vector<1x1xf32> to vector<1x16xf32>
    %601 = arith.addf %16, %600 : vector<1x16xf32>
    %602 = arith.subf %601, %596 : vector<1x16xf32>
    %603 = vector.broadcast %1 : f32 to vector<1x16xf32>
    %604 = arith.mulf %603, %602 : vector<1x16xf32>
    %605 = arith.cmpf ogt, %596, %604 : vector<1x16xf32>
    %606 = vector.broadcast %572 : i32 to vector<1x16xi32>
    %607 = arith.cmpi eq, %3, %606 : vector<1x16xi32>
    %608 = arith.ori %605, %607 : vector<1x16xi1>
    %cst_106 = arith.constant -1.000000e+30 : f32
    %609 = vector.broadcast %cst_106 : f32 to vector<1x16xf32>
    %610 = arith.select %608, %609, %564 : vector<1x16xi1>, vector<1x16xf32>
    %611 = arith.index_cast %562 : i32 to index
    %c0_107 = arith.constant 0 : index
    %612 = vector.load %arg5[%611, %c0_107] : memref<4x16xf32, #tpu.memory_space<vmem>>, vector<1x16xf32>
    tpu.vector_store %arg5[%611, %c0_107], %610 {strides = array<i32>} : memref<4x16xf32, #tpu.memory_space<vmem>>, vector<1x16xf32>,
    %613 = vector.broadcast %562 : i32 to vector<4x1xi32>
    %614 = arith.cmpi eq, %2, %613 : vector<4x1xi32>
    %615 = vector.shape_cast %610 : vector<1x16xf32> to vector<1x1x16xf32>
    %cst_108 = arith.constant dense<0xFF800000> : vector<1xf32>
    %616 = vector.multi_reduction <maximumf>, %615, %cst_108 [1, 2] : vector<1x1x16xf32> to vector<1xf32>
    %617 = vector.shape_cast %616 : vector<1xf32> to vector<1x1x1xf32>
    %618 = vector.extract %617[0, 0, 0] : f32 from vector<1x1x1xf32>
    %619 = vector.broadcast %618 : f32 to vector<4x1xf32>
    %620 = arith.select %614, %619, %533 : vector<4x1xi1>, vector<4x1xf32>
    %621 = vector.broadcast %c6_i32 : i32 to vector<1x8xi32>
    %622 = arith.cmpi eq, %5, %621 : vector<1x8xi32>
    %623 = vector.broadcast %554 : i1 to vector<1x8xi1>
    %624 = arith.andi %622, %623 : vector<1x8xi1>
    %625 = vector.shape_cast %624 : vector<1x8xi1> to vector<1x8xi1>
    %626 = vector.broadcast %625 : vector<1x8xi1> to vector<4x8xi1>
    %627 = vector.shape_cast %577 : vector<4x1xf32> to vector<4x1xf32>
    %628 = vector.broadcast %627 : vector<4x1xf32> to vector<4x8xf32>
    %629 = arith.select %626, %628, %542 : vector<4x8xi1>, vector<4x8xf32>
    %630 = vector.broadcast %553 : f32 to vector<1x8xf32>
    %631 = arith.select %624, %630, %544 : vector<1x8xi1>, vector<1x8xf32>
    %632 = arith.sitofp %562 : i32 to f32
    %633 = vector.broadcast %632 : f32 to vector<1x8xf32>
    %634 = arith.select %624, %633, %547 : vector<1x8xi1>, vector<1x8xf32>
    %cst_109 = arith.constant 1.000000e+00 : f32
    %635 = vector.broadcast %cst_109 : f32 to vector<1x8xf32>
    %636 = arith.select %624, %635, %549 : vector<1x8xi1>, vector<1x8xf32>
    %c7_i32 = arith.constant 7 : i32
    %637 = vector.shape_cast %620 : vector<4x1xf32> to vector<1x4x1xf32>
    %cst_110 = arith.constant dense<0xFF800000> : vector<1xf32>
    %638 = vector.multi_reduction <maximumf>, %637, %cst_110 [1, 2] : vector<1x4x1xf32> to vector<1xf32>
    %639 = vector.shape_cast %638 : vector<1xf32> to vector<1x1x1xf32>
    %640 = vector.extract %639[0, 0, 0] : f32 from vector<1x1x1xf32>
    %cst_111 = arith.constant -1.000000e+29 : f32
    %641 = arith.cmpf ogt, %640, %cst_111 : f32
    %642 = vector.broadcast %640 : f32 to vector<4x1xf32>
    %643 = arith.cmpf oge, %620, %642 : vector<4x1xf32>
    %c4_i32_112 = arith.constant 4 : i32
    %644 = vector.broadcast %c4_i32_112 : i32 to vector<4x1xi32>
    %645 = arith.select %643, %2, %644 : vector<4x1xi1>, vector<4x1xi32>
    %646 = vector.shape_cast %645 : vector<4x1xi32> to vector<1x4x1xi32>
    %cst_113 = arith.constant dense<2147483647> : vector<1xi32>
    %647 = vector.multi_reduction <minsi>, %646, %cst_113 [1, 2] : vector<1x4x1xi32> to vector<1xi32>
    %648 = vector.shape_cast %647 : vector<1xi32> to vector<1x1x1xi32>
    %649 = vector.extract %648[0, 0, 0] : i32 from vector<1x1x1xi32>
    %650 = arith.index_cast %649 : i32 to index
    %c0_114 = arith.constant 0 : index
    %651 = vector.load %arg5[%650, %c0_114] : memref<4x16xf32, #tpu.memory_space<vmem>>, vector<1x16xf32>
    %652 = vector.broadcast %640 : f32 to vector<1x16xf32>
    %653 = arith.cmpf oge, %651, %652 : vector<1x16xf32>
    %c16_i32_115 = arith.constant 16 : i32
    %654 = vector.broadcast %c16_i32_115 : i32 to vector<1x16xi32>
    %655 = arith.select %653, %3, %654 : vector<1x16xi1>, vector<1x16xi32>
    %656 = vector.shape_cast %655 : vector<1x16xi32> to vector<1x1x16xi32>
    %cst_116 = arith.constant dense<2147483647> : vector<1xi32>
    %657 = vector.multi_reduction <minsi>, %656, %cst_116 [1, 2] : vector<1x1x16xi32> to vector<1xi32>
    %658 = vector.shape_cast %657 : vector<1xi32> to vector<1x1x1xi32>
    %659 = vector.extract %658[0, 0, 0] : i32 from vector<1x1x1xi32>
    %660 = vector.broadcast %659 : i32 to vector<16x1xi32>
    %661 = arith.cmpi eq, %4, %660 : vector<16x1xi32>
    %662 = arith.extui %661 : vector<16x1xi1> to vector<16x1xi32>
    %663 = arith.sitofp %662 : vector<16x1xi32> to vector<16x1xf32>
    %cst_117 = arith.constant dense<0.000000e+00> : vector<4x1xf32>
    %664 = tpu.matmul %7, %663, %cst_117 {dimension_numbers = #tpu.dot_dimension_numbers<[1], [0], [0], [1], [0, 0, 1, 1], [], []>} : vector<4x16xf32>, vector<16x1xf32>, vector<4x1xf32> -> vector<4x1xf32>
    %665 = vector.extract_strided_slice %664 {offsets = [0, 0], sizes = [1, 1], strides = [1, 1]} : vector<4x1xf32> to vector<1x1xf32>
    %666 = vector.extract_strided_slice %664 {offsets = [1, 0], sizes = [1, 1], strides = [1, 1]} : vector<4x1xf32> to vector<1x1xf32>
    %667 = vector.extract_strided_slice %664 {offsets = [2, 0], sizes = [1, 1], strides = [1, 1]} : vector<4x1xf32> to vector<1x1xf32>
    %668 = vector.extract_strided_slice %664 {offsets = [3, 0], sizes = [1, 1], strides = [1, 1]} : vector<4x1xf32> to vector<1x1xf32>
    %669 = vector.broadcast %665 : vector<1x1xf32> to vector<1x16xf32>
    %670 = arith.maximumf %10, %669 : vector<1x16xf32>
    %671 = vector.broadcast %666 : vector<1x1xf32> to vector<1x16xf32>
    %672 = arith.maximumf %11, %671 : vector<1x16xf32>
    %673 = vector.broadcast %667 : vector<1x1xf32> to vector<1x16xf32>
    %674 = arith.minimumf %12, %673 : vector<1x16xf32>
    %675 = vector.broadcast %668 : vector<1x1xf32> to vector<1x16xf32>
    %676 = arith.minimumf %13, %675 : vector<1x16xf32>
    %677 = arith.subf %674, %670 : vector<1x16xf32>
    %cst_118 = arith.constant 0.000000e+00 : f32
    %678 = vector.broadcast %cst_118 : f32 to vector<1x16xf32>
    %679 = arith.maximumf %677, %678 : vector<1x16xf32>
    %680 = arith.subf %676, %672 : vector<1x16xf32>
    %cst_119 = arith.constant 0.000000e+00 : f32
    %681 = vector.broadcast %cst_119 : f32 to vector<1x16xf32>
    %682 = arith.maximumf %680, %681 : vector<1x16xf32>
    %683 = arith.mulf %679, %682 : vector<1x16xf32>
    %684 = arith.subf %667, %665 : vector<1x1xf32>
    %685 = arith.subf %668, %666 : vector<1x1xf32>
    %686 = arith.mulf %684, %685 : vector<1x1xf32>
    %687 = vector.broadcast %686 : vector<1x1xf32> to vector<1x16xf32>
    %688 = arith.addf %16, %687 : vector<1x16xf32>
    %689 = arith.subf %688, %683 : vector<1x16xf32>
    %690 = vector.broadcast %1 : f32 to vector<1x16xf32>
    %691 = arith.mulf %690, %689 : vector<1x16xf32>
    %692 = arith.cmpf ogt, %683, %691 : vector<1x16xf32>
    %693 = vector.broadcast %659 : i32 to vector<1x16xi32>
    %694 = arith.cmpi eq, %3, %693 : vector<1x16xi32>
    %695 = arith.ori %692, %694 : vector<1x16xi1>
    %cst_120 = arith.constant -1.000000e+30 : f32
    %696 = vector.broadcast %cst_120 : f32 to vector<1x16xf32>
    %697 = arith.select %695, %696, %651 : vector<1x16xi1>, vector<1x16xf32>
    %698 = arith.index_cast %649 : i32 to index
    %c0_121 = arith.constant 0 : index
    %699 = vector.load %arg5[%698, %c0_121] : memref<4x16xf32, #tpu.memory_space<vmem>>, vector<1x16xf32>
    tpu.vector_store %arg5[%698, %c0_121], %697 {strides = array<i32>} : memref<4x16xf32, #tpu.memory_space<vmem>>, vector<1x16xf32>,
    %700 = vector.broadcast %649 : i32 to vector<4x1xi32>
    %701 = arith.cmpi eq, %2, %700 : vector<4x1xi32>
    %702 = vector.shape_cast %697 : vector<1x16xf32> to vector<1x1x16xf32>
    %cst_122 = arith.constant dense<0xFF800000> : vector<1xf32>
    %703 = vector.multi_reduction <maximumf>, %702, %cst_122 [1, 2] : vector<1x1x16xf32> to vector<1xf32>
    %704 = vector.shape_cast %703 : vector<1xf32> to vector<1x1x1xf32>
    %705 = vector.extract %704[0, 0, 0] : f32 from vector<1x1x1xf32>
    %706 = vector.broadcast %705 : f32 to vector<4x1xf32>
    %707 = arith.select %701, %706, %620 : vector<4x1xi1>, vector<4x1xf32>
    %708 = vector.broadcast %c7_i32 : i32 to vector<1x8xi32>
    %709 = arith.cmpi eq, %5, %708 : vector<1x8xi32>
    %710 = vector.broadcast %641 : i1 to vector<1x8xi1>
    %711 = arith.andi %709, %710 : vector<1x8xi1>
    %712 = vector.shape_cast %711 : vector<1x8xi1> to vector<1x8xi1>
    %713 = vector.broadcast %712 : vector<1x8xi1> to vector<4x8xi1>
    %714 = vector.shape_cast %664 : vector<4x1xf32> to vector<4x1xf32>
    %715 = vector.broadcast %714 : vector<4x1xf32> to vector<4x8xf32>
    %716 = arith.select %713, %715, %629 : vector<4x8xi1>, vector<4x8xf32>
    %717 = vector.broadcast %640 : f32 to vector<1x8xf32>
    %718 = arith.select %711, %717, %631 : vector<1x8xi1>, vector<1x8xf32>
    %719 = arith.sitofp %649 : i32 to f32
    %720 = vector.broadcast %719 : f32 to vector<1x8xf32>
    %721 = arith.select %711, %720, %634 : vector<1x8xi1>, vector<1x8xf32>
    %cst_123 = arith.constant 1.000000e+00 : f32
    %722 = vector.broadcast %cst_123 : f32 to vector<1x8xf32>
    %723 = arith.select %711, %722, %636 : vector<1x8xi1>, vector<1x8xf32>
    %c8_i32 = arith.constant 8 : i32
    %c0_124 = arith.constant 0 : index
    %c0_125 = arith.constant 0 : index
    %c0_126 = arith.constant 0 : index
    %724 = vector.load %arg4[%c0_124, %c0_125, %c0_126] : memref<2x8x8xf32, #tpu.memory_space<vmem>>, vector<1x4x8xf32>
    %725 = vector.shape_cast %724 : vector<1x4x8xf32> to vector<4x8xf32>
    %726 = vector.shape_cast %716 : vector<4x8xf32> to vector<1x4x8xf32>
    tpu.vector_store %arg4[%c0_124, %c0_125, %c0_126], %726 {strides = array<i32>} : memref<2x8x8xf32, #tpu.memory_space<vmem>>, vector<1x4x8xf32>,
    %c0_127 = arith.constant 0 : index
    %c4_128 = arith.constant 4 : index
    %c0_129 = arith.constant 0 : index
    %727 = vector.load %arg4[%c0_127, %c4_128, %c0_129] : memref<2x8x8xf32, #tpu.memory_space<vmem>>, vector<1x1x8xf32>
    %728 = vector.shape_cast %727 : vector<1x1x8xf32> to vector<1x8xf32>
    %729 = vector.shape_cast %718 : vector<1x8xf32> to vector<1x1x8xf32>
    tpu.vector_store %arg4[%c0_127, %c4_128, %c0_129], %729 {strides = array<i32>} : memref<2x8x8xf32, #tpu.memory_space<vmem>>, vector<1x1x8xf32>,
    %c0_130 = arith.constant 0 : index
    %c5 = arith.constant 5 : index
    %c0_131 = arith.constant 0 : index
    %730 = vector.load %arg4[%c0_130, %c5, %c0_131] : memref<2x8x8xf32, #tpu.memory_space<vmem>>, vector<1x1x8xf32>
    %731 = vector.shape_cast %730 : vector<1x1x8xf32> to vector<1x8xf32>
    %732 = vector.shape_cast %721 : vector<1x8xf32> to vector<1x1x8xf32>
    tpu.vector_store %arg4[%c0_130, %c5, %c0_131], %732 {strides = array<i32>} : memref<2x8x8xf32, #tpu.memory_space<vmem>>, vector<1x1x8xf32>,
    %c0_132 = arith.constant 0 : index
    %c6 = arith.constant 6 : index
    %c0_133 = arith.constant 0 : index
    %733 = vector.load %arg4[%c0_132, %c6, %c0_133] : memref<2x8x8xf32, #tpu.memory_space<vmem>>, vector<1x1x8xf32>
    %734 = vector.shape_cast %733 : vector<1x1x8xf32> to vector<1x8xf32>
    %735 = vector.shape_cast %723 : vector<1x8xf32> to vector<1x1x8xf32>
    tpu.vector_store %arg4[%c0_132, %c6, %c0_133], %735 {strides = array<i32>} : memref<2x8x8xf32, #tpu.memory_space<vmem>>, vector<1x1x8xf32>,
    %736 = vector.shape_cast %723 : vector<1x8xf32> to vector<1x1x8xf32>
    %cst_134 = arith.constant dense<0.000000e+00> : vector<1xf32>
    %737 = vector.multi_reduction <add>, %736, %cst_134 [1, 2] : vector<1x1x8xf32> to vector<1xf32>
    %738 = vector.shape_cast %737 : vector<1xf32> to vector<1x1x1xf32>
    %739 = vector.extract %738[0, 0, 0] : f32 from vector<1x1x1xf32>
    %740 = vector.broadcast %739 : f32 to vector<1x8xf32>
    %c0_135 = arith.constant 0 : index
    %c7 = arith.constant 7 : index
    %c0_136 = arith.constant 0 : index
    %741 = vector.load %arg4[%c0_135, %c7, %c0_136] : memref<2x8x8xf32, #tpu.memory_space<vmem>>, vector<1x1x8xf32>
    %742 = vector.shape_cast %741 : vector<1x1x8xf32> to vector<1x8xf32>
    %743 = vector.shape_cast %740 : vector<1x8xf32> to vector<1x1x8xf32>
    tpu.vector_store %arg4[%c0_135, %c7, %c0_136], %743 {strides = array<i32>} : memref<2x8x8xf32, #tpu.memory_space<vmem>>, vector<1x1x8xf32>,
    %c1 = arith.constant 1 : index
    %c0_137 = arith.constant 0 : index
    %c0_138 = arith.constant 0 : index
    %744 = vector.load %arg3[%c1, %c0_137, %c0_138] : memref<2x8x16xf32, #tpu.memory_space<vmem>>, vector<1x4x16xf32>
    %745 = vector.shape_cast %744 : vector<1x4x16xf32> to vector<4x16xf32>
    %c1_139 = arith.constant 1 : index
    %c4_140 = arith.constant 4 : index
    %c0_141 = arith.constant 0 : index
    %746 = vector.load %arg3[%c1_139, %c4_140, %c0_141] : memref<2x8x16xf32, #tpu.memory_space<vmem>>, vector<1x4x16xf32>
    %747 = vector.shape_cast %746 : vector<1x4x16xf32> to vector<4x16xf32>
    %748 = vector.extract_strided_slice %745 {offsets = [0, 0], sizes = [1, 16], strides = [1, 1]} : vector<4x16xf32> to vector<1x16xf32>
    %749 = vector.extract_strided_slice %745 {offsets = [1, 0], sizes = [1, 16], strides = [1, 1]} : vector<4x16xf32> to vector<1x16xf32>
    %750 = vector.extract_strided_slice %745 {offsets = [2, 0], sizes = [1, 16], strides = [1, 1]} : vector<4x16xf32> to vector<1x16xf32>
    %751 = vector.extract_strided_slice %745 {offsets = [3, 0], sizes = [1, 16], strides = [1, 1]} : vector<4x16xf32> to vector<1x16xf32>
    %752 = arith.subf %750, %748 : vector<1x16xf32>
    %753 = arith.subf %751, %749 : vector<1x16xf32>
    %754 = arith.mulf %752, %753 : vector<1x16xf32>
    %755 = vector.broadcast %0 : f32 to vector<4x16xf32>
    %756 = arith.cmpf ogt, %747, %755 : vector<4x16xf32>
    %cst_142 = arith.constant -1.000000e+30 : f32
    %757 = vector.broadcast %cst_142 : f32 to vector<4x16xf32>
    %758 = arith.select %756, %747, %757 : vector<4x16xi1>, vector<4x16xf32>
    %c0_143 = arith.constant 0 : index
    %c0_144 = arith.constant 0 : index
    %759 = vector.load %arg5[%c0_143, %c0_144] : memref<4x16xf32, #tpu.memory_space<vmem>>, vector<4x16xf32>
    tpu.vector_store %arg5[%c0_143, %c0_144], %758 {strides = array<i32>} : memref<4x16xf32, #tpu.memory_space<vmem>>, vector<4x16xf32>,
    %cst_145 = arith.constant dense<0xFF800000> : vector<4xf32>
    %760 = vector.multi_reduction <maximumf>, %758, %cst_145 [1] : vector<4x16xf32> to vector<4xf32>
    %761 = vector.shape_cast %760 : vector<4xf32> to vector<4x1xf32>
    %cst_146 = arith.constant 0.000000e+00 : f32
    %762 = vector.broadcast %cst_146 : f32 to vector<4x8xf32>
    %cst_147 = arith.constant 0.000000e+00 : f32
    %763 = vector.broadcast %cst_147 : f32 to vector<1x8xf32>
    %cst_148 = arith.constant -1.000000e+00 : f32
    %764 = vector.broadcast %cst_148 : f32 to vector<1x8xf32>
    %cst_149 = arith.constant 0.000000e+00 : f32
    %765 = vector.broadcast %cst_149 : f32 to vector<1x8xf32>
    %c0_i32_150 = arith.constant 0 : i32
    %766 = vector.shape_cast %761 : vector<4x1xf32> to vector<1x4x1xf32>
    %cst_151 = arith.constant dense<0xFF800000> : vector<1xf32>
    %767 = vector.multi_reduction <maximumf>, %766, %cst_151 [1, 2] : vector<1x4x1xf32> to vector<1xf32>
    %768 = vector.shape_cast %767 : vector<1xf32> to vector<1x1x1xf32>
    %769 = vector.extract %768[0, 0, 0] : f32 from vector<1x1x1xf32>
    %cst_152 = arith.constant -1.000000e+29 : f32
    %770 = arith.cmpf ogt, %769, %cst_152 : f32
    %771 = vector.broadcast %769 : f32 to vector<4x1xf32>
    %772 = arith.cmpf oge, %761, %771 : vector<4x1xf32>
    %c4_i32_153 = arith.constant 4 : i32
    %773 = vector.broadcast %c4_i32_153 : i32 to vector<4x1xi32>
    %774 = arith.select %772, %2, %773 : vector<4x1xi1>, vector<4x1xi32>
    %775 = vector.shape_cast %774 : vector<4x1xi32> to vector<1x4x1xi32>
    %cst_154 = arith.constant dense<2147483647> : vector<1xi32>
    %776 = vector.multi_reduction <minsi>, %775, %cst_154 [1, 2] : vector<1x4x1xi32> to vector<1xi32>
    %777 = vector.shape_cast %776 : vector<1xi32> to vector<1x1x1xi32>
    %778 = vector.extract %777[0, 0, 0] : i32 from vector<1x1x1xi32>
    %779 = arith.index_cast %778 : i32 to index
    %c0_155 = arith.constant 0 : index
    %780 = vector.load %arg5[%779, %c0_155] : memref<4x16xf32, #tpu.memory_space<vmem>>, vector<1x16xf32>
    %781 = vector.broadcast %769 : f32 to vector<1x16xf32>
    %782 = arith.cmpf oge, %780, %781 : vector<1x16xf32>
    %c16_i32_156 = arith.constant 16 : i32
    %783 = vector.broadcast %c16_i32_156 : i32 to vector<1x16xi32>
    %784 = arith.select %782, %3, %783 : vector<1x16xi1>, vector<1x16xi32>
    %785 = vector.shape_cast %784 : vector<1x16xi32> to vector<1x1x16xi32>
    %cst_157 = arith.constant dense<2147483647> : vector<1xi32>
    %786 = vector.multi_reduction <minsi>, %785, %cst_157 [1, 2] : vector<1x1x16xi32> to vector<1xi32>
    %787 = vector.shape_cast %786 : vector<1xi32> to vector<1x1x1xi32>
    %788 = vector.extract %787[0, 0, 0] : i32 from vector<1x1x1xi32>
    %789 = vector.broadcast %788 : i32 to vector<16x1xi32>
    %790 = arith.cmpi eq, %4, %789 : vector<16x1xi32>
    %791 = arith.extui %790 : vector<16x1xi1> to vector<16x1xi32>
    %792 = arith.sitofp %791 : vector<16x1xi32> to vector<16x1xf32>
    %cst_158 = arith.constant dense<0.000000e+00> : vector<4x1xf32>
    %793 = tpu.matmul %745, %792, %cst_158 {dimension_numbers = #tpu.dot_dimension_numbers<[1], [0], [0], [1], [0, 0, 1, 1], [], []>} : vector<4x16xf32>, vector<16x1xf32>, vector<4x1xf32> -> vector<4x1xf32>
    %794 = vector.extract_strided_slice %793 {offsets = [0, 0], sizes = [1, 1], strides = [1, 1]} : vector<4x1xf32> to vector<1x1xf32>
    %795 = vector.extract_strided_slice %793 {offsets = [1, 0], sizes = [1, 1], strides = [1, 1]} : vector<4x1xf32> to vector<1x1xf32>
    %796 = vector.extract_strided_slice %793 {offsets = [2, 0], sizes = [1, 1], strides = [1, 1]} : vector<4x1xf32> to vector<1x1xf32>
    %797 = vector.extract_strided_slice %793 {offsets = [3, 0], sizes = [1, 1], strides = [1, 1]} : vector<4x1xf32> to vector<1x1xf32>
    %798 = vector.broadcast %794 : vector<1x1xf32> to vector<1x16xf32>
    %799 = arith.maximumf %748, %798 : vector<1x16xf32>
    %800 = vector.broadcast %795 : vector<1x1xf32> to vector<1x16xf32>
    %801 = arith.maximumf %749, %800 : vector<1x16xf32>
    %802 = vector.broadcast %796 : vector<1x1xf32> to vector<1x16xf32>
    %803 = arith.minimumf %750, %802 : vector<1x16xf32>
    %804 = vector.broadcast %797 : vector<1x1xf32> to vector<1x16xf32>
    %805 = arith.minimumf %751, %804 : vector<1x16xf32>
    %806 = arith.subf %803, %799 : vector<1x16xf32>
    %cst_159 = arith.constant 0.000000e+00 : f32
    %807 = vector.broadcast %cst_159 : f32 to vector<1x16xf32>
    %808 = arith.maximumf %806, %807 : vector<1x16xf32>
    %809 = arith.subf %805, %801 : vector<1x16xf32>
    %cst_160 = arith.constant 0.000000e+00 : f32
    %810 = vector.broadcast %cst_160 : f32 to vector<1x16xf32>
    %811 = arith.maximumf %809, %810 : vector<1x16xf32>
    %812 = arith.mulf %808, %811 : vector<1x16xf32>
    %813 = arith.subf %796, %794 : vector<1x1xf32>
    %814 = arith.subf %797, %795 : vector<1x1xf32>
    %815 = arith.mulf %813, %814 : vector<1x1xf32>
    %816 = vector.broadcast %815 : vector<1x1xf32> to vector<1x16xf32>
    %817 = arith.addf %754, %816 : vector<1x16xf32>
    %818 = arith.subf %817, %812 : vector<1x16xf32>
    %819 = vector.broadcast %1 : f32 to vector<1x16xf32>
    %820 = arith.mulf %819, %818 : vector<1x16xf32>
    %821 = arith.cmpf ogt, %812, %820 : vector<1x16xf32>
    %822 = vector.broadcast %788 : i32 to vector<1x16xi32>
    %823 = arith.cmpi eq, %3, %822 : vector<1x16xi32>
    %824 = arith.ori %821, %823 : vector<1x16xi1>
    %cst_161 = arith.constant -1.000000e+30 : f32
    %825 = vector.broadcast %cst_161 : f32 to vector<1x16xf32>
    %826 = arith.select %824, %825, %780 : vector<1x16xi1>, vector<1x16xf32>
    %827 = arith.index_cast %778 : i32 to index
    %c0_162 = arith.constant 0 : index
    %828 = vector.load %arg5[%827, %c0_162] : memref<4x16xf32, #tpu.memory_space<vmem>>, vector<1x16xf32>
    tpu.vector_store %arg5[%827, %c0_162], %826 {strides = array<i32>} : memref<4x16xf32, #tpu.memory_space<vmem>>, vector<1x16xf32>,
    %829 = vector.broadcast %778 : i32 to vector<4x1xi32>
    %830 = arith.cmpi eq, %2, %829 : vector<4x1xi32>
    %831 = vector.shape_cast %826 : vector<1x16xf32> to vector<1x1x16xf32>
    %cst_163 = arith.constant dense<0xFF800000> : vector<1xf32>
    %832 = vector.multi_reduction <maximumf>, %831, %cst_163 [1, 2] : vector<1x1x16xf32> to vector<1xf32>
    %833 = vector.shape_cast %832 : vector<1xf32> to vector<1x1x1xf32>
    %834 = vector.extract %833[0, 0, 0] : f32 from vector<1x1x1xf32>
    %835 = vector.broadcast %834 : f32 to vector<4x1xf32>
    %836 = arith.select %830, %835, %761 : vector<4x1xi1>, vector<4x1xf32>
    %837 = vector.broadcast %c0_i32_150 : i32 to vector<1x8xi32>
    %838 = arith.cmpi eq, %5, %837 : vector<1x8xi32>
    %839 = vector.broadcast %770 : i1 to vector<1x8xi1>
    %840 = arith.andi %838, %839 : vector<1x8xi1>
    %841 = vector.shape_cast %840 : vector<1x8xi1> to vector<1x8xi1>
    %842 = vector.broadcast %841 : vector<1x8xi1> to vector<4x8xi1>
    %843 = vector.shape_cast %793 : vector<4x1xf32> to vector<4x1xf32>
    %844 = vector.broadcast %843 : vector<4x1xf32> to vector<4x8xf32>
    %845 = arith.select %842, %844, %762 : vector<4x8xi1>, vector<4x8xf32>
    %846 = vector.broadcast %769 : f32 to vector<1x8xf32>
    %847 = arith.select %840, %846, %763 : vector<1x8xi1>, vector<1x8xf32>
    %848 = arith.sitofp %778 : i32 to f32
    %849 = vector.broadcast %848 : f32 to vector<1x8xf32>
    %850 = arith.select %840, %849, %764 : vector<1x8xi1>, vector<1x8xf32>
    %cst_164 = arith.constant 1.000000e+00 : f32
    %851 = vector.broadcast %cst_164 : f32 to vector<1x8xf32>
    %852 = arith.select %840, %851, %765 : vector<1x8xi1>, vector<1x8xf32>
    %c1_i32_165 = arith.constant 1 : i32
    %853 = vector.shape_cast %836 : vector<4x1xf32> to vector<1x4x1xf32>
    %cst_166 = arith.constant dense<0xFF800000> : vector<1xf32>
    %854 = vector.multi_reduction <maximumf>, %853, %cst_166 [1, 2] : vector<1x4x1xf32> to vector<1xf32>
    %855 = vector.shape_cast %854 : vector<1xf32> to vector<1x1x1xf32>
    %856 = vector.extract %855[0, 0, 0] : f32 from vector<1x1x1xf32>
    %cst_167 = arith.constant -1.000000e+29 : f32
    %857 = arith.cmpf ogt, %856, %cst_167 : f32
    %858 = vector.broadcast %856 : f32 to vector<4x1xf32>
    %859 = arith.cmpf oge, %836, %858 : vector<4x1xf32>
    %c4_i32_168 = arith.constant 4 : i32
    %860 = vector.broadcast %c4_i32_168 : i32 to vector<4x1xi32>
    %861 = arith.select %859, %2, %860 : vector<4x1xi1>, vector<4x1xi32>
    %862 = vector.shape_cast %861 : vector<4x1xi32> to vector<1x4x1xi32>
    %cst_169 = arith.constant dense<2147483647> : vector<1xi32>
    %863 = vector.multi_reduction <minsi>, %862, %cst_169 [1, 2] : vector<1x4x1xi32> to vector<1xi32>
    %864 = vector.shape_cast %863 : vector<1xi32> to vector<1x1x1xi32>
    %865 = vector.extract %864[0, 0, 0] : i32 from vector<1x1x1xi32>
    %866 = arith.index_cast %865 : i32 to index
    %c0_170 = arith.constant 0 : index
    %867 = vector.load %arg5[%866, %c0_170] : memref<4x16xf32, #tpu.memory_space<vmem>>, vector<1x16xf32>
    %868 = vector.broadcast %856 : f32 to vector<1x16xf32>
    %869 = arith.cmpf oge, %867, %868 : vector<1x16xf32>
    %c16_i32_171 = arith.constant 16 : i32
    %870 = vector.broadcast %c16_i32_171 : i32 to vector<1x16xi32>
    %871 = arith.select %869, %3, %870 : vector<1x16xi1>, vector<1x16xi32>
    %872 = vector.shape_cast %871 : vector<1x16xi32> to vector<1x1x16xi32>
    %cst_172 = arith.constant dense<2147483647> : vector<1xi32>
    %873 = vector.multi_reduction <minsi>, %872, %cst_172 [1, 2] : vector<1x1x16xi32> to vector<1xi32>
    %874 = vector.shape_cast %873 : vector<1xi32> to vector<1x1x1xi32>
    %875 = vector.extract %874[0, 0, 0] : i32 from vector<1x1x1xi32>
    %876 = vector.broadcast %875 : i32 to vector<16x1xi32>
    %877 = arith.cmpi eq, %4, %876 : vector<16x1xi32>
    %878 = arith.extui %877 : vector<16x1xi1> to vector<16x1xi32>
    %879 = arith.sitofp %878 : vector<16x1xi32> to vector<16x1xf32>
    %cst_173 = arith.constant dense<0.000000e+00> : vector<4x1xf32>
    %880 = tpu.matmul %745, %879, %cst_173 {dimension_numbers = #tpu.dot_dimension_numbers<[1], [0], [0], [1], [0, 0, 1, 1], [], []>} : vector<4x16xf32>, vector<16x1xf32>, vector<4x1xf32> -> vector<4x1xf32>
    %881 = vector.extract_strided_slice %880 {offsets = [0, 0], sizes = [1, 1], strides = [1, 1]} : vector<4x1xf32> to vector<1x1xf32>
    %882 = vector.extract_strided_slice %880 {offsets = [1, 0], sizes = [1, 1], strides = [1, 1]} : vector<4x1xf32> to vector<1x1xf32>
    %883 = vector.extract_strided_slice %880 {offsets = [2, 0], sizes = [1, 1], strides = [1, 1]} : vector<4x1xf32> to vector<1x1xf32>
    %884 = vector.extract_strided_slice %880 {offsets = [3, 0], sizes = [1, 1], strides = [1, 1]} : vector<4x1xf32> to vector<1x1xf32>
    %885 = vector.broadcast %881 : vector<1x1xf32> to vector<1x16xf32>
    %886 = arith.maximumf %748, %885 : vector<1x16xf32>
    %887 = vector.broadcast %882 : vector<1x1xf32> to vector<1x16xf32>
    %888 = arith.maximumf %749, %887 : vector<1x16xf32>
    %889 = vector.broadcast %883 : vector<1x1xf32> to vector<1x16xf32>
    %890 = arith.minimumf %750, %889 : vector<1x16xf32>
    %891 = vector.broadcast %884 : vector<1x1xf32> to vector<1x16xf32>
    %892 = arith.minimumf %751, %891 : vector<1x16xf32>
    %893 = arith.subf %890, %886 : vector<1x16xf32>
    %cst_174 = arith.constant 0.000000e+00 : f32
    %894 = vector.broadcast %cst_174 : f32 to vector<1x16xf32>
    %895 = arith.maximumf %893, %894 : vector<1x16xf32>
    %896 = arith.subf %892, %888 : vector<1x16xf32>
    %cst_175 = arith.constant 0.000000e+00 : f32
    %897 = vector.broadcast %cst_175 : f32 to vector<1x16xf32>
    %898 = arith.maximumf %896, %897 : vector<1x16xf32>
    %899 = arith.mulf %895, %898 : vector<1x16xf32>
    %900 = arith.subf %883, %881 : vector<1x1xf32>
    %901 = arith.subf %884, %882 : vector<1x1xf32>
    %902 = arith.mulf %900, %901 : vector<1x1xf32>
    %903 = vector.broadcast %902 : vector<1x1xf32> to vector<1x16xf32>
    %904 = arith.addf %754, %903 : vector<1x16xf32>
    %905 = arith.subf %904, %899 : vector<1x16xf32>
    %906 = vector.broadcast %1 : f32 to vector<1x16xf32>
    %907 = arith.mulf %906, %905 : vector<1x16xf32>
    %908 = arith.cmpf ogt, %899, %907 : vector<1x16xf32>
    %909 = vector.broadcast %875 : i32 to vector<1x16xi32>
    %910 = arith.cmpi eq, %3, %909 : vector<1x16xi32>
    %911 = arith.ori %908, %910 : vector<1x16xi1>
    %cst_176 = arith.constant -1.000000e+30 : f32
    %912 = vector.broadcast %cst_176 : f32 to vector<1x16xf32>
    %913 = arith.select %911, %912, %867 : vector<1x16xi1>, vector<1x16xf32>
    %914 = arith.index_cast %865 : i32 to index
    %c0_177 = arith.constant 0 : index
    %915 = vector.load %arg5[%914, %c0_177] : memref<4x16xf32, #tpu.memory_space<vmem>>, vector<1x16xf32>
    tpu.vector_store %arg5[%914, %c0_177], %913 {strides = array<i32>} : memref<4x16xf32, #tpu.memory_space<vmem>>, vector<1x16xf32>,
    %916 = vector.broadcast %865 : i32 to vector<4x1xi32>
    %917 = arith.cmpi eq, %2, %916 : vector<4x1xi32>
    %918 = vector.shape_cast %913 : vector<1x16xf32> to vector<1x1x16xf32>
    %cst_178 = arith.constant dense<0xFF800000> : vector<1xf32>
    %919 = vector.multi_reduction <maximumf>, %918, %cst_178 [1, 2] : vector<1x1x16xf32> to vector<1xf32>
    %920 = vector.shape_cast %919 : vector<1xf32> to vector<1x1x1xf32>
    %921 = vector.extract %920[0, 0, 0] : f32 from vector<1x1x1xf32>
    %922 = vector.broadcast %921 : f32 to vector<4x1xf32>
    %923 = arith.select %917, %922, %836 : vector<4x1xi1>, vector<4x1xf32>
    %924 = vector.broadcast %c1_i32_165 : i32 to vector<1x8xi32>
    %925 = arith.cmpi eq, %5, %924 : vector<1x8xi32>
    %926 = vector.broadcast %857 : i1 to vector<1x8xi1>
    %927 = arith.andi %925, %926 : vector<1x8xi1>
    %928 = vector.shape_cast %927 : vector<1x8xi1> to vector<1x8xi1>
    %929 = vector.broadcast %928 : vector<1x8xi1> to vector<4x8xi1>
    %930 = vector.shape_cast %880 : vector<4x1xf32> to vector<4x1xf32>
    %931 = vector.broadcast %930 : vector<4x1xf32> to vector<4x8xf32>
    %932 = arith.select %929, %931, %845 : vector<4x8xi1>, vector<4x8xf32>
    %933 = vector.broadcast %856 : f32 to vector<1x8xf32>
    %934 = arith.select %927, %933, %847 : vector<1x8xi1>, vector<1x8xf32>
    %935 = arith.sitofp %865 : i32 to f32
    %936 = vector.broadcast %935 : f32 to vector<1x8xf32>
    %937 = arith.select %927, %936, %850 : vector<1x8xi1>, vector<1x8xf32>
    %cst_179 = arith.constant 1.000000e+00 : f32
    %938 = vector.broadcast %cst_179 : f32 to vector<1x8xf32>
    %939 = arith.select %927, %938, %852 : vector<1x8xi1>, vector<1x8xf32>
    %c2_i32_180 = arith.constant 2 : i32
    %940 = vector.shape_cast %923 : vector<4x1xf32> to vector<1x4x1xf32>
    %cst_181 = arith.constant dense<0xFF800000> : vector<1xf32>
    %941 = vector.multi_reduction <maximumf>, %940, %cst_181 [1, 2] : vector<1x4x1xf32> to vector<1xf32>
    %942 = vector.shape_cast %941 : vector<1xf32> to vector<1x1x1xf32>
    %943 = vector.extract %942[0, 0, 0] : f32 from vector<1x1x1xf32>
    %cst_182 = arith.constant -1.000000e+29 : f32
    %944 = arith.cmpf ogt, %943, %cst_182 : f32
    %945 = vector.broadcast %943 : f32 to vector<4x1xf32>
    %946 = arith.cmpf oge, %923, %945 : vector<4x1xf32>
    %c4_i32_183 = arith.constant 4 : i32
    %947 = vector.broadcast %c4_i32_183 : i32 to vector<4x1xi32>
    %948 = arith.select %946, %2, %947 : vector<4x1xi1>, vector<4x1xi32>
    %949 = vector.shape_cast %948 : vector<4x1xi32> to vector<1x4x1xi32>
    %cst_184 = arith.constant dense<2147483647> : vector<1xi32>
    %950 = vector.multi_reduction <minsi>, %949, %cst_184 [1, 2] : vector<1x4x1xi32> to vector<1xi32>
    %951 = vector.shape_cast %950 : vector<1xi32> to vector<1x1x1xi32>
    %952 = vector.extract %951[0, 0, 0] : i32 from vector<1x1x1xi32>
    %953 = arith.index_cast %952 : i32 to index
    %c0_185 = arith.constant 0 : index
    %954 = vector.load %arg5[%953, %c0_185] : memref<4x16xf32, #tpu.memory_space<vmem>>, vector<1x16xf32>
    %955 = vector.broadcast %943 : f32 to vector<1x16xf32>
    %956 = arith.cmpf oge, %954, %955 : vector<1x16xf32>
    %c16_i32_186 = arith.constant 16 : i32
    %957 = vector.broadcast %c16_i32_186 : i32 to vector<1x16xi32>
    %958 = arith.select %956, %3, %957 : vector<1x16xi1>, vector<1x16xi32>
    %959 = vector.shape_cast %958 : vector<1x16xi32> to vector<1x1x16xi32>
    %cst_187 = arith.constant dense<2147483647> : vector<1xi32>
    %960 = vector.multi_reduction <minsi>, %959, %cst_187 [1, 2] : vector<1x1x16xi32> to vector<1xi32>
    %961 = vector.shape_cast %960 : vector<1xi32> to vector<1x1x1xi32>
    %962 = vector.extract %961[0, 0, 0] : i32 from vector<1x1x1xi32>
    %963 = vector.broadcast %962 : i32 to vector<16x1xi32>
    %964 = arith.cmpi eq, %4, %963 : vector<16x1xi32>
    %965 = arith.extui %964 : vector<16x1xi1> to vector<16x1xi32>
    %966 = arith.sitofp %965 : vector<16x1xi32> to vector<16x1xf32>
    %cst_188 = arith.constant dense<0.000000e+00> : vector<4x1xf32>
    %967 = tpu.matmul %745, %966, %cst_188 {dimension_numbers = #tpu.dot_dimension_numbers<[1], [0], [0], [1], [0, 0, 1, 1], [], []>} : vector<4x16xf32>, vector<16x1xf32>, vector<4x1xf32> -> vector<4x1xf32>
    %968 = vector.extract_strided_slice %967 {offsets = [0, 0], sizes = [1, 1], strides = [1, 1]} : vector<4x1xf32> to vector<1x1xf32>
    %969 = vector.extract_strided_slice %967 {offsets = [1, 0], sizes = [1, 1], strides = [1, 1]} : vector<4x1xf32> to vector<1x1xf32>
    %970 = vector.extract_strided_slice %967 {offsets = [2, 0], sizes = [1, 1], strides = [1, 1]} : vector<4x1xf32> to vector<1x1xf32>
    %971 = vector.extract_strided_slice %967 {offsets = [3, 0], sizes = [1, 1], strides = [1, 1]} : vector<4x1xf32> to vector<1x1xf32>
    %972 = vector.broadcast %968 : vector<1x1xf32> to vector<1x16xf32>
    %973 = arith.maximumf %748, %972 : vector<1x16xf32>
    %974 = vector.broadcast %969 : vector<1x1xf32> to vector<1x16xf32>
    %975 = arith.maximumf %749, %974 : vector<1x16xf32>
    %976 = vector.broadcast %970 : vector<1x1xf32> to vector<1x16xf32>
    %977 = arith.minimumf %750, %976 : vector<1x16xf32>
    %978 = vector.broadcast %971 : vector<1x1xf32> to vector<1x16xf32>
    %979 = arith.minimumf %751, %978 : vector<1x16xf32>
    %980 = arith.subf %977, %973 : vector<1x16xf32>
    %cst_189 = arith.constant 0.000000e+00 : f32
    %981 = vector.broadcast %cst_189 : f32 to vector<1x16xf32>
    %982 = arith.maximumf %980, %981 : vector<1x16xf32>
    %983 = arith.subf %979, %975 : vector<1x16xf32>
    %cst_190 = arith.constant 0.000000e+00 : f32
    %984 = vector.broadcast %cst_190 : f32 to vector<1x16xf32>
    %985 = arith.maximumf %983, %984 : vector<1x16xf32>
    %986 = arith.mulf %982, %985 : vector<1x16xf32>
    %987 = arith.subf %970, %968 : vector<1x1xf32>
    %988 = arith.subf %971, %969 : vector<1x1xf32>
    %989 = arith.mulf %987, %988 : vector<1x1xf32>
    %990 = vector.broadcast %989 : vector<1x1xf32> to vector<1x16xf32>
    %991 = arith.addf %754, %990 : vector<1x16xf32>
    %992 = arith.subf %991, %986 : vector<1x16xf32>
    %993 = vector.broadcast %1 : f32 to vector<1x16xf32>
    %994 = arith.mulf %993, %992 : vector<1x16xf32>
    %995 = arith.cmpf ogt, %986, %994 : vector<1x16xf32>
    %996 = vector.broadcast %962 : i32 to vector<1x16xi32>
    %997 = arith.cmpi eq, %3, %996 : vector<1x16xi32>
    %998 = arith.ori %995, %997 : vector<1x16xi1>
    %cst_191 = arith.constant -1.000000e+30 : f32
    %999 = vector.broadcast %cst_191 : f32 to vector<1x16xf32>
    %1000 = arith.select %998, %999, %954 : vector<1x16xi1>, vector<1x16xf32>
    %1001 = arith.index_cast %952 : i32 to index
    %c0_192 = arith.constant 0 : index
    %1002 = vector.load %arg5[%1001, %c0_192] : memref<4x16xf32, #tpu.memory_space<vmem>>, vector<1x16xf32>
    tpu.vector_store %arg5[%1001, %c0_192], %1000 {strides = array<i32>} : memref<4x16xf32, #tpu.memory_space<vmem>>, vector<1x16xf32>,
    %1003 = vector.broadcast %952 : i32 to vector<4x1xi32>
    %1004 = arith.cmpi eq, %2, %1003 : vector<4x1xi32>
    %1005 = vector.shape_cast %1000 : vector<1x16xf32> to vector<1x1x16xf32>
    %cst_193 = arith.constant dense<0xFF800000> : vector<1xf32>
    %1006 = vector.multi_reduction <maximumf>, %1005, %cst_193 [1, 2] : vector<1x1x16xf32> to vector<1xf32>
    %1007 = vector.shape_cast %1006 : vector<1xf32> to vector<1x1x1xf32>
    %1008 = vector.extract %1007[0, 0, 0] : f32 from vector<1x1x1xf32>
    %1009 = vector.broadcast %1008 : f32 to vector<4x1xf32>
    %1010 = arith.select %1004, %1009, %923 : vector<4x1xi1>, vector<4x1xf32>
    %1011 = vector.broadcast %c2_i32_180 : i32 to vector<1x8xi32>
    %1012 = arith.cmpi eq, %5, %1011 : vector<1x8xi32>
    %1013 = vector.broadcast %944 : i1 to vector<1x8xi1>
    %1014 = arith.andi %1012, %1013 : vector<1x8xi1>
    %1015 = vector.shape_cast %1014 : vector<1x8xi1> to vector<1x8xi1>
    %1016 = vector.broadcast %1015 : vector<1x8xi1> to vector<4x8xi1>
    %1017 = vector.shape_cast %967 : vector<4x1xf32> to vector<4x1xf32>
    %1018 = vector.broadcast %1017 : vector<4x1xf32> to vector<4x8xf32>
    %1019 = arith.select %1016, %1018, %932 : vector<4x8xi1>, vector<4x8xf32>
    %1020 = vector.broadcast %943 : f32 to vector<1x8xf32>
    %1021 = arith.select %1014, %1020, %934 : vector<1x8xi1>, vector<1x8xf32>
    %1022 = arith.sitofp %952 : i32 to f32
    %1023 = vector.broadcast %1022 : f32 to vector<1x8xf32>
    %1024 = arith.select %1014, %1023, %937 : vector<1x8xi1>, vector<1x8xf32>
    %cst_194 = arith.constant 1.000000e+00 : f32
    %1025 = vector.broadcast %cst_194 : f32 to vector<1x8xf32>
    %1026 = arith.select %1014, %1025, %939 : vector<1x8xi1>, vector<1x8xf32>
    %c3_i32_195 = arith.constant 3 : i32
    %1027 = vector.shape_cast %1010 : vector<4x1xf32> to vector<1x4x1xf32>
    %cst_196 = arith.constant dense<0xFF800000> : vector<1xf32>
    %1028 = vector.multi_reduction <maximumf>, %1027, %cst_196 [1, 2] : vector<1x4x1xf32> to vector<1xf32>
    %1029 = vector.shape_cast %1028 : vector<1xf32> to vector<1x1x1xf32>
    %1030 = vector.extract %1029[0, 0, 0] : f32 from vector<1x1x1xf32>
    %cst_197 = arith.constant -1.000000e+29 : f32
    %1031 = arith.cmpf ogt, %1030, %cst_197 : f32
    %1032 = vector.broadcast %1030 : f32 to vector<4x1xf32>
    %1033 = arith.cmpf oge, %1010, %1032 : vector<4x1xf32>
    %c4_i32_198 = arith.constant 4 : i32
    %1034 = vector.broadcast %c4_i32_198 : i32 to vector<4x1xi32>
    %1035 = arith.select %1033, %2, %1034 : vector<4x1xi1>, vector<4x1xi32>
    %1036 = vector.shape_cast %1035 : vector<4x1xi32> to vector<1x4x1xi32>
    %cst_199 = arith.constant dense<2147483647> : vector<1xi32>
    %1037 = vector.multi_reduction <minsi>, %1036, %cst_199 [1, 2] : vector<1x4x1xi32> to vector<1xi32>
    %1038 = vector.shape_cast %1037 : vector<1xi32> to vector<1x1x1xi32>
    %1039 = vector.extract %1038[0, 0, 0] : i32 from vector<1x1x1xi32>
    %1040 = arith.index_cast %1039 : i32 to index
    %c0_200 = arith.constant 0 : index
    %1041 = vector.load %arg5[%1040, %c0_200] : memref<4x16xf32, #tpu.memory_space<vmem>>, vector<1x16xf32>
    %1042 = vector.broadcast %1030 : f32 to vector<1x16xf32>
    %1043 = arith.cmpf oge, %1041, %1042 : vector<1x16xf32>
    %c16_i32_201 = arith.constant 16 : i32
    %1044 = vector.broadcast %c16_i32_201 : i32 to vector<1x16xi32>
    %1045 = arith.select %1043, %3, %1044 : vector<1x16xi1>, vector<1x16xi32>
    %1046 = vector.shape_cast %1045 : vector<1x16xi32> to vector<1x1x16xi32>
    %cst_202 = arith.constant dense<2147483647> : vector<1xi32>
    %1047 = vector.multi_reduction <minsi>, %1046, %cst_202 [1, 2] : vector<1x1x16xi32> to vector<1xi32>
    %1048 = vector.shape_cast %1047 : vector<1xi32> to vector<1x1x1xi32>
    %1049 = vector.extract %1048[0, 0, 0] : i32 from vector<1x1x1xi32>
    %1050 = vector.broadcast %1049 : i32 to vector<16x1xi32>
    %1051 = arith.cmpi eq, %4, %1050 : vector<16x1xi32>
    %1052 = arith.extui %1051 : vector<16x1xi1> to vector<16x1xi32>
    %1053 = arith.sitofp %1052 : vector<16x1xi32> to vector<16x1xf32>
    %cst_203 = arith.constant dense<0.000000e+00> : vector<4x1xf32>
    %1054 = tpu.matmul %745, %1053, %cst_203 {dimension_numbers = #tpu.dot_dimension_numbers<[1], [0], [0], [1], [0, 0, 1, 1], [], []>} : vector<4x16xf32>, vector<16x1xf32>, vector<4x1xf32> -> vector<4x1xf32>
    %1055 = vector.extract_strided_slice %1054 {offsets = [0, 0], sizes = [1, 1], strides = [1, 1]} : vector<4x1xf32> to vector<1x1xf32>
    %1056 = vector.extract_strided_slice %1054 {offsets = [1, 0], sizes = [1, 1], strides = [1, 1]} : vector<4x1xf32> to vector<1x1xf32>
    %1057 = vector.extract_strided_slice %1054 {offsets = [2, 0], sizes = [1, 1], strides = [1, 1]} : vector<4x1xf32> to vector<1x1xf32>
    %1058 = vector.extract_strided_slice %1054 {offsets = [3, 0], sizes = [1, 1], strides = [1, 1]} : vector<4x1xf32> to vector<1x1xf32>
    %1059 = vector.broadcast %1055 : vector<1x1xf32> to vector<1x16xf32>
    %1060 = arith.maximumf %748, %1059 : vector<1x16xf32>
    %1061 = vector.broadcast %1056 : vector<1x1xf32> to vector<1x16xf32>
    %1062 = arith.maximumf %749, %1061 : vector<1x16xf32>
    %1063 = vector.broadcast %1057 : vector<1x1xf32> to vector<1x16xf32>
    %1064 = arith.minimumf %750, %1063 : vector<1x16xf32>
    %1065 = vector.broadcast %1058 : vector<1x1xf32> to vector<1x16xf32>
    %1066 = arith.minimumf %751, %1065 : vector<1x16xf32>
    %1067 = arith.subf %1064, %1060 : vector<1x16xf32>
    %cst_204 = arith.constant 0.000000e+00 : f32
    %1068 = vector.broadcast %cst_204 : f32 to vector<1x16xf32>
    %1069 = arith.maximumf %1067, %1068 : vector<1x16xf32>
    %1070 = arith.subf %1066, %1062 : vector<1x16xf32>
    %cst_205 = arith.constant 0.000000e+00 : f32
    %1071 = vector.broadcast %cst_205 : f32 to vector<1x16xf32>
    %1072 = arith.maximumf %1070, %1071 : vector<1x16xf32>
    %1073 = arith.mulf %1069, %1072 : vector<1x16xf32>
    %1074 = arith.subf %1057, %1055 : vector<1x1xf32>
    %1075 = arith.subf %1058, %1056 : vector<1x1xf32>
    %1076 = arith.mulf %1074, %1075 : vector<1x1xf32>
    %1077 = vector.broadcast %1076 : vector<1x1xf32> to vector<1x16xf32>
    %1078 = arith.addf %754, %1077 : vector<1x16xf32>
    %1079 = arith.subf %1078, %1073 : vector<1x16xf32>
    %1080 = vector.broadcast %1 : f32 to vector<1x16xf32>
    %1081 = arith.mulf %1080, %1079 : vector<1x16xf32>
    %1082 = arith.cmpf ogt, %1073, %1081 : vector<1x16xf32>
    %1083 = vector.broadcast %1049 : i32 to vector<1x16xi32>
    %1084 = arith.cmpi eq, %3, %1083 : vector<1x16xi32>
    %1085 = arith.ori %1082, %1084 : vector<1x16xi1>
    %cst_206 = arith.constant -1.000000e+30 : f32
    %1086 = vector.broadcast %cst_206 : f32 to vector<1x16xf32>
    %1087 = arith.select %1085, %1086, %1041 : vector<1x16xi1>, vector<1x16xf32>
    %1088 = arith.index_cast %1039 : i32 to index
    %c0_207 = arith.constant 0 : index
    %1089 = vector.load %arg5[%1088, %c0_207] : memref<4x16xf32, #tpu.memory_space<vmem>>, vector<1x16xf32>
    tpu.vector_store %arg5[%1088, %c0_207], %1087 {strides = array<i32>} : memref<4x16xf32, #tpu.memory_space<vmem>>, vector<1x16xf32>,
    %1090 = vector.broadcast %1039 : i32 to vector<4x1xi32>
    %1091 = arith.cmpi eq, %2, %1090 : vector<4x1xi32>
    %1092 = vector.shape_cast %1087 : vector<1x16xf32> to vector<1x1x16xf32>
    %cst_208 = arith.constant dense<0xFF800000> : vector<1xf32>
    %1093 = vector.multi_reduction <maximumf>, %1092, %cst_208 [1, 2] : vector<1x1x16xf32> to vector<1xf32>
    %1094 = vector.shape_cast %1093 : vector<1xf32> to vector<1x1x1xf32>
    %1095 = vector.extract %1094[0, 0, 0] : f32 from vector<1x1x1xf32>
    %1096 = vector.broadcast %1095 : f32 to vector<4x1xf32>
    %1097 = arith.select %1091, %1096, %1010 : vector<4x1xi1>, vector<4x1xf32>
    %1098 = vector.broadcast %c3_i32_195 : i32 to vector<1x8xi32>
    %1099 = arith.cmpi eq, %5, %1098 : vector<1x8xi32>
    %1100 = vector.broadcast %1031 : i1 to vector<1x8xi1>
    %1101 = arith.andi %1099, %1100 : vector<1x8xi1>
    %1102 = vector.shape_cast %1101 : vector<1x8xi1> to vector<1x8xi1>
    %1103 = vector.broadcast %1102 : vector<1x8xi1> to vector<4x8xi1>
    %1104 = vector.shape_cast %1054 : vector<4x1xf32> to vector<4x1xf32>
    %1105 = vector.broadcast %1104 : vector<4x1xf32> to vector<4x8xf32>
    %1106 = arith.select %1103, %1105, %1019 : vector<4x8xi1>, vector<4x8xf32>
    %1107 = vector.broadcast %1030 : f32 to vector<1x8xf32>
    %1108 = arith.select %1101, %1107, %1021 : vector<1x8xi1>, vector<1x8xf32>
    %1109 = arith.sitofp %1039 : i32 to f32
    %1110 = vector.broadcast %1109 : f32 to vector<1x8xf32>
    %1111 = arith.select %1101, %1110, %1024 : vector<1x8xi1>, vector<1x8xf32>
    %cst_209 = arith.constant 1.000000e+00 : f32
    %1112 = vector.broadcast %cst_209 : f32 to vector<1x8xf32>
    %1113 = arith.select %1101, %1112, %1026 : vector<1x8xi1>, vector<1x8xf32>
    %c4_i32_210 = arith.constant 4 : i32
    %1114 = vector.shape_cast %1097 : vector<4x1xf32> to vector<1x4x1xf32>
    %cst_211 = arith.constant dense<0xFF800000> : vector<1xf32>
    %1115 = vector.multi_reduction <maximumf>, %1114, %cst_211 [1, 2] : vector<1x4x1xf32> to vector<1xf32>
    %1116 = vector.shape_cast %1115 : vector<1xf32> to vector<1x1x1xf32>
    %1117 = vector.extract %1116[0, 0, 0] : f32 from vector<1x1x1xf32>
    %cst_212 = arith.constant -1.000000e+29 : f32
    %1118 = arith.cmpf ogt, %1117, %cst_212 : f32
    %1119 = vector.broadcast %1117 : f32 to vector<4x1xf32>
    %1120 = arith.cmpf oge, %1097, %1119 : vector<4x1xf32>
    %c4_i32_213 = arith.constant 4 : i32
    %1121 = vector.broadcast %c4_i32_213 : i32 to vector<4x1xi32>
    %1122 = arith.select %1120, %2, %1121 : vector<4x1xi1>, vector<4x1xi32>
    %1123 = vector.shape_cast %1122 : vector<4x1xi32> to vector<1x4x1xi32>
    %cst_214 = arith.constant dense<2147483647> : vector<1xi32>
    %1124 = vector.multi_reduction <minsi>, %1123, %cst_214 [1, 2] : vector<1x4x1xi32> to vector<1xi32>
    %1125 = vector.shape_cast %1124 : vector<1xi32> to vector<1x1x1xi32>
    %1126 = vector.extract %1125[0, 0, 0] : i32 from vector<1x1x1xi32>
    %1127 = arith.index_cast %1126 : i32 to index
    %c0_215 = arith.constant 0 : index
    %1128 = vector.load %arg5[%1127, %c0_215] : memref<4x16xf32, #tpu.memory_space<vmem>>, vector<1x16xf32>
    %1129 = vector.broadcast %1117 : f32 to vector<1x16xf32>
    %1130 = arith.cmpf oge, %1128, %1129 : vector<1x16xf32>
    %c16_i32_216 = arith.constant 16 : i32
    %1131 = vector.broadcast %c16_i32_216 : i32 to vector<1x16xi32>
    %1132 = arith.select %1130, %3, %1131 : vector<1x16xi1>, vector<1x16xi32>
    %1133 = vector.shape_cast %1132 : vector<1x16xi32> to vector<1x1x16xi32>
    %cst_217 = arith.constant dense<2147483647> : vector<1xi32>
    %1134 = vector.multi_reduction <minsi>, %1133, %cst_217 [1, 2] : vector<1x1x16xi32> to vector<1xi32>
    %1135 = vector.shape_cast %1134 : vector<1xi32> to vector<1x1x1xi32>
    %1136 = vector.extract %1135[0, 0, 0] : i32 from vector<1x1x1xi32>
    %1137 = vector.broadcast %1136 : i32 to vector<16x1xi32>
    %1138 = arith.cmpi eq, %4, %1137 : vector<16x1xi32>
    %1139 = arith.extui %1138 : vector<16x1xi1> to vector<16x1xi32>
    %1140 = arith.sitofp %1139 : vector<16x1xi32> to vector<16x1xf32>
    %cst_218 = arith.constant dense<0.000000e+00> : vector<4x1xf32>
    %1141 = tpu.matmul %745, %1140, %cst_218 {dimension_numbers = #tpu.dot_dimension_numbers<[1], [0], [0], [1], [0, 0, 1, 1], [], []>} : vector<4x16xf32>, vector<16x1xf32>, vector<4x1xf32> -> vector<4x1xf32>
    %1142 = vector.extract_strided_slice %1141 {offsets = [0, 0], sizes = [1, 1], strides = [1, 1]} : vector<4x1xf32> to vector<1x1xf32>
    %1143 = vector.extract_strided_slice %1141 {offsets = [1, 0], sizes = [1, 1], strides = [1, 1]} : vector<4x1xf32> to vector<1x1xf32>
    %1144 = vector.extract_strided_slice %1141 {offsets = [2, 0], sizes = [1, 1], strides = [1, 1]} : vector<4x1xf32> to vector<1x1xf32>
    %1145 = vector.extract_strided_slice %1141 {offsets = [3, 0], sizes = [1, 1], strides = [1, 1]} : vector<4x1xf32> to vector<1x1xf32>
    %1146 = vector.broadcast %1142 : vector<1x1xf32> to vector<1x16xf32>
    %1147 = arith.maximumf %748, %1146 : vector<1x16xf32>
    %1148 = vector.broadcast %1143 : vector<1x1xf32> to vector<1x16xf32>
    %1149 = arith.maximumf %749, %1148 : vector<1x16xf32>
    %1150 = vector.broadcast %1144 : vector<1x1xf32> to vector<1x16xf32>
    %1151 = arith.minimumf %750, %1150 : vector<1x16xf32>
    %1152 = vector.broadcast %1145 : vector<1x1xf32> to vector<1x16xf32>
    %1153 = arith.minimumf %751, %1152 : vector<1x16xf32>
    %1154 = arith.subf %1151, %1147 : vector<1x16xf32>
    %cst_219 = arith.constant 0.000000e+00 : f32
    %1155 = vector.broadcast %cst_219 : f32 to vector<1x16xf32>
    %1156 = arith.maximumf %1154, %1155 : vector<1x16xf32>
    %1157 = arith.subf %1153, %1149 : vector<1x16xf32>
    %cst_220 = arith.constant 0.000000e+00 : f32
    %1158 = vector.broadcast %cst_220 : f32 to vector<1x16xf32>
    %1159 = arith.maximumf %1157, %1158 : vector<1x16xf32>
    %1160 = arith.mulf %1156, %1159 : vector<1x16xf32>
    %1161 = arith.subf %1144, %1142 : vector<1x1xf32>
    %1162 = arith.subf %1145, %1143 : vector<1x1xf32>
    %1163 = arith.mulf %1161, %1162 : vector<1x1xf32>
    %1164 = vector.broadcast %1163 : vector<1x1xf32> to vector<1x16xf32>
    %1165 = arith.addf %754, %1164 : vector<1x16xf32>
    %1166 = arith.subf %1165, %1160 : vector<1x16xf32>
    %1167 = vector.broadcast %1 : f32 to vector<1x16xf32>
    %1168 = arith.mulf %1167, %1166 : vector<1x16xf32>
    %1169 = arith.cmpf ogt, %1160, %1168 : vector<1x16xf32>
    %1170 = vector.broadcast %1136 : i32 to vector<1x16xi32>
    %1171 = arith.cmpi eq, %3, %1170 : vector<1x16xi32>
    %1172 = arith.ori %1169, %1171 : vector<1x16xi1>
    %cst_221 = arith.constant -1.000000e+30 : f32
    %1173 = vector.broadcast %cst_221 : f32 to vector<1x16xf32>
    %1174 = arith.select %1172, %1173, %1128 : vector<1x16xi1>, vector<1x16xf32>
    %1175 = arith.index_cast %1126 : i32 to index
    %c0_222 = arith.constant 0 : index
    %1176 = vector.load %arg5[%1175, %c0_222] : memref<4x16xf32, #tpu.memory_space<vmem>>, vector<1x16xf32>
    tpu.vector_store %arg5[%1175, %c0_222], %1174 {strides = array<i32>} : memref<4x16xf32, #tpu.memory_space<vmem>>, vector<1x16xf32>,
    %1177 = vector.broadcast %1126 : i32 to vector<4x1xi32>
    %1178 = arith.cmpi eq, %2, %1177 : vector<4x1xi32>
    %1179 = vector.shape_cast %1174 : vector<1x16xf32> to vector<1x1x16xf32>
    %cst_223 = arith.constant dense<0xFF800000> : vector<1xf32>
    %1180 = vector.multi_reduction <maximumf>, %1179, %cst_223 [1, 2] : vector<1x1x16xf32> to vector<1xf32>
    %1181 = vector.shape_cast %1180 : vector<1xf32> to vector<1x1x1xf32>
    %1182 = vector.extract %1181[0, 0, 0] : f32 from vector<1x1x1xf32>
    %1183 = vector.broadcast %1182 : f32 to vector<4x1xf32>
    %1184 = arith.select %1178, %1183, %1097 : vector<4x1xi1>, vector<4x1xf32>
    %1185 = vector.broadcast %c4_i32_210 : i32 to vector<1x8xi32>
    %1186 = arith.cmpi eq, %5, %1185 : vector<1x8xi32>
    %1187 = vector.broadcast %1118 : i1 to vector<1x8xi1>
    %1188 = arith.andi %1186, %1187 : vector<1x8xi1>
    %1189 = vector.shape_cast %1188 : vector<1x8xi1> to vector<1x8xi1>
    %1190 = vector.broadcast %1189 : vector<1x8xi1> to vector<4x8xi1>
    %1191 = vector.shape_cast %1141 : vector<4x1xf32> to vector<4x1xf32>
    %1192 = vector.broadcast %1191 : vector<4x1xf32> to vector<4x8xf32>
    %1193 = arith.select %1190, %1192, %1106 : vector<4x8xi1>, vector<4x8xf32>
    %1194 = vector.broadcast %1117 : f32 to vector<1x8xf32>
    %1195 = arith.select %1188, %1194, %1108 : vector<1x8xi1>, vector<1x8xf32>
    %1196 = arith.sitofp %1126 : i32 to f32
    %1197 = vector.broadcast %1196 : f32 to vector<1x8xf32>
    %1198 = arith.select %1188, %1197, %1111 : vector<1x8xi1>, vector<1x8xf32>
    %cst_224 = arith.constant 1.000000e+00 : f32
    %1199 = vector.broadcast %cst_224 : f32 to vector<1x8xf32>
    %1200 = arith.select %1188, %1199, %1113 : vector<1x8xi1>, vector<1x8xf32>
    %c5_i32_225 = arith.constant 5 : i32
    %1201 = vector.shape_cast %1184 : vector<4x1xf32> to vector<1x4x1xf32>
    %cst_226 = arith.constant dense<0xFF800000> : vector<1xf32>
    %1202 = vector.multi_reduction <maximumf>, %1201, %cst_226 [1, 2] : vector<1x4x1xf32> to vector<1xf32>
    %1203 = vector.shape_cast %1202 : vector<1xf32> to vector<1x1x1xf32>
    %1204 = vector.extract %1203[0, 0, 0] : f32 from vector<1x1x1xf32>
    %cst_227 = arith.constant -1.000000e+29 : f32
    %1205 = arith.cmpf ogt, %1204, %cst_227 : f32
    %1206 = vector.broadcast %1204 : f32 to vector<4x1xf32>
    %1207 = arith.cmpf oge, %1184, %1206 : vector<4x1xf32>
    %c4_i32_228 = arith.constant 4 : i32
    %1208 = vector.broadcast %c4_i32_228 : i32 to vector<4x1xi32>
    %1209 = arith.select %1207, %2, %1208 : vector<4x1xi1>, vector<4x1xi32>
    %1210 = vector.shape_cast %1209 : vector<4x1xi32> to vector<1x4x1xi32>
    %cst_229 = arith.constant dense<2147483647> : vector<1xi32>
    %1211 = vector.multi_reduction <minsi>, %1210, %cst_229 [1, 2] : vector<1x4x1xi32> to vector<1xi32>
    %1212 = vector.shape_cast %1211 : vector<1xi32> to vector<1x1x1xi32>
    %1213 = vector.extract %1212[0, 0, 0] : i32 from vector<1x1x1xi32>
    %1214 = arith.index_cast %1213 : i32 to index
    %c0_230 = arith.constant 0 : index
    %1215 = vector.load %arg5[%1214, %c0_230] : memref<4x16xf32, #tpu.memory_space<vmem>>, vector<1x16xf32>
    %1216 = vector.broadcast %1204 : f32 to vector<1x16xf32>
    %1217 = arith.cmpf oge, %1215, %1216 : vector<1x16xf32>
    %c16_i32_231 = arith.constant 16 : i32
    %1218 = vector.broadcast %c16_i32_231 : i32 to vector<1x16xi32>
    %1219 = arith.select %1217, %3, %1218 : vector<1x16xi1>, vector<1x16xi32>
    %1220 = vector.shape_cast %1219 : vector<1x16xi32> to vector<1x1x16xi32>
    %cst_232 = arith.constant dense<2147483647> : vector<1xi32>
    %1221 = vector.multi_reduction <minsi>, %1220, %cst_232 [1, 2] : vector<1x1x16xi32> to vector<1xi32>
    %1222 = vector.shape_cast %1221 : vector<1xi32> to vector<1x1x1xi32>
    %1223 = vector.extract %1222[0, 0, 0] : i32 from vector<1x1x1xi32>
    %1224 = vector.broadcast %1223 : i32 to vector<16x1xi32>
    %1225 = arith.cmpi eq, %4, %1224 : vector<16x1xi32>
    %1226 = arith.extui %1225 : vector<16x1xi1> to vector<16x1xi32>
    %1227 = arith.sitofp %1226 : vector<16x1xi32> to vector<16x1xf32>
    %cst_233 = arith.constant dense<0.000000e+00> : vector<4x1xf32>
    %1228 = tpu.matmul %745, %1227, %cst_233 {dimension_numbers = #tpu.dot_dimension_numbers<[1], [0], [0], [1], [0, 0, 1, 1], [], []>} : vector<4x16xf32>, vector<16x1xf32>, vector<4x1xf32> -> vector<4x1xf32>
    %1229 = vector.extract_strided_slice %1228 {offsets = [0, 0], sizes = [1, 1], strides = [1, 1]} : vector<4x1xf32> to vector<1x1xf32>
    %1230 = vector.extract_strided_slice %1228 {offsets = [1, 0], sizes = [1, 1], strides = [1, 1]} : vector<4x1xf32> to vector<1x1xf32>
    %1231 = vector.extract_strided_slice %1228 {offsets = [2, 0], sizes = [1, 1], strides = [1, 1]} : vector<4x1xf32> to vector<1x1xf32>
    %1232 = vector.extract_strided_slice %1228 {offsets = [3, 0], sizes = [1, 1], strides = [1, 1]} : vector<4x1xf32> to vector<1x1xf32>
    %1233 = vector.broadcast %1229 : vector<1x1xf32> to vector<1x16xf32>
    %1234 = arith.maximumf %748, %1233 : vector<1x16xf32>
    %1235 = vector.broadcast %1230 : vector<1x1xf32> to vector<1x16xf32>
    %1236 = arith.maximumf %749, %1235 : vector<1x16xf32>
    %1237 = vector.broadcast %1231 : vector<1x1xf32> to vector<1x16xf32>
    %1238 = arith.minimumf %750, %1237 : vector<1x16xf32>
    %1239 = vector.broadcast %1232 : vector<1x1xf32> to vector<1x16xf32>
    %1240 = arith.minimumf %751, %1239 : vector<1x16xf32>
    %1241 = arith.subf %1238, %1234 : vector<1x16xf32>
    %cst_234 = arith.constant 0.000000e+00 : f32
    %1242 = vector.broadcast %cst_234 : f32 to vector<1x16xf32>
    %1243 = arith.maximumf %1241, %1242 : vector<1x16xf32>
    %1244 = arith.subf %1240, %1236 : vector<1x16xf32>
    %cst_235 = arith.constant 0.000000e+00 : f32
    %1245 = vector.broadcast %cst_235 : f32 to vector<1x16xf32>
    %1246 = arith.maximumf %1244, %1245 : vector<1x16xf32>
    %1247 = arith.mulf %1243, %1246 : vector<1x16xf32>
    %1248 = arith.subf %1231, %1229 : vector<1x1xf32>
    %1249 = arith.subf %1232, %1230 : vector<1x1xf32>
    %1250 = arith.mulf %1248, %1249 : vector<1x1xf32>
    %1251 = vector.broadcast %1250 : vector<1x1xf32> to vector<1x16xf32>
    %1252 = arith.addf %754, %1251 : vector<1x16xf32>
    %1253 = arith.subf %1252, %1247 : vector<1x16xf32>
    %1254 = vector.broadcast %1 : f32 to vector<1x16xf32>
    %1255 = arith.mulf %1254, %1253 : vector<1x16xf32>
    %1256 = arith.cmpf ogt, %1247, %1255 : vector<1x16xf32>
    %1257 = vector.broadcast %1223 : i32 to vector<1x16xi32>
    %1258 = arith.cmpi eq, %3, %1257 : vector<1x16xi32>
    %1259 = arith.ori %1256, %1258 : vector<1x16xi1>
    %cst_236 = arith.constant -1.000000e+30 : f32
    %1260 = vector.broadcast %cst_236 : f32 to vector<1x16xf32>
    %1261 = arith.select %1259, %1260, %1215 : vector<1x16xi1>, vector<1x16xf32>
    %1262 = arith.index_cast %1213 : i32 to index
    %c0_237 = arith.constant 0 : index
    %1263 = vector.load %arg5[%1262, %c0_237] : memref<4x16xf32, #tpu.memory_space<vmem>>, vector<1x16xf32>
    tpu.vector_store %arg5[%1262, %c0_237], %1261 {strides = array<i32>} : memref<4x16xf32, #tpu.memory_space<vmem>>, vector<1x16xf32>,
    %1264 = vector.broadcast %1213 : i32 to vector<4x1xi32>
    %1265 = arith.cmpi eq, %2, %1264 : vector<4x1xi32>
    %1266 = vector.shape_cast %1261 : vector<1x16xf32> to vector<1x1x16xf32>
    %cst_238 = arith.constant dense<0xFF800000> : vector<1xf32>
    %1267 = vector.multi_reduction <maximumf>, %1266, %cst_238 [1, 2] : vector<1x1x16xf32> to vector<1xf32>
    %1268 = vector.shape_cast %1267 : vector<1xf32> to vector<1x1x1xf32>
    %1269 = vector.extract %1268[0, 0, 0] : f32 from vector<1x1x1xf32>
    %1270 = vector.broadcast %1269 : f32 to vector<4x1xf32>
    %1271 = arith.select %1265, %1270, %1184 : vector<4x1xi1>, vector<4x1xf32>
    %1272 = vector.broadcast %c5_i32_225 : i32 to vector<1x8xi32>
    %1273 = arith.cmpi eq, %5, %1272 : vector<1x8xi32>
    %1274 = vector.broadcast %1205 : i1 to vector<1x8xi1>
    %1275 = arith.andi %1273, %1274 : vector<1x8xi1>
    %1276 = vector.shape_cast %1275 : vector<1x8xi1> to vector<1x8xi1>
    %1277 = vector.broadcast %1276 : vector<1x8xi1> to vector<4x8xi1>
    %1278 = vector.shape_cast %1228 : vector<4x1xf32> to vector<4x1xf32>
    %1279 = vector.broadcast %1278 : vector<4x1xf32> to vector<4x8xf32>
    %1280 = arith.select %1277, %1279, %1193 : vector<4x8xi1>, vector<4x8xf32>
    %1281 = vector.broadcast %1204 : f32 to vector<1x8xf32>
    %1282 = arith.select %1275, %1281, %1195 : vector<1x8xi1>, vector<1x8xf32>
    %1283 = arith.sitofp %1213 : i32 to f32
    %1284 = vector.broadcast %1283 : f32 to vector<1x8xf32>
    %1285 = arith.select %1275, %1284, %1198 : vector<1x8xi1>, vector<1x8xf32>
    %cst_239 = arith.constant 1.000000e+00 : f32
    %1286 = vector.broadcast %cst_239 : f32 to vector<1x8xf32>
    %1287 = arith.select %1275, %1286, %1200 : vector<1x8xi1>, vector<1x8xf32>
    %c6_i32_240 = arith.constant 6 : i32
    %1288 = vector.shape_cast %1271 : vector<4x1xf32> to vector<1x4x1xf32>
    %cst_241 = arith.constant dense<0xFF800000> : vector<1xf32>
    %1289 = vector.multi_reduction <maximumf>, %1288, %cst_241 [1, 2] : vector<1x4x1xf32> to vector<1xf32>
    %1290 = vector.shape_cast %1289 : vector<1xf32> to vector<1x1x1xf32>
    %1291 = vector.extract %1290[0, 0, 0] : f32 from vector<1x1x1xf32>
    %cst_242 = arith.constant -1.000000e+29 : f32
    %1292 = arith.cmpf ogt, %1291, %cst_242 : f32
    %1293 = vector.broadcast %1291 : f32 to vector<4x1xf32>
    %1294 = arith.cmpf oge, %1271, %1293 : vector<4x1xf32>
    %c4_i32_243 = arith.constant 4 : i32
    %1295 = vector.broadcast %c4_i32_243 : i32 to vector<4x1xi32>
    %1296 = arith.select %1294, %2, %1295 : vector<4x1xi1>, vector<4x1xi32>
    %1297 = vector.shape_cast %1296 : vector<4x1xi32> to vector<1x4x1xi32>
    %cst_244 = arith.constant dense<2147483647> : vector<1xi32>
    %1298 = vector.multi_reduction <minsi>, %1297, %cst_244 [1, 2] : vector<1x4x1xi32> to vector<1xi32>
    %1299 = vector.shape_cast %1298 : vector<1xi32> to vector<1x1x1xi32>
    %1300 = vector.extract %1299[0, 0, 0] : i32 from vector<1x1x1xi32>
    %1301 = arith.index_cast %1300 : i32 to index
    %c0_245 = arith.constant 0 : index
    %1302 = vector.load %arg5[%1301, %c0_245] : memref<4x16xf32, #tpu.memory_space<vmem>>, vector<1x16xf32>
    %1303 = vector.broadcast %1291 : f32 to vector<1x16xf32>
    %1304 = arith.cmpf oge, %1302, %1303 : vector<1x16xf32>
    %c16_i32_246 = arith.constant 16 : i32
    %1305 = vector.broadcast %c16_i32_246 : i32 to vector<1x16xi32>
    %1306 = arith.select %1304, %3, %1305 : vector<1x16xi1>, vector<1x16xi32>
    %1307 = vector.shape_cast %1306 : vector<1x16xi32> to vector<1x1x16xi32>
    %cst_247 = arith.constant dense<2147483647> : vector<1xi32>
    %1308 = vector.multi_reduction <minsi>, %1307, %cst_247 [1, 2] : vector<1x1x16xi32> to vector<1xi32>
    %1309 = vector.shape_cast %1308 : vector<1xi32> to vector<1x1x1xi32>
    %1310 = vector.extract %1309[0, 0, 0] : i32 from vector<1x1x1xi32>
    %1311 = vector.broadcast %1310 : i32 to vector<16x1xi32>
    %1312 = arith.cmpi eq, %4, %1311 : vector<16x1xi32>
    %1313 = arith.extui %1312 : vector<16x1xi1> to vector<16x1xi32>
    %1314 = arith.sitofp %1313 : vector<16x1xi32> to vector<16x1xf32>
    %cst_248 = arith.constant dense<0.000000e+00> : vector<4x1xf32>
    %1315 = tpu.matmul %745, %1314, %cst_248 {dimension_numbers = #tpu.dot_dimension_numbers<[1], [0], [0], [1], [0, 0, 1, 1], [], []>} : vector<4x16xf32>, vector<16x1xf32>, vector<4x1xf32> -> vector<4x1xf32>
    %1316 = vector.extract_strided_slice %1315 {offsets = [0, 0], sizes = [1, 1], strides = [1, 1]} : vector<4x1xf32> to vector<1x1xf32>
    %1317 = vector.extract_strided_slice %1315 {offsets = [1, 0], sizes = [1, 1], strides = [1, 1]} : vector<4x1xf32> to vector<1x1xf32>
    %1318 = vector.extract_strided_slice %1315 {offsets = [2, 0], sizes = [1, 1], strides = [1, 1]} : vector<4x1xf32> to vector<1x1xf32>
    %1319 = vector.extract_strided_slice %1315 {offsets = [3, 0], sizes = [1, 1], strides = [1, 1]} : vector<4x1xf32> to vector<1x1xf32>
    %1320 = vector.broadcast %1316 : vector<1x1xf32> to vector<1x16xf32>
    %1321 = arith.maximumf %748, %1320 : vector<1x16xf32>
    %1322 = vector.broadcast %1317 : vector<1x1xf32> to vector<1x16xf32>
    %1323 = arith.maximumf %749, %1322 : vector<1x16xf32>
    %1324 = vector.broadcast %1318 : vector<1x1xf32> to vector<1x16xf32>
    %1325 = arith.minimumf %750, %1324 : vector<1x16xf32>
    %1326 = vector.broadcast %1319 : vector<1x1xf32> to vector<1x16xf32>
    %1327 = arith.minimumf %751, %1326 : vector<1x16xf32>
    %1328 = arith.subf %1325, %1321 : vector<1x16xf32>
    %cst_249 = arith.constant 0.000000e+00 : f32
    %1329 = vector.broadcast %cst_249 : f32 to vector<1x16xf32>
    %1330 = arith.maximumf %1328, %1329 : vector<1x16xf32>
    %1331 = arith.subf %1327, %1323 : vector<1x16xf32>
    %cst_250 = arith.constant 0.000000e+00 : f32
    %1332 = vector.broadcast %cst_250 : f32 to vector<1x16xf32>
    %1333 = arith.maximumf %1331, %1332 : vector<1x16xf32>
    %1334 = arith.mulf %1330, %1333 : vector<1x16xf32>
    %1335 = arith.subf %1318, %1316 : vector<1x1xf32>
    %1336 = arith.subf %1319, %1317 : vector<1x1xf32>
    %1337 = arith.mulf %1335, %1336 : vector<1x1xf32>
    %1338 = vector.broadcast %1337 : vector<1x1xf32> to vector<1x16xf32>
    %1339 = arith.addf %754, %1338 : vector<1x16xf32>
    %1340 = arith.subf %1339, %1334 : vector<1x16xf32>
    %1341 = vector.broadcast %1 : f32 to vector<1x16xf32>
    %1342 = arith.mulf %1341, %1340 : vector<1x16xf32>
    %1343 = arith.cmpf ogt, %1334, %1342 : vector<1x16xf32>
    %1344 = vector.broadcast %1310 : i32 to vector<1x16xi32>
    %1345 = arith.cmpi eq, %3, %1344 : vector<1x16xi32>
    %1346 = arith.ori %1343, %1345 : vector<1x16xi1>
    %cst_251 = arith.constant -1.000000e+30 : f32
    %1347 = vector.broadcast %cst_251 : f32 to vector<1x16xf32>
    %1348 = arith.select %1346, %1347, %1302 : vector<1x16xi1>, vector<1x16xf32>
    %1349 = arith.index_cast %1300 : i32 to index
    %c0_252 = arith.constant 0 : index
    %1350 = vector.load %arg5[%1349, %c0_252] : memref<4x16xf32, #tpu.memory_space<vmem>>, vector<1x16xf32>
    tpu.vector_store %arg5[%1349, %c0_252], %1348 {strides = array<i32>} : memref<4x16xf32, #tpu.memory_space<vmem>>, vector<1x16xf32>,
    %1351 = vector.broadcast %1300 : i32 to vector<4x1xi32>
    %1352 = arith.cmpi eq, %2, %1351 : vector<4x1xi32>
    %1353 = vector.shape_cast %1348 : vector<1x16xf32> to vector<1x1x16xf32>
    %cst_253 = arith.constant dense<0xFF800000> : vector<1xf32>
    %1354 = vector.multi_reduction <maximumf>, %1353, %cst_253 [1, 2] : vector<1x1x16xf32> to vector<1xf32>
    %1355 = vector.shape_cast %1354 : vector<1xf32> to vector<1x1x1xf32>
    %1356 = vector.extract %1355[0, 0, 0] : f32 from vector<1x1x1xf32>
    %1357 = vector.broadcast %1356 : f32 to vector<4x1xf32>
    %1358 = arith.select %1352, %1357, %1271 : vector<4x1xi1>, vector<4x1xf32>
    %1359 = vector.broadcast %c6_i32_240 : i32 to vector<1x8xi32>
    %1360 = arith.cmpi eq, %5, %1359 : vector<1x8xi32>
    %1361 = vector.broadcast %1292 : i1 to vector<1x8xi1>
    %1362 = arith.andi %1360, %1361 : vector<1x8xi1>
    %1363 = vector.shape_cast %1362 : vector<1x8xi1> to vector<1x8xi1>
    %1364 = vector.broadcast %1363 : vector<1x8xi1> to vector<4x8xi1>
    %1365 = vector.shape_cast %1315 : vector<4x1xf32> to vector<4x1xf32>
    %1366 = vector.broadcast %1365 : vector<4x1xf32> to vector<4x8xf32>
    %1367 = arith.select %1364, %1366, %1280 : vector<4x8xi1>, vector<4x8xf32>
    %1368 = vector.broadcast %1291 : f32 to vector<1x8xf32>
    %1369 = arith.select %1362, %1368, %1282 : vector<1x8xi1>, vector<1x8xf32>
    %1370 = arith.sitofp %1300 : i32 to f32
    %1371 = vector.broadcast %1370 : f32 to vector<1x8xf32>
    %1372 = arith.select %1362, %1371, %1285 : vector<1x8xi1>, vector<1x8xf32>
    %cst_254 = arith.constant 1.000000e+00 : f32
    %1373 = vector.broadcast %cst_254 : f32 to vector<1x8xf32>
    %1374 = arith.select %1362, %1373, %1287 : vector<1x8xi1>, vector<1x8xf32>
    %c7_i32_255 = arith.constant 7 : i32
    %1375 = vector.shape_cast %1358 : vector<4x1xf32> to vector<1x4x1xf32>
    %cst_256 = arith.constant dense<0xFF800000> : vector<1xf32>
    %1376 = vector.multi_reduction <maximumf>, %1375, %cst_256 [1, 2] : vector<1x4x1xf32> to vector<1xf32>
    %1377 = vector.shape_cast %1376 : vector<1xf32> to vector<1x1x1xf32>
    %1378 = vector.extract %1377[0, 0, 0] : f32 from vector<1x1x1xf32>
    %cst_257 = arith.constant -1.000000e+29 : f32
    %1379 = arith.cmpf ogt, %1378, %cst_257 : f32
    %1380 = vector.broadcast %1378 : f32 to vector<4x1xf32>
    %1381 = arith.cmpf oge, %1358, %1380 : vector<4x1xf32>
    %c4_i32_258 = arith.constant 4 : i32
    %1382 = vector.broadcast %c4_i32_258 : i32 to vector<4x1xi32>
    %1383 = arith.select %1381, %2, %1382 : vector<4x1xi1>, vector<4x1xi32>
    %1384 = vector.shape_cast %1383 : vector<4x1xi32> to vector<1x4x1xi32>
    %cst_259 = arith.constant dense<2147483647> : vector<1xi32>
    %1385 = vector.multi_reduction <minsi>, %1384, %cst_259 [1, 2] : vector<1x4x1xi32> to vector<1xi32>
    %1386 = vector.shape_cast %1385 : vector<1xi32> to vector<1x1x1xi32>
    %1387 = vector.extract %1386[0, 0, 0] : i32 from vector<1x1x1xi32>
    %1388 = arith.index_cast %1387 : i32 to index
    %c0_260 = arith.constant 0 : index
    %1389 = vector.load %arg5[%1388, %c0_260] : memref<4x16xf32, #tpu.memory_space<vmem>>, vector<1x16xf32>
    %1390 = vector.broadcast %1378 : f32 to vector<1x16xf32>
    %1391 = arith.cmpf oge, %1389, %1390 : vector<1x16xf32>
    %c16_i32_261 = arith.constant 16 : i32
    %1392 = vector.broadcast %c16_i32_261 : i32 to vector<1x16xi32>
    %1393 = arith.select %1391, %3, %1392 : vector<1x16xi1>, vector<1x16xi32>
    %1394 = vector.shape_cast %1393 : vector<1x16xi32> to vector<1x1x16xi32>
    %cst_262 = arith.constant dense<2147483647> : vector<1xi32>
    %1395 = vector.multi_reduction <minsi>, %1394, %cst_262 [1, 2] : vector<1x1x16xi32> to vector<1xi32>
    %1396 = vector.shape_cast %1395 : vector<1xi32> to vector<1x1x1xi32>
    %1397 = vector.extract %1396[0, 0, 0] : i32 from vector<1x1x1xi32>
    %1398 = vector.broadcast %1397 : i32 to vector<16x1xi32>
    %1399 = arith.cmpi eq, %4, %1398 : vector<16x1xi32>
    %1400 = arith.extui %1399 : vector<16x1xi1> to vector<16x1xi32>
    %1401 = arith.sitofp %1400 : vector<16x1xi32> to vector<16x1xf32>
    %cst_263 = arith.constant dense<0.000000e+00> : vector<4x1xf32>
    %1402 = tpu.matmul %745, %1401, %cst_263 {dimension_numbers = #tpu.dot_dimension_numbers<[1], [0], [0], [1], [0, 0, 1, 1], [], []>} : vector<4x16xf32>, vector<16x1xf32>, vector<4x1xf32> -> vector<4x1xf32>
    %1403 = vector.extract_strided_slice %1402 {offsets = [0, 0], sizes = [1, 1], strides = [1, 1]} : vector<4x1xf32> to vector<1x1xf32>
    %1404 = vector.extract_strided_slice %1402 {offsets = [1, 0], sizes = [1, 1], strides = [1, 1]} : vector<4x1xf32> to vector<1x1xf32>
    %1405 = vector.extract_strided_slice %1402 {offsets = [2, 0], sizes = [1, 1], strides = [1, 1]} : vector<4x1xf32> to vector<1x1xf32>
    %1406 = vector.extract_strided_slice %1402 {offsets = [3, 0], sizes = [1, 1], strides = [1, 1]} : vector<4x1xf32> to vector<1x1xf32>
    %1407 = vector.broadcast %1403 : vector<1x1xf32> to vector<1x16xf32>
    %1408 = arith.maximumf %748, %1407 : vector<1x16xf32>
    %1409 = vector.broadcast %1404 : vector<1x1xf32> to vector<1x16xf32>
    %1410 = arith.maximumf %749, %1409 : vector<1x16xf32>
    %1411 = vector.broadcast %1405 : vector<1x1xf32> to vector<1x16xf32>
    %1412 = arith.minimumf %750, %1411 : vector<1x16xf32>
    %1413 = vector.broadcast %1406 : vector<1x1xf32> to vector<1x16xf32>
    %1414 = arith.minimumf %751, %1413 : vector<1x16xf32>
    %1415 = arith.subf %1412, %1408 : vector<1x16xf32>
    %cst_264 = arith.constant 0.000000e+00 : f32
    %1416 = vector.broadcast %cst_264 : f32 to vector<1x16xf32>
    %1417 = arith.maximumf %1415, %1416 : vector<1x16xf32>
    %1418 = arith.subf %1414, %1410 : vector<1x16xf32>
    %cst_265 = arith.constant 0.000000e+00 : f32
    %1419 = vector.broadcast %cst_265 : f32 to vector<1x16xf32>
    %1420 = arith.maximumf %1418, %1419 : vector<1x16xf32>
    %1421 = arith.mulf %1417, %1420 : vector<1x16xf32>
    %1422 = arith.subf %1405, %1403 : vector<1x1xf32>
    %1423 = arith.subf %1406, %1404 : vector<1x1xf32>
    %1424 = arith.mulf %1422, %1423 : vector<1x1xf32>
    %1425 = vector.broadcast %1424 : vector<1x1xf32> to vector<1x16xf32>
    %1426 = arith.addf %754, %1425 : vector<1x16xf32>
    %1427 = arith.subf %1426, %1421 : vector<1x16xf32>
    %1428 = vector.broadcast %1 : f32 to vector<1x16xf32>
    %1429 = arith.mulf %1428, %1427 : vector<1x16xf32>
    %1430 = arith.cmpf ogt, %1421, %1429 : vector<1x16xf32>
    %1431 = vector.broadcast %1397 : i32 to vector<1x16xi32>
    %1432 = arith.cmpi eq, %3, %1431 : vector<1x16xi32>
    %1433 = arith.ori %1430, %1432 : vector<1x16xi1>
    %cst_266 = arith.constant -1.000000e+30 : f32
    %1434 = vector.broadcast %cst_266 : f32 to vector<1x16xf32>
    %1435 = arith.select %1433, %1434, %1389 : vector<1x16xi1>, vector<1x16xf32>
    %1436 = arith.index_cast %1387 : i32 to index
    %c0_267 = arith.constant 0 : index
    %1437 = vector.load %arg5[%1436, %c0_267] : memref<4x16xf32, #tpu.memory_space<vmem>>, vector<1x16xf32>
    tpu.vector_store %arg5[%1436, %c0_267], %1435 {strides = array<i32>} : memref<4x16xf32, #tpu.memory_space<vmem>>, vector<1x16xf32>,
    %1438 = vector.broadcast %1387 : i32 to vector<4x1xi32>
    %1439 = arith.cmpi eq, %2, %1438 : vector<4x1xi32>
    %1440 = vector.shape_cast %1435 : vector<1x16xf32> to vector<1x1x16xf32>
    %cst_268 = arith.constant dense<0xFF800000> : vector<1xf32>
    %1441 = vector.multi_reduction <maximumf>, %1440, %cst_268 [1, 2] : vector<1x1x16xf32> to vector<1xf32>
    %1442 = vector.shape_cast %1441 : vector<1xf32> to vector<1x1x1xf32>
    %1443 = vector.extract %1442[0, 0, 0] : f32 from vector<1x1x1xf32>
    %1444 = vector.broadcast %1443 : f32 to vector<4x1xf32>
    %1445 = arith.select %1439, %1444, %1358 : vector<4x1xi1>, vector<4x1xf32>
    %1446 = vector.broadcast %c7_i32_255 : i32 to vector<1x8xi32>
    %1447 = arith.cmpi eq, %5, %1446 : vector<1x8xi32>
    %1448 = vector.broadcast %1379 : i1 to vector<1x8xi1>
    %1449 = arith.andi %1447, %1448 : vector<1x8xi1>
    %1450 = vector.shape_cast %1449 : vector<1x8xi1> to vector<1x8xi1>
    %1451 = vector.broadcast %1450 : vector<1x8xi1> to vector<4x8xi1>
    %1452 = vector.shape_cast %1402 : vector<4x1xf32> to vector<4x1xf32>
    %1453 = vector.broadcast %1452 : vector<4x1xf32> to vector<4x8xf32>
    %1454 = arith.select %1451, %1453, %1367 : vector<4x8xi1>, vector<4x8xf32>
    %1455 = vector.broadcast %1378 : f32 to vector<1x8xf32>
    %1456 = arith.select %1449, %1455, %1369 : vector<1x8xi1>, vector<1x8xf32>
    %1457 = arith.sitofp %1387 : i32 to f32
    %1458 = vector.broadcast %1457 : f32 to vector<1x8xf32>
    %1459 = arith.select %1449, %1458, %1372 : vector<1x8xi1>, vector<1x8xf32>
    %cst_269 = arith.constant 1.000000e+00 : f32
    %1460 = vector.broadcast %cst_269 : f32 to vector<1x8xf32>
    %1461 = arith.select %1449, %1460, %1374 : vector<1x8xi1>, vector<1x8xf32>
    %c8_i32_270 = arith.constant 8 : i32
    %c1_271 = arith.constant 1 : index
    %c0_272 = arith.constant 0 : index
    %c0_273 = arith.constant 0 : index
    %1462 = vector.load %arg4[%c1_271, %c0_272, %c0_273] : memref<2x8x8xf32, #tpu.memory_space<vmem>>, vector<1x4x8xf32>
    %1463 = vector.shape_cast %1462 : vector<1x4x8xf32> to vector<4x8xf32>
    %1464 = vector.shape_cast %1454 : vector<4x8xf32> to vector<1x4x8xf32>
    tpu.vector_store %arg4[%c1_271, %c0_272, %c0_273], %1464 {strides = array<i32>} : memref<2x8x8xf32, #tpu.memory_space<vmem>>, vector<1x4x8xf32>,
    %c1_274 = arith.constant 1 : index
    %c4_275 = arith.constant 4 : index
    %c0_276 = arith.constant 0 : index
    %1465 = vector.load %arg4[%c1_274, %c4_275, %c0_276] : memref<2x8x8xf32, #tpu.memory_space<vmem>>, vector<1x1x8xf32>
    %1466 = vector.shape_cast %1465 : vector<1x1x8xf32> to vector<1x8xf32>
    %1467 = vector.shape_cast %1456 : vector<1x8xf32> to vector<1x1x8xf32>
    tpu.vector_store %arg4[%c1_274, %c4_275, %c0_276], %1467 {strides = array<i32>} : memref<2x8x8xf32, #tpu.memory_space<vmem>>, vector<1x1x8xf32>,
    %c1_277 = arith.constant 1 : index
    %c5_278 = arith.constant 5 : index
    %c0_279 = arith.constant 0 : index
    %1468 = vector.load %arg4[%c1_277, %c5_278, %c0_279] : memref<2x8x8xf32, #tpu.memory_space<vmem>>, vector<1x1x8xf32>
    %1469 = vector.shape_cast %1468 : vector<1x1x8xf32> to vector<1x8xf32>
    %1470 = vector.shape_cast %1459 : vector<1x8xf32> to vector<1x1x8xf32>
    tpu.vector_store %arg4[%c1_277, %c5_278, %c0_279], %1470 {strides = array<i32>} : memref<2x8x8xf32, #tpu.memory_space<vmem>>, vector<1x1x8xf32>,
    %c1_280 = arith.constant 1 : index
    %c6_281 = arith.constant 6 : index
    %c0_282 = arith.constant 0 : index
    %1471 = vector.load %arg4[%c1_280, %c6_281, %c0_282] : memref<2x8x8xf32, #tpu.memory_space<vmem>>, vector<1x1x8xf32>
    %1472 = vector.shape_cast %1471 : vector<1x1x8xf32> to vector<1x8xf32>
    %1473 = vector.shape_cast %1461 : vector<1x8xf32> to vector<1x1x8xf32>
    tpu.vector_store %arg4[%c1_280, %c6_281, %c0_282], %1473 {strides = array<i32>} : memref<2x8x8xf32, #tpu.memory_space<vmem>>, vector<1x1x8xf32>,
    %1474 = vector.shape_cast %1461 : vector<1x8xf32> to vector<1x1x8xf32>
    %cst_283 = arith.constant dense<0.000000e+00> : vector<1xf32>
    %1475 = vector.multi_reduction <add>, %1474, %cst_283 [1, 2] : vector<1x1x8xf32> to vector<1xf32>
    %1476 = vector.shape_cast %1475 : vector<1xf32> to vector<1x1x1xf32>
    %1477 = vector.extract %1476[0, 0, 0] : f32 from vector<1x1x1xf32>
    %1478 = vector.broadcast %1477 : f32 to vector<1x8xf32>
    %c1_284 = arith.constant 1 : index
    %c7_285 = arith.constant 7 : index
    %c0_286 = arith.constant 0 : index
    %1479 = vector.load %arg4[%c1_284, %c7_285, %c0_286] : memref<2x8x8xf32, #tpu.memory_space<vmem>>, vector<1x1x8xf32>
    %1480 = vector.shape_cast %1479 : vector<1x1x8xf32> to vector<1x8xf32>
    %1481 = vector.shape_cast %1478 : vector<1x8xf32> to vector<1x1x8xf32>
    tpu.vector_store %arg4[%c1_284, %c7_285, %c0_286], %1481 {strides = array<i32>} : memref<2x8x8xf32, #tpu.memory_space<vmem>>, vector<1x1x8xf32>,
    return
  }
  func.func @transform_0(%arg0: i32) -> i32 {
    %c0_i32 = arith.constant 0 : i32
    %c0_i32_0 = arith.constant 0 : i32
    return %c0_i32 : i32
  }
  func.func @transform_1(%arg0: i32) -> i32 {
    %c0_i32 = arith.constant 0 : i32
    %c0_i32_0 = arith.constant 0 : i32
    return %c0_i32 : i32
  }
  func.func @transform_2(%arg0: i32) -> (i32, i32, i32) {
    %c0_i32 = arith.constant 0 : i32
    %c0_i32_0 = arith.constant 0 : i32
    %c0_i32_1 = arith.constant 0 : i32
    return %arg0, %c0_i32, %c0_i32_0 : i32, i32, i32
  }
  func.func @transform_3(%arg0: i32) -> (i32, i32, i32) {
    %c0_i32 = arith.constant 0 : i32
    %c0_i32_0 = arith.constant 0 : i32
    %c0_i32_1 = arith.constant 0 : i32
    return %arg0, %c0_i32, %c0_i32_0 : i32, i32, i32
  }
}

</mosaic_0001>

<bundles_post_ra>
// kernel: batched_nms_postprocess.1
= control target key start
LH: loop header
LB: loop body
LE: loop exit
PB: predicated region body
PF: predicated region fallthrough
CT: control target
= control target key end

     0   :  { %s5245_s0 = inlined_call_operand.<no memory space> [shape: f32[1], index: 0, kind: input, shape index: {}]   ;;  %s5246_s1 = inlined_call_operand.<no memory space> [shape: f32[1], index: 1, kind: input, shape index: {}]   ;;  %s5247_s2 = inlined_call_operand.hbm [shape: f32[4,8,16], index: 2, kind: input, shape index: {}]   ;;  %s5248_s3 = inlined_call_operand.vmem [shape: f32[4,8,8], index: 3, kind: output, shape index: {}]  }
   0x1   :  { %8 = sst [smem:[#allocation3]] %s5245_s0 }
   0x2   :  { %9 = sst [smem:[#allocation4]] %s5246_s1 }
   0x3   :  { %10 = vsyncpa [#allocation6], 0 }
   0x4   :  { %12 = vsyncpa [#allocation6 + $0x1], 0  ;;  %s3983_s16 = smov 0   ;;  %s3985_s17 = smov 0  }
   0x5   :  { %s3987_s18 = smov 0   ;;  %s3989_s19 = smov 0  }
   0x6 LB: > { %s3448_s0 = sadd.s32 4294967295, %s3948_s19   ;;  %s4003_s1 = sadd.s32 1, %s3948_s19   ;;  %s3948_s19 = sphi %s3989_s19, %s5327_s19   ;;  %s3944_s18 = sphi %s3987_s18, %s5326_s18   ;;  %s3940_s17 = sphi %s3985_s17, %s5325_s17   ;;  %s3936_s16 = sphi %s3983_s16, %s5324_s16  }
   0x7   : > { %s64_s20 = ssub.s32 %s3948_s19, %s4003_s1  ;;  %s67_s21 = sadd.s32 1, %s3944_s18 }
   0x8   : > { %p65_p0 = scmp.eq.s32.totalorder %s64_s20, 0  ;;  %p74_p1 = scmp.ne.s32.totalorder %s3944_s18, %s3940_s17 }
   0x9   : > { %p75_p2 = scmp.eq.s32.totalorder %s3948_s19, 0  ;;  %p80_p3 = scmp.ne.s32.totalorder %s3940_s17, %s3936_s16 }
   0xa   : > { %s4013_s22 = scalar_select %p65_p0, %s3944_s18, %s67_s21  }
   0xb   : > { %p76_p4 = por %p75_p2, %p74_p1  ;;  %p81_p5 = scmp.eq.s32.totalorder %s3448_s0, 0 }
   0xc   : > { %p3843_p6 = scmp.lt.s32.totalorder %s3948_s19, 2  ;;  %s136_s24 = sand.u32 1, %s3944_s18  }
   0xd   : > { %p4018_p7 = por %p81_p5, %p80_p3  ;;  %s3452_s25 = sshll.u32 %s136_s24, 4 }
   0xe   : > { %s3548_s26 = sshll.u32 %s3948_s19, 8  ;;  %s140_s30 = scalar_lea.vmem [#allocation5], %s3452_s25 }
   0xf   : > { %s5261_s23 = scalar_select %p4018_p7, 1, 0 }
  0x10   : > { %s4027_s29 = scalar_lea.hbm %s5247_s2, %s3548_s26  ;;  %s147_s4 = sshll.u32 %s140_s30, 4  ;;  %s4029_s4 = int_to_ptr.vmem [resolvable:$true] %s147_s4 }
  0x11   : > { %p4031_p8 = pnand %p3843_p6, %p76_p4  ;;  %s4036_s6 = scalar_lea.sflag [#allocation6], %s136_s24 }
  0x12   : > { %s3886_s7 = scalar_lea.hbm %s4027_s29, 256  ;;  %s3891_s10 = scalar_lea.hbm %s5247_s2, 512 }
  0x13   : > { %p3887_p10 = scmp.ne.s32.totalorder %s4027_s29, %s3886_s7  ;;  %p3888_p11 = pneg %p4031_p8 }
  0x14   : > { %p3892_p0 = scmp.lt.s32.totalorder %s4027_s29, %s5247_s2  ;;  %p3893_p1 = scmp.lt.s32.totalorder %s3891_s10, %s3886_s7 }
  0x15   : > { %p3889_p12 = pnand %p3888_p11, %p3887_p10 }
  0x16   : > { %p3894_p2 = por %p3893_p1, %p3892_p0 }
  0x17   : > { %p3890_p13 = pneg %p3889_p12 }
  0x19   : > { %p3895_p3 = pnand %p3894_p2, %p3890_p13 }
  0x1b   : > { %3898 = shalt.err (!%p3895_p3)
}
  0x1c   : > { %s3899_s13 = scalar_lea.vmem %s4029_s4, 256  ;;  %s3950_s14 = smov [#allocation5]  }
  0x1d   : > { %p3900_p4 = scmp.ne.s32.totalorder %s4029_s4, %s3899_s13  ;;  %s3904_s15 = sshll.u32 %s3950_s14, 4  ;;  %s3905_s15 = int_to_ptr.vmem [resolvable:$false] %s3904_s15 }
  0x1e   : > { %s3906_s16 = scalar_lea.vmem %s3905_s15, 512  ;;  %p3907_p10 = scmp.lt.s32.totalorder %s4029_s4, %s3905_s15 }
  0x1f   : > { %p3902_p5 = pnand %p3900_p4, %p3888_p11  ;;  %p3908_p12 = scmp.lt.s32.totalorder %s3906_s16, %s3899_s13 }
  0x21   : > { %p3903_p6 = pneg %p3902_p5  ;;  %p3909_p9 = por %p3908_p12, %p3907_p10 }
  0x23   : > { %p3910_p7 = pnand %p3909_p9, %p3903_p6 }
  0x25   : > { %3913 = shalt.err (!%p3910_p7)
}
  0x26   : > { %s3951_s20 = smov 128   ;;  %s3952_s21 = smov 8  }
  0x27   : > { %3842 = dma.hbm_to_vmem [thread:$0]  (!%p4031_p8), %s4027_s29, 256, %s4029_s4, %s4036_s6, %s3951_s20, %s3951_s20, %s3952_s21  }
  0x28   : > { %p155_p11 = scmp.lt.s32.totalorder %s3948_s19, 3  ;;  %p5263_p13 = scmp.ge.s32.totalorder %s3948_s19, 1 }
  0x2a   : > { %p156_p0 = pnand %p5263_p13, %p155_p11 }
  0x2b   : > { %s161_s24 = sand.u32 (!%p156_p0), 1, %s3940_s17   ;;  %p5264_p7 = scmp.ne.s32.totalorder (!%p156_p0), %s5261_s23, 0 }
  0x2c   : > { %159 = sbr.rel (%p156_p0) target bundleno = 16087 (0x3ed7), region = 32  ;;  %s3456_s25 = sshll.u32 (!%p156_p0), %s161_s24, 4 }
  0x2d   : > { %s162_s26 = scalar_lea.sflag (!%p156_p0), [#allocation6], %s161_s24  ;;  %s4061_s27 = scalar_lea.vmem (!%p156_p0), [#allocation5], %s3456_s25 }
  0x31   : > { %3931 = dma.done.wait (%p5264_p7), %s162_s26, 256  }
  0x32   : > { %3933 = vsyncadd (%p5264_p7), %s162_s26, 4294967040  ;;  %s4067_s28 = sld [smem:[#allocation3]]  ;;  %v203_v0 = vld [vmem:[%s4061_s27 + $0x4] sm:$0xf]  ;;  %vm5256_vm0 = vcmask 125952   ;;  %v3953_v4 = vmov 0.0   ;;  %v197_v13 = vlaneseq }
  0x33   : > { %3597 = vmatprep.subr.mxu0 %v3953_v4  ;;  %3604 = vmatprep.subr.mxu1 %v3953_v4  ;;  %vm220_vm2 = vcmask 1043456   ;;  %vm248_vm7 = vcmask 122880   ;;  %vm3954_vm10 = vmmov 0   ;;  %v3955_v34 = vmov 0   ;;  %v4115_v49 = vld [vmem:[%s4061_s27] sm:$0xf] }
  0x34   : > { %v4081_v14 = vshrl.u32 %v197_v13, 7  ;;  %v4094_v24 = vand.u32 127, %v197_v13  ;;  %3601 = vmatprep.mubr.msk.f32.mxu0 %vm3954_vm10, %v3953_v4  ;;  %3608 = vmatprep.mubr.msk.f32.mxu1 %vm3954_vm10, %v3953_v4  ;;  %v3956_v48 = vmov 1.0   ;;  %vm281_vm15 = vcmask 130048   ;;  %s196_s5 = sld [smem:[#allocation4]] }
  0x35   : > { %3882 = vset.pattern.permute.xlu1 %v3955_v34  ;;  %3883 = vset.pattern.permute.xlu0 %v3955_v34  ;;  %v205_v56 = vrot.slane %v4115_v49, 6 }
  0x36   : > { %v4110_v46 = vadd.s32 8, %v4081_v14 }
  0x37   : > { %v207_v57 = vsub.f32 %v4115_v49, %v205_v56 }
  0x38   : > { %v212_v1 = vstv %s4067_s28 }
  0x39   : > { %vm213_vm1 = vcmp.gt.f32.partialorder %v203_v0, %v212_v1  ;;  %v209_v62 = vrot.slane %v207_v57, 1 }
  0x3a   : > { %v214_v2 = vsel %vm213_vm1, %v203_v0, -1e+30 }
  0x3b   : > { %v217_v3 = vsel %vm5256_vm0, %v214_v2, -inf  ;;  %216 = vst.msk [vmem:[#allocation2] sm:$0xf] %vm5256_vm0, %v214_v2  ;;  %v4133_v2 = vmul.f32 %v209_v62, %v207_v57 }
  0x3c   : > { %218 = vmax.xlane.f32.xlu0 %v217_v3 }
  0xc5   : > { %v4077_v5 = vpop.xlane.xlu0 %218 }
  0xc6   : > { %v221_v6 = vsel %vm220_vm2, %v4077_v5, -inf }
  0xc7   : > { %v222_v7 = vrot.slane %v221_v6, 4 }
  0xc9   : > { %v223_v8 = vmax.f32 %v221_v6, %v222_v7 }
  0xcb   : > { %v224_v9 = vrot.slane %v223_v8, 2 }
  0xcd   : > { %v225_v10 = vmax.f32 %v223_v8, %v224_v9  ;;  %v4136_v9 = vstv %s196_s5 }
  0xcf   : > { %v226_v11 = vrot.slane %v225_v10, 1 }
  0xd1   : > { %v227_v12 = vmax.f32 %v225_v10, %v226_v11 }
  0xd3   : > { %3709 = vpush %v227_v12 }
 0x104   : > { %s4083_s23 = spop %3709 }
 0x105   : > { %v4086_v15 = vstv %s4083_s23  ;;  %p229_p8 = scmp.gt.f32.partialorder %s4083_s23, -1e+29 }
 0x106   : > { %vm231_vm3 = vcmp.ge.f32.partialorder %v4077_v5, %v4086_v15 }
 0x107   : > { %v232_v16 = vsel %vm231_vm3, %v4081_v14, 4  ;;  %s410_s16 = scalar_select %p229_p8, 1, 0 }
 0x108   : > { %v233_v17 = vsel %vm220_vm2, %v232_v16, 2147483647 }
 0x109   : > { %v234_v18 = vrot.slane %v233_v17, 4 }
 0x10b   : > { %vm235_vm4 = vcmp.lt.s32.totalorder %v233_v17, %v234_v18 }
 0x10c   : > { %v236_v19 = vsel %vm235_vm4, %v233_v17, %v234_v18 }
 0x10d   : > { %v237_v20 = vrot.slane %v236_v19, 2 }
 0x10f   : > { %vm238_vm5 = vcmp.lt.s32.totalorder %v236_v19, %v237_v20 }
 0x110   : > { %v239_v21 = vsel %vm238_vm5, %v236_v19, %v237_v20  ;;  %vm5258_vm5 = vcmask 124930  }
 0x111   : > { %v240_v22 = vrot.slane %v239_v21, 1 }
 0x113   : > { %vm241_vm6 = vcmp.lt.s32.totalorder %v239_v21, %v240_v22 }
 0x114   : > { %v242_v23 = vsel %vm241_vm6, %v239_v21, %v240_v22 }
 0x115   : > { %3711 = vpush %v242_v23 }
 0x146   : > { %s4092_s29 = spop %3711 }
 0x147   : > { %s244_s30 = scalar_lea.vmem [#allocation2], %s4092_s29 }
 0x148   : > { %v4099_v25 = vld [vmem:[%s244_s30] sm:$0x1] }
 0x149   : > { %vm246_vm8 = vcmp.ge.f32.partialorder %v4099_v25, %v4086_v15  ;;  %v390_v12 = vrot.slane %v4099_v25, 6 }
 0x14a   : > { %v247_v26 = vsel %vm246_vm8, %v4094_v24, 16 }
 0x14b   : > { %v249_v27 = vsel %vm248_vm7, %v247_v26, 2147483647  ;;  %v395_v26 = vstv %s4092_s29 }
 0x14c   : > { %v251_v28 = vshra.s32 %v249_v27, 16  ;;  %v250_v30 = vand.u32 65535, %v249_v27  ;;  %vm396_vm8 = vcmp.eq.s32.totalorder %v4081_v14, %v395_v26 }
 0x14e   : > { %v253_v29 = vcvt.s32.f32 %v251_v28  ;;  %v252_v32 = vcvt.s32.f32 %v250_v30 }
 0x150   : > { %254 = vmin.xlane.f32.xlu0 %v253_v29 }
 0x1d9   : > { %v255_v31 = vpop.xlane.xlu0 %254 }
 0x1da   : > { %vm256_vm9 = vcmp.eq.f32.partialorder %v253_v29, %v255_v31  ;;  %v261_v35 = vcvt.f32.s32 %v255_v31 }
 0x1db   : > { %v257_v33 = vsel %vm256_vm9, %v252_v32, inf }
 0x1dc   : > { %258 = vmin.xlane.f32.xlu1 %v257_v33  ;;  %v262_v37 = vshll.u32 %v261_v35, 16 }
 0x265   : > { %v259_v36 = vpop.xlane.xlu1 %258 }
 0x266   : > { %v260_v38 = vcvt.f32.s32 %v259_v36 }
 0x268   : > { %v263_v39 = vadd.s32 %v262_v37, %v260_v38 }
 0x26a   : > { %v264_v40 = vrot.slane %v263_v39, 4 }
 0x26c   : > { %vm265_vm11 = vcmp.lt.s32.totalorder %v263_v39, %v264_v40 }
 0x26d   : > { %v266_v41 = vsel %vm265_vm11, %v263_v39, %v264_v40 }
 0x26e   : > { %v267_v42 = vrot.slane %v266_v41, 2 }
 0x270   : > { %vm268_vm12 = vcmp.lt.s32.totalorder %v266_v41, %v267_v42 }
 0x271   : > { %v269_v43 = vsel %vm268_vm12, %v266_v41, %v267_v42 }
 0x272   : > { %v270_v44 = vrot.slane %v269_v43, 1 }
 0x274   : > { %vm271_vm13 = vcmp.lt.s32.totalorder %v269_v43, %v270_v44 }
 0x275   : > { %v272_v45 = vsel %vm271_vm13, %v269_v43, %v270_v44 }
 0x276   : > { %3713 = vpush %v272_v45 }
 0x2a7   : > { %s3714_s4 = spop %3713 }
 0x2a8   : > { %v274_v47 = vstv %s3714_s4 }
 0x2a9   : > { %vm276_vm14 = vcmp.eq.s32.totalorder %v4110_v46, %v274_v47  ;;  %vm275_vm1 = vcmp.eq.s32.totalorder %v4081_v14, %v274_v47  ;;  %vm387_vm3 = vcmp.eq.s32.totalorder %v4094_v24, %v274_v47 }
 0x2aa   : > { %3598 = vmatpush3.msk.msra.mxu0 %vm276_vm14, %v3956_v48 }
 0x2ab   : > { %3599 = vmatprep.subr.mxu0 %v3953_v4 }
 0x2ac   : > { %3600 = vmatpush3.msk.msra.mxu0 %vm275_vm1, %v3956_v48 }
 0x2ad   : > { %3602 = vmatmul.mubr.msk.f32.vlgmr.msra.gmra.mxu0 %vm281_vm15, %v4115_v49  ;;  %3611 = vmatprep.subr.mxu0 %v3953_v4 }
 0x2ae   : > { %3615 = vmatprep.mubr.msk.f32.mxu0 %vm3954_vm10, %v3953_v4 }
 0x36d   : > { %v350_v50 = vpop.f32.mrf.mxu0 }
 0x36e   : > { %v370_v51 = vrot.slane %v350_v50, 6  ;;  %356 = vperm.xlu1 %3882, %v350_v50  }
 0x36f   : > { %v3603_v52 = vpop.f32.mrf.mxu0 }
 0x370   : > { %v372_v53 = vsub.f32 %v350_v50, %v370_v51 }
 0x372   : > { %v374_v54 = vrot.slane %v372_v53, 1 }
 0x374   : > { %v376_v55 = vmul.f32 %v374_v54, %v372_v53 }
 0x376   : > { %379 = vperm.xlu0 %3883, %v376_v55  }
 0x3e9   : > { %v4127_v58 = vpop.permute.xlu1 %356 }
 0x3ea   : > { %v359_v59 = vmax.f32 %v4115_v49, %v4127_v58  ;;  %v360_v60 = vmin.f32 %v4115_v49, %v4127_v58 }
 0x3ec   : > { %v362_v61 = vrot.slane %v359_v59, 6 }
 0x3ee   : > { %v364_v63 = vsub.f32 %v360_v60, %v362_v61 }
 0x3f0   : > { %v365_v0 = vmax.f32 %v364_v63, 0.0 }
 0x3f1   : > { %v380_v3 = vpop.permute.xlu0 %379 }
 0x3f2   : > { %v367_v6 = vrot.slane %v365_v0, 1  ;;  %v382_v8 = vadd.f32 %v380_v3, %v4133_v2 }
 0x3f4   : > { %v369_v7 = vmul.f32 %v367_v6, %v365_v0 }
 0x3f6   : > { %v383_v10 = vsub.f32 %v382_v8, %v369_v7 }
 0x3f8   : > { %v385_v11 = vmul.f32 %v4136_v9, %v383_v10 }
 0x3fa   : > { %vm386_vm4 = vcmp.gt.f32.partialorder %v369_v7, %v385_v11 }
 0x3fb   : > { %vm388_vm6 = vmor %vm386_vm4, %vm387_vm3 }
 0x3fc   : > { %v392_v13 = vsel %vm388_vm6, -1e+30, %v390_v12 }
 0x3fd   : > { %v397_v16 = vsel %vm5258_vm5, %v392_v13, -inf  ;;  %394 = vst.msk [vmem:[%s244_s30 - $0x2] sm:$0x4] %vm5258_vm5, %v392_v13 }
 0x3fe   : > { %398 = vmax.xlane.f32.xlu1 %v397_v16 }
 0x487   : > { %v399_v17 = vpop.xlane.xlu1 %398 }
 0x488   : > { %v400_v18 = vrot.slane %v399_v17, 4 }
 0x48a   : > { %v401_v19 = vmax.f32 %v399_v17, %v400_v18 }
 0x48c   : > { %v402_v20 = vrot.slane %v401_v19, 2 }
 0x48e   : > { %v403_v21 = vmax.f32 %v401_v19, %v402_v20 }
 0x490   : > { %v404_v22 = vrot.slane %v403_v21, 1 }
 0x492   : > { %v405_v23 = vmax.f32 %v403_v21, %v404_v22 }
 0x494   : > { %3715 = vpush %v405_v23 }
 0x4c5   : > { %s3716_s6 = spop %3715 }
 0x4c6   : > { %v407_v25 = vstv %s3716_s6 }
 0x4c7   : > { %v4148_v27 = vsel %vm396_vm8, %v407_v25, %v4077_v5 }
 0x4c8   : > { %v422_v28 = vsel %vm220_vm2, %v4148_v27, -inf }
 0x4c9   : > { %v423_v29 = vrot.slane %v422_v28, 4 }
 0x4cb   : > { %v424_v30 = vmax.f32 %v422_v28, %v423_v29 }
 0x4cd   : > { %v425_v31 = vrot.slane %v424_v30, 2 }
 0x4cf   : > { %v426_v32 = vmax.f32 %v424_v30, %v425_v31 }
 0x4d1   : > { %v427_v33 = vrot.slane %v426_v32, 1 }
 0x4d3   : > { %v428_v34 = vmax.f32 %v426_v32, %v427_v33 }
 0x4d5   : > { %3717 = vpush %v428_v34 }
 0x506   : > { %s4152_s7 = spop %3717 }
 0x507   : > { %v4155_v35 = vstv %s4152_s7  ;;  %p430_p9 = scmp.gt.f32.partialorder %s4152_s7, -1e+29 }
 0x508   : > { %vm432_vm9 = vcmp.ge.f32.partialorder %v4148_v27, %v4155_v35 }
 0x509   : > { %v433_v5 = vsel %vm432_vm9, %v4081_v14, 4  ;;  %s605_s20 = scalar_select %p430_p9, 1, 0 }
 0x50a   : > { %v434_v36 = vsel %vm220_vm2, %v433_v5, 2147483647 }
 0x50b   : > { %v435_v37 = vrot.slane %v434_v36, 4 }
 0x50d   : > { %vm436_vm11 = vcmp.lt.s32.totalorder %v434_v36, %v435_v37 }
 0x50e   : > { %v437_v38 = vsel %vm436_vm11, %v434_v36, %v435_v37 }
 0x50f   : > { %v438_v39 = vrot.slane %v437_v38, 2 }
 0x511   : > { %vm439_vm12 = vcmp.lt.s32.totalorder %v437_v38, %v438_v39 }
 0x512   : > { %v440_v40 = vsel %vm439_vm12, %v437_v38, %v438_v39 }
 0x513   : > { %v441_v41 = vrot.slane %v440_v40, 1 }
 0x515   : > { %vm442_vm13 = vcmp.lt.s32.totalorder %v440_v40, %v441_v41 }
 0x516   : > { %v443_v42 = vsel %vm442_vm13, %v440_v40, %v441_v41 }
 0x517   : > { %3719 = vpush %v443_v42 }
 0x548   : > { %s4161_s8 = spop %3719 }
 0x549   : > { %s445_s9 = scalar_lea.vmem [#allocation2], %s4161_s8  ;;  %v590_v41 = vstv %s4161_s8 }
 0x54a   : > { %v4166_v43 = vld [vmem:[%s445_s9] sm:$0x1] }
 0x54b   : > { %vm447_vm14 = vcmp.ge.f32.partialorder %v4166_v43, %v4155_v35  ;;  %v586_v31 = vrot.slane %v4166_v43, 6 }
 0x54c   : > { %v448_v44 = vsel %vm447_vm14, %v4094_v24, 16  ;;  %vm591_vm14 = vcmp.eq.s32.totalorder %v4081_v14, %v590_v41 }
 0x54d   : > { %v449_v45 = vsel %vm248_vm7, %v448_v44, 2147483647 }
 0x54e   : > { %v451_v47 = vshra.s32 %v449_v45, 16  ;;  %v450_v51 = vand.u32 65535, %v449_v45 }
 0x550   : > { %v453_v50 = vcvt.s32.f32 %v451_v47  ;;  %v452_v53 = vcvt.s32.f32 %v450_v51 }
 0x552   : > { %454 = vmin.xlane.f32.xlu0 %v453_v50 }
 0x5db   : > { %v455_v52 = vpop.xlane.xlu0 %454 }
 0x5dc   : > { %vm456_vm1 = vcmp.eq.f32.partialorder %v453_v50, %v455_v52  ;;  %v461_v55 = vcvt.f32.s32 %v455_v52 }
 0x5dd   : > { %v457_v54 = vsel %vm456_vm1, %v452_v53, inf }
 0x5de   : > { %458 = vmin.xlane.f32.xlu1 %v457_v54  ;;  %v462_v57 = vshll.u32 %v461_v55, 16 }
 0x667   : > { %v459_v56 = vpop.xlane.xlu1 %458 }
 0x668   : > { %v460_v59 = vcvt.f32.s32 %v459_v56 }
 0x66a   : > { %v463_v60 = vadd.s32 %v462_v57, %v460_v59 }
 0x66c   : > { %v464_v61 = vrot.slane %v463_v60, 4 }
 0x66e   : > { %vm465_vm3 = vcmp.lt.s32.totalorder %v463_v60, %v464_v61 }
 0x66f   : > { %v466_v62 = vsel %vm465_vm3, %v463_v60, %v464_v61 }
 0x670   : > { %v467_v63 = vrot.slane %v466_v62, 2 }
 0x672   : > { %vm468_vm4 = vcmp.lt.s32.totalorder %v466_v62, %v467_v63 }
 0x673   : > { %v469_v0 = vsel %vm468_vm4, %v466_v62, %v467_v63 }
 0x674   : > { %v470_v3 = vrot.slane %v469_v0, 1 }
 0x676   : > { %vm471_vm6 = vcmp.lt.s32.totalorder %v469_v0, %v470_v3 }
 0x677   : > { %v472_v6 = vsel %vm471_vm6, %v469_v0, %v470_v3 }
 0x678   : > { %3721 = vpush %v472_v6 }
 0x6a9   : > { %s3722_s10 = spop %3721 }
 0x6aa   : > { %v474_v7 = vstv %s3722_s10 }
 0x6ab   : > { %vm476_vm8 = vcmp.eq.s32.totalorder %v4110_v46, %v474_v7  ;;  %vm475_vm9 = vcmp.eq.s32.totalorder %v4081_v14, %v474_v7  ;;  %vm583_vm11 = vcmp.eq.s32.totalorder %v4094_v24, %v474_v7 }
 0x6ac   : > { %3605 = vmatpush3.msk.msra.mxu1 %vm476_vm8, %v3956_v48 }
 0x6ad   : > { %3606 = vmatprep.subr.mxu1 %v3953_v4 }
 0x6ae   : > { %3607 = vmatpush3.msk.msra.mxu1 %vm475_vm9, %v3956_v48 }
 0x6af   : > { %3609 = vmatmul.mubr.msk.f32.vlgmr.msra.gmra.mxu1 %vm281_vm15, %v4115_v49  ;;  %3618 = vmatprep.subr.mxu1 %v3953_v4 }
 0x6b0   : > { %3622 = vmatprep.mubr.msk.f32.mxu1 %vm3954_vm10, %v3953_v4 }
 0x76f   : > { %v547_v8 = vpop.f32.mrf.mxu1 }
 0x770   : > { %v567_v10 = vrot.slane %v547_v8, 6  ;;  %553 = vperm.xlu1 %3882, %v547_v8  }
 0x771   : > { %v3610_v11 = vpop.f32.mrf.mxu1 }
 0x772   : > { %v569_v12 = vsub.f32 %v547_v8, %v567_v10 }
 0x774   : > { %v571_v13 = vrot.slane %v569_v12, 1 }
 0x776   : > { %v573_v16 = vmul.f32 %v571_v13, %v569_v12 }
 0x778   : > { %576 = vperm.xlu1 %3882, %v573_v16  }
 0x7eb   : > { %v4182_v17 = vpop.permute.xlu1 %553 }
 0x7ec   : > { %v556_v18 = vmax.f32 %v4115_v49, %v4182_v17  ;;  %v557_v19 = vmin.f32 %v4115_v49, %v4182_v17 }
 0x7ee   : > { %v559_v20 = vrot.slane %v556_v18, 6 }
 0x7f0   : > { %v561_v21 = vsub.f32 %v557_v19, %v559_v20 }
 0x7f2   : > { %v562_v22 = vmax.f32 %v561_v21, 0.0 }
 0x7f3   : > { %v577_v23 = vpop.permute.xlu1 %576 }
 0x7f4   : > { %v564_v26 = vrot.slane %v562_v22, 1  ;;  %v579_v28 = vadd.f32 %v577_v23, %v4133_v2 }
 0x7f6   : > { %v566_v25 = vmul.f32 %v564_v26, %v562_v22 }
 0x7f8   : > { %v580_v29 = vsub.f32 %v579_v28, %v566_v25 }
 0x7fa   : > { %v581_v30 = vmul.f32 %v580_v29, %v4136_v9 }
 0x7fc   : > { %vm582_vm12 = vcmp.gt.f32.partialorder %v566_v25, %v581_v30 }
 0x7fd   : > { %vm584_vm13 = vmor %vm582_vm12, %vm583_vm11 }
 0x7fe   : > { %v588_v32 = vsel %vm584_vm13, -1e+30, %v586_v31 }
 0x7ff   : > { %v592_v33 = vsel %vm5258_vm5, %v588_v32, -inf  ;;  %589 = vst.msk [vmem:[%s445_s9 - $0x2] sm:$0x4] %vm5258_vm5, %v588_v32 }
 0x800   : > { %593 = vmax.xlane.f32.xlu1 %v592_v33 }
 0x889   : > { %v594_v34 = vpop.xlane.xlu1 %593 }
 0x88a   : > { %v595_v5 = vrot.slane %v594_v34, 4 }
 0x88c   : > { %v596_v36 = vmax.f32 %v594_v34, %v595_v5 }
 0x88e   : > { %v597_v37 = vrot.slane %v596_v36, 2 }
 0x890   : > { %v598_v38 = vmax.f32 %v596_v36, %v597_v37  ;;  %v411_v36 = vstv %s410_s16  ;;  %v606_v37 = vstv %s605_s20 }
 0x892   : > { %v599_v39 = vrot.slane %v598_v38, 1 }
 0x894   : > { %v600_v40 = vmax.f32 %v598_v38, %v599_v39 }
 0x896   : > { %3723 = vpush %v600_v40 }
 0x8c7   : > { %s3724_s11 = spop %3723 }
 0x8c8   : > { %v602_v42 = vstv %s3724_s11 }
 0x8c9   : > { %v4199_v43 = vsel %vm591_vm14, %v602_v42, %v4148_v27 }
 0x8ca   : > { %v617_v44 = vsel %vm220_vm2, %v4199_v43, -inf }
 0x8cb   : > { %v618_v45 = vrot.slane %v617_v44, 4 }
 0x8cd   : > { %v619_v47 = vmax.f32 %v617_v44, %v618_v45 }
 0x8cf   : > { %v620_v50 = vrot.slane %v619_v47, 2 }
 0x8d1   : > { %v621_v51 = vmax.f32 %v619_v47, %v620_v50 }
 0x8d3   : > { %v622_v52 = vrot.slane %v621_v51, 1 }
 0x8d5   : > { %v623_v53 = vmax.f32 %v621_v51, %v622_v52 }
 0x8d7   : > { %3725 = vpush %v623_v53 }
 0x908   : > { %s4203_s12 = spop %3725 }
 0x909   : > { %v4206_v54 = vstv %s4203_s12  ;;  %p625_p1 = scmp.gt.f32.partialorder %s4203_s12, -1e+29 }
 0x90a   : > { %vm627_vm1 = vcmp.ge.f32.partialorder %v4199_v43, %v4206_v54 }
 0x90b   : > { %v628_v27 = vsel %vm627_vm1, %v4081_v14, 4  ;;  %s800_s21 = scalar_select %p625_p1, 1, 0 }
 0x90c   : > { %v629_v55 = vsel %vm220_vm2, %v628_v27, 2147483647 }
 0x90d   : > { %v630_v56 = vrot.slane %v629_v55, 4  ;;  %v801_v38 = vstv %s800_s21 }
 0x90f   : > { %vm631_vm3 = vcmp.lt.s32.totalorder %v629_v55, %v630_v56 }
 0x910   : > { %v632_v57 = vsel %vm631_vm3, %v629_v55, %v630_v56  ;;  %vm5254_vm3 = vcmp.eq.s32.totalorder %v4094_v24, 0 }
 0x911   : > { %v633_v59 = vrot.slane %v632_v57, 2 }
 0x913   : > { %vm634_vm4 = vcmp.lt.s32.totalorder %v632_v57, %v633_v59 }
 0x914   : > { %v635_v60 = vsel %vm634_vm4, %v632_v57, %v633_v59  ;;  %vm412_vm4 = vcmp.eq.s32.totalorder %v411_v36, 1 }
 0x915   : > { %v636_v61 = vrot.slane %v635_v60, 1 }
 0x917   : > { %vm637_vm6 = vcmp.lt.s32.totalorder %v635_v60, %v636_v61 }
 0x918   : > { %v638_v62 = vsel %vm637_vm6, %v635_v60, %v636_v61  ;;  %vm5252_vm6 = vcmp.eq.s32.totalorder %v4094_v24, 1 }
 0x919   : > { %3727 = vpush %v638_v62 }
 0x94a   : > { %s4212_s13 = spop %3727 }
 0x94b   : > { %s640_s14 = scalar_lea.vmem [#allocation2], %s4212_s13 }
 0x94c   : > { %v4217_v63 = vld [vmem:[%s640_s14] sm:$0x1] }
 0x94d   : > { %vm642_vm8 = vcmp.ge.f32.partialorder %v4217_v63, %v4206_v54  ;;  %v781_v60 = vrot.slane %v4217_v63, 6 }
 0x94e   : > { %v643_v0 = vsel %vm642_vm8, %v4094_v24, 16  ;;  %vm607_vm8 = vcmp.eq.s32.totalorder %v606_v37, 1 }
 0x94f   : > { %v644_v3 = vsel %vm248_vm7, %v643_v0, 2147483647 }
 0x950   : > { %v646_v6 = vshra.s32 %v644_v3, 16  ;;  %v645_v8 = vand.u32 65535, %v644_v3 }
 0x952   : > { %v648_v7 = vcvt.s32.f32 %v646_v6  ;;  %v647_v11 = vcvt.s32.f32 %v645_v8 }
 0x954   : > { %649 = vmin.xlane.f32.xlu0 %v648_v7 }
 0x9dd   : > { %v650_v10 = vpop.xlane.xlu0 %649 }
 0x9de   : > { %vm651_vm9 = vcmp.eq.f32.partialorder %v648_v7, %v650_v10  ;;  %v656_v13 = vcvt.f32.s32 %v650_v10 }
 0x9df   : > { %v652_v12 = vsel %vm651_vm9, %v647_v11, inf  ;;  %vm5250_vm9 = vcmp.eq.s32.totalorder %v4094_v24, 2 }
 0x9e0   : > { %653 = vmin.xlane.f32.xlu0 %v652_v12  ;;  %v657_v18 = vshll.u32 %v656_v13, 16  ;;  %v785_v12 = vstv %s4212_s13 }
 0xa69   : > { %v654_v16 = vpop.xlane.xlu0 %653 }
 0xa6a   : > { %v655_v19 = vcvt.f32.s32 %v654_v16 }
 0xa6c   : > { %v658_v20 = vadd.s32 %v657_v18, %v655_v19 }
 0xa6e   : > { %v659_v21 = vrot.slane %v658_v20, 4 }
 0xa70   : > { %vm660_vm11 = vcmp.lt.s32.totalorder %v658_v20, %v659_v21 }
 0xa71   : > { %v661_v22 = vsel %vm660_vm11, %v658_v20, %v659_v21  ;;  %vm802_vm11 = vcmp.eq.s32.totalorder %v801_v38, 1 }
 0xa72   : > { %v662_v23 = vrot.slane %v661_v22, 2 }
 0xa74   : > { %vm663_vm12 = vcmp.lt.s32.totalorder %v661_v22, %v662_v23 }
 0xa75   : > { %v664_v26 = vsel %vm663_vm12, %v661_v22, %v662_v23  ;;  %vm4241_vm12 = vmand %vm5254_vm3, %vm412_vm4 }
 0xa76   : > { %v665_v25 = vrot.slane %v664_v26, 1  ;;  %v416_v40 = vsel %vm4241_vm12, %v4127_v58, 0.0 }
 0xa78   : > { %vm666_vm13 = vcmp.lt.s32.totalorder %v664_v26, %v665_v25 }
 0xa79   : > { %v667_v28 = vsel %vm666_vm13, %v664_v26, %v665_v25  ;;  %vm4250_vm13 = vmand %vm5252_vm6, %vm607_vm8 }
 0xa7a   : > { %3729 = vpush %v667_v28  ;;  %v4257_v42 = vsel %vm4250_vm13, %v4182_v17, %v416_v40 }
 0xaab   : > { %s3730_s15 = spop %3729 }
 0xaac   : > { %v669_v29 = vstv %s3730_s15 }
 0xaad   : > { %vm671_vm14 = vcmp.eq.s32.totalorder %v4110_v46, %v669_v29  ;;  %vm670_vm1 = vcmp.eq.s32.totalorder %v4081_v14, %v669_v29 }
 0xaae   : > { %3612 = vmatpush3.msk.msra.mxu0 %vm671_vm14, %v3956_v48  ;;  %vm4261_vm14 = vmand %vm5250_vm9, %vm802_vm11  ;;  %vm786_vm11 = vcmp.eq.s32.totalorder %v4081_v14, %v785_v12 }
 0xaaf   : > { %3613 = vmatprep.subr.mxu0 %v3953_v4 }
 0xab0   : > { %3614 = vmatpush3.msk.msra.mxu0 %vm670_vm1, %v3956_v48  ;;  %vm778_vm1 = vcmp.eq.s32.totalorder %v4094_v24, %v669_v29 }
 0xab1   : > { %3616 = vmatmul.mubr.msk.f32.vlgmr.msra.gmra.mxu0 %vm281_vm15, %v4115_v49  ;;  %3625 = vmatprep.subr.mxu0 %v3953_v4 }
 0xab2   : > { %3629 = vmatprep.mubr.msk.f32.mxu0 %vm3954_vm10, %v3953_v4 }
 0xb71   : > { %v742_v30 = vpop.f32.mrf.mxu0 }
 0xb72   : > { %v762_v31 = vrot.slane %v742_v30, 6  ;;  %748 = vperm.xlu0 %3883, %v742_v30  }
 0xb73   : > { %v3617_v32 = vpop.f32.mrf.mxu0 }
 0xb74   : > { %v764_v33 = vsub.f32 %v742_v30, %v762_v31 }
 0xb76   : > { %v766_v34 = vrot.slane %v764_v33, 1 }
 0xb78   : > { %v768_v5 = vmul.f32 %v766_v34, %v764_v33 }
 0xb7a   : > { %771 = vperm.xlu0 %3883, %v768_v5  }
 0xbed   : > { %v4265_v45 = vpop.permute.xlu0 %748 }
 0xbee   : > { %v751_v58 = vmax.f32 %v4115_v49, %v4265_v45  ;;  %v806_v47 = vsel %vm4261_vm14, %v4265_v45, %v4257_v42  ;;  %v752_v17 = vmin.f32 %v4115_v49, %v4265_v45 }
 0xbf0   : > { %v754_v50 = vrot.slane %v751_v58, 6 }
 0xbf2   : > { %v756_v51 = vsub.f32 %v752_v17, %v754_v50 }
 0xbf4   : > { %v757_v52 = vmax.f32 %v756_v51, 0.0 }
 0xbf5   : > { %v772_v53 = vpop.permute.xlu0 %771 }
 0xbf6   : > { %v759_v27 = vrot.slane %v757_v52, 1  ;;  %v774_v56 = vadd.f32 %v772_v53, %v4133_v2 }
 0xbf8   : > { %v761_v55 = vmul.f32 %v759_v27, %v757_v52 }
 0xbfa   : > { %v775_v57 = vsub.f32 %v774_v56, %v761_v55 }
 0xbfc   : > { %v776_v59 = vmul.f32 %v775_v57, %v4136_v9 }
 0xbfe   : > { %vm777_vm4 = vcmp.gt.f32.partialorder %v761_v55, %v776_v59 }
 0xbff   : > { %vm779_vm8 = vmor %vm777_vm4, %vm778_vm1 }
 0xc00   : > { %v783_v61 = vsel %vm779_vm8, -1e+30, %v781_v60 }
 0xc01   : > { %v787_v62 = vsel %vm5258_vm5, %v783_v61, -inf  ;;  %784 = vst.msk [vmem:[%s640_s14 - $0x2] sm:$0x4] %vm5258_vm5, %v783_v61 }
 0xc02   : > { %788 = vmax.xlane.f32.xlu0 %v787_v62 }
 0xc8b   : > { %v789_v0 = vpop.xlane.xlu0 %788 }
 0xc8c   : > { %v790_v3 = vrot.slane %v789_v0, 4 }
 0xc8e   : > { %v791_v6 = vmax.f32 %v789_v0, %v790_v3 }
 0xc90   : > { %v792_v7 = vrot.slane %v791_v6, 2 }
 0xc92   : > { %v793_v8 = vmax.f32 %v791_v6, %v792_v7 }
 0xc94   : > { %v794_v10 = vrot.slane %v793_v8, 1 }
 0xc96   : > { %v795_v11 = vmax.f32 %v793_v8, %v794_v10 }
 0xc98   : > { %3731 = vpush %v795_v11 }
 0xcc9   : > { %s3732_s24 = spop %3731 }
 0xcca   : > { %v797_v63 = vstv %s3732_s24 }
 0xccb   : > { %v4286_v13 = vsel %vm786_vm11, %v797_v63, %v4199_v43 }
 0xccc   : > { %v812_v16 = vsel %vm220_vm2, %v4286_v13, -inf }
 0xccd   : > { %v813_v18 = vrot.slane %v812_v16, 4 }
 0xccf   : > { %v814_v19 = vmax.f32 %v812_v16, %v813_v18 }
 0xcd1   : > { %v815_v20 = vrot.slane %v814_v19, 2 }
 0xcd3   : > { %v816_v21 = vmax.f32 %v814_v19, %v815_v20 }
 0xcd5   : > { %v817_v22 = vrot.slane %v816_v21, 1 }
 0xcd7   : > { %v818_v23 = vmax.f32 %v816_v21, %v817_v22 }
 0xcd9   : > { %3733 = vpush %v818_v23 }
 0xd0a   : > { %s4290_s25 = spop %3733 }
 0xd0b   : > { %v4293_v26 = vstv %s4290_s25  ;;  %p820_p2 = scmp.gt.f32.partialorder %s4290_s25, -1e+29 }
 0xd0c   : > { %vm822_vm1 = vcmp.ge.f32.partialorder %v4286_v13, %v4293_v26 }
 0xd0d   : > { %v823_v43 = vsel %vm822_vm1, %v4081_v14, 4  ;;  %s995_s4 = scalar_select %p820_p2, 1, 0 }
 0xd0e   : > { %v824_v25 = vsel %vm220_vm2, %v823_v43, 2147483647 }
 0xd0f   : > { %v825_v28 = vrot.slane %v824_v25, 4  ;;  %v996_v12 = vstv %s995_s4 }
 0xd11   : > { %vm826_vm4 = vcmp.lt.s32.totalorder %v824_v25, %v825_v28 }
 0xd12   : > { %v827_v29 = vsel %vm826_vm4, %v824_v25, %v825_v28 }
 0xd13   : > { %v828_v30 = vrot.slane %v827_v29, 2 }
 0xd15   : > { %vm829_vm8 = vcmp.lt.s32.totalorder %v827_v29, %v828_v30 }
 0xd16   : > { %v830_v31 = vsel %vm829_vm8, %v827_v29, %v828_v30 }
 0xd17   : > { %v831_v32 = vrot.slane %v830_v31, 1 }
 0xd19   : > { %vm832_vm11 = vcmp.lt.s32.totalorder %v830_v31, %v831_v32 }
 0xd1a   : > { %v833_v33 = vsel %vm832_vm11, %v830_v31, %v831_v32 }
 0xd1b   : > { %3735 = vpush %v833_v33 }
 0xd4c   : > { %s4299_s26 = spop %3735 }
 0xd4d   : > { %s835_s23 = scalar_lea.vmem [#allocation2], %s4299_s26 }
 0xd4e   : > { %v4304_v34 = vld [vmem:[%s835_s23] sm:$0x1] }
 0xd4f   : > { %vm837_vm1 = vcmp.ge.f32.partialorder %v4304_v34, %v4293_v26  ;;  %v976_v42 = vrot.slane %v4304_v34, 6 }
 0xd50   : > { %v838_v5 = vsel %vm837_vm1, %v4094_v24, 16 }
 0xd51   : > { %v839_v36 = vsel %vm248_vm7, %v838_v5, 2147483647 }
 0xd52   : > { %v841_v37 = vshra.s32 %v839_v36, 16  ;;  %v840_v40 = vand.u32 65535, %v839_v36 }
 0xd54   : > { %v843_v38 = vcvt.s32.f32 %v841_v37  ;;  %v842_v17 = vcvt.s32.f32 %v840_v40 }
 0xd56   : > { %844 = vmin.xlane.f32.xlu1 %v843_v38 }
 0xddf   : > { %v845_v58 = vpop.xlane.xlu1 %844 }
 0xde0   : > { %vm846_vm4 = vcmp.eq.f32.partialorder %v843_v38, %v845_v58  ;;  %v851_v51 = vcvt.f32.s32 %v845_v58  ;;  %v980_v58 = vstv %s4299_s26 }
 0xde1   : > { %v847_v50 = vsel %vm846_vm4, %v842_v17, inf }
 0xde2   : > { %848 = vmin.xlane.f32.xlu1 %v847_v50  ;;  %v852_v53 = vshll.u32 %v851_v51, 16 }
 0xe6b   : > { %v849_v52 = vpop.xlane.xlu1 %848 }
 0xe6c   : > { %v850_v27 = vcvt.f32.s32 %v849_v52 }
 0xe6e   : > { %v853_v55 = vadd.s32 %v852_v53, %v850_v27 }
 0xe70   : > { %v854_v56 = vrot.slane %v853_v55, 4 }
 0xe72   : > { %vm855_vm8 = vcmp.lt.s32.totalorder %v853_v55, %v854_v56 }
 0xe73   : > { %v856_v57 = vsel %vm855_vm8, %v853_v55, %v854_v56  ;;  %vm997_vm8 = vcmp.eq.s32.totalorder %v996_v12, 1 }
 0xe74   : > { %v857_v59 = vrot.slane %v856_v57, 2 }
 0xe76   : > { %vm858_vm11 = vcmp.lt.s32.totalorder %v856_v57, %v857_v59 }
 0xe77   : > { %v859_v60 = vsel %vm858_vm11, %v856_v57, %v857_v59 }
 0xe78   : > { %v860_v61 = vrot.slane %v859_v60, 1 }
 0xe7a   : > { %vm861_vm1 = vcmp.lt.s32.totalorder %v859_v60, %v860_v61 }
 0xe7b   : > { %v862_v62 = vsel %vm861_vm1, %v859_v60, %v860_v61 }
 0xe7c   : > { %3737 = vpush %v862_v62 }
 0xead   : > { %s3738_s30 = spop %3737 }
 0xeae   : > { %v864_v0 = vstv %s3738_s30 }
 0xeaf   : > { %vm866_vm4 = vcmp.eq.s32.totalorder %v4110_v46, %v864_v0  ;;  %vm865_vm9 = vcmp.eq.s32.totalorder %v4081_v14, %v864_v0  ;;  %vm973_vm1 = vcmp.eq.s32.totalorder %v4094_v24, %v864_v0 }
 0xeb0   : > { %3619 = vmatpush3.msk.msra.mxu1 %vm866_vm4, %v3956_v48 }
 0xeb1   : > { %3620 = vmatprep.subr.mxu1 %v3953_v4 }
 0xeb2   : > { %3621 = vmatpush3.msk.msra.mxu1 %vm865_vm9, %v3956_v48  ;;  %vm5251_vm9 = vcmp.eq.s32.totalorder %v4094_v24, 3 }
 0xeb3   : > { %3623 = vmatmul.mubr.msk.f32.vlgmr.msra.gmra.mxu1 %vm281_vm15, %v4115_v49  ;;  %3632 = vmatprep.subr.mxu1 %v3953_v4  ;;  %vm4324_vm11 = vmand %vm5251_vm9, %vm997_vm8  ;;  %vm981_vm9 = vcmp.eq.s32.totalorder %v4081_v14, %v980_v58 }
 0xeb4   : > { %3636 = vmatprep.mubr.msk.f32.mxu1 %vm3954_vm10, %v3953_v4 }
 0xf73   : > { %v937_v3 = vpop.f32.mrf.mxu1 }
 0xf74   : > { %v957_v6 = vrot.slane %v937_v3, 6  ;;  %943 = vperm.xlu1 %3882, %v937_v3  }
 0xf75   : > { %v3624_v7 = vpop.f32.mrf.mxu1 }
 0xf76   : > { %v959_v8 = vsub.f32 %v937_v3, %v957_v6 }
 0xf78   : > { %v961_v10 = vrot.slane %v959_v8, 1 }
 0xf7a   : > { %v963_v11 = vmul.f32 %v961_v10, %v959_v8 }
 0xf7c   : > { %966 = vperm.xlu1 %3882, %v963_v11  }
 0xfef   : > { %v944_v16 = vpop.permute.xlu1 %943 }
 0xff0   : > { %v946_v18 = vmax.f32 %v4115_v49, %v944_v16  ;;  %v4336_v19 = vsel %vm4324_vm11, %v944_v16, %v806_v47  ;;  %v947_v20 = vmin.f32 %v4115_v49, %v944_v16 }
 0xff2   : > { %v949_v21 = vrot.slane %v946_v18, 6 }
 0xff4   : > { %v951_v22 = vsub.f32 %v947_v20, %v949_v21 }
 0xff6   : > { %v952_v23 = vmax.f32 %v951_v22, 0.0 }
 0xff7   : > { %v967_v43 = vpop.permute.xlu1 %966 }
 0xff8   : > { %v954_v25 = vrot.slane %v952_v23, 1  ;;  %v969_v29 = vadd.f32 %v967_v43, %v4133_v2 }
 0xffa   : > { %v956_v28 = vmul.f32 %v954_v25, %v952_v23 }
 0xffc   : > { %v970_v30 = vsub.f32 %v969_v29, %v956_v28 }
 0xffe   : > { %v971_v31 = vmul.f32 %v970_v30, %v4136_v9 }
0x1000   : > { %vm972_vm4 = vcmp.gt.f32.partialorder %v956_v28, %v971_v31 }
0x1001   : > { %vm974_vm8 = vmor %vm972_vm4, %vm973_vm1 }
0x1002   : > { %v978_v45 = vsel %vm974_vm8, -1e+30, %v976_v42 }
0x1003   : > { %v982_v47 = vsel %vm5258_vm5, %v978_v45, -inf  ;;  %979 = vst.msk [vmem:[%s835_s23 - $0x2] sm:$0x4] %vm5258_vm5, %v978_v45 }
0x1004   : > { %983 = vmax.xlane.f32.xlu1 %v982_v47 }
0x108d   : > { %v984_v32 = vpop.xlane.xlu1 %983 }
0x108e   : > { %v985_v33 = vrot.slane %v984_v32, 4 }
0x1090   : > { %v986_v5 = vmax.f32 %v984_v32, %v985_v33 }
0x1092   : > { %v987_v36 = vrot.slane %v986_v5, 2 }
0x1094   : > { %v988_v37 = vmax.f32 %v986_v5, %v987_v36 }
0x1096   : > { %v989_v38 = vrot.slane %v988_v37, 1 }
0x1098   : > { %v990_v40 = vmax.f32 %v988_v37, %v989_v38 }
0x109a   : > { %3739 = vpush %v990_v40 }
0x10cb   : > { %s3740_s5 = spop %3739 }
0x10cc   : > { %v992_v34 = vstv %s3740_s5 }
0x10cd   : > { %v4350_v17 = vsel %vm981_vm9, %v992_v34, %v4286_v13 }
0x10ce   : > { %v1007_v50 = vsel %vm220_vm2, %v4350_v17, -inf }
0x10cf   : > { %v1008_v51 = vrot.slane %v1007_v50, 4 }
0x10d1   : > { %v1009_v52 = vmax.f32 %v1007_v50, %v1008_v51 }
0x10d3   : > { %v1010_v53 = vrot.slane %v1009_v52, 2 }
0x10d5   : > { %v1011_v27 = vmax.f32 %v1009_v52, %v1010_v53 }
0x10d7   : > { %v1012_v55 = vrot.slane %v1011_v27, 1 }
0x10d9   : > { %v1013_v56 = vmax.f32 %v1011_v27, %v1012_v55 }
0x10db   : > { %3741 = vpush %v1013_v56 }
0x110c   : > { %s4354_s6 = spop %3741 }
0x110d   : > { %v4357_v57 = vstv %s4354_s6  ;;  %p1015_p3 = scmp.gt.f32.partialorder %s4354_s6, -1e+29 }
0x110e   : > { %vm1017_vm1 = vcmp.ge.f32.partialorder %v4350_v17, %v4357_v57 }
0x110f   : > { %v1018_v13 = vsel %vm1017_vm1, %v4081_v14, 4  ;;  %s1190_s11 = scalar_select %p1015_p3, 1, 0 }
0x1110   : > { %v1019_v59 = vsel %vm220_vm2, %v1018_v13, 2147483647 }
0x1111   : > { %v1020_v60 = vrot.slane %v1019_v59, 4  ;;  %v1191_v58 = vstv %s1190_s11 }
0x1113   : > { %vm1021_vm9 = vcmp.lt.s32.totalorder %v1019_v59, %v1020_v60 }
0x1114   : > { %v1022_v61 = vsel %vm1021_vm9, %v1019_v59, %v1020_v60 }
0x1115   : > { %v1023_v62 = vrot.slane %v1022_v61, 2 }
0x1117   : > { %vm1024_vm4 = vcmp.lt.s32.totalorder %v1022_v61, %v1023_v62 }
0x1118   : > { %v1025_v0 = vsel %vm1024_vm4, %v1022_v61, %v1023_v62 }
0x1119   : > { %v1026_v3 = vrot.slane %v1025_v0, 1 }
0x111b   : > { %vm1027_vm8 = vcmp.lt.s32.totalorder %v1025_v0, %v1026_v3 }
0x111c   : > { %v1028_v6 = vsel %vm1027_vm8, %v1025_v0, %v1026_v3 }
0x111d   : > { %3743 = vpush %v1028_v6 }
0x114e   : > { %s4363_s7 = spop %3743 }
0x114f   : > { %s1030_s9 = scalar_lea.vmem [#allocation2], %s4363_s7 }
0x1150   : > { %v4368_v7 = vld [vmem:[%s1030_s9] sm:$0x1] }
0x1151   : > { %vm1032_vm1 = vcmp.ge.f32.partialorder %v4368_v7, %v4357_v57  ;;  %v1171_v3 = vrot.slane %v4368_v7, 6 }
0x1152   : > { %v1033_v8 = vsel %vm1032_vm1, %v4094_v24, 16 }
0x1153   : > { %v1034_v10 = vsel %vm248_vm7, %v1033_v8, 2147483647 }
0x1154   : > { %v1036_v11 = vshra.s32 %v1034_v10, 16  ;;  %v1035_v16 = vand.u32 65535, %v1034_v10 }
0x1156   : > { %v1038_v12 = vcvt.s32.f32 %v1036_v11  ;;  %v1037_v20 = vcvt.s32.f32 %v1035_v16 }
0x1158   : > { %1039 = vmin.xlane.f32.xlu0 %v1038_v12 }
0x11e1   : > { %v1040_v18 = vpop.xlane.xlu0 %1039 }
0x11e2   : > { %vm1041_vm9 = vcmp.eq.f32.partialorder %v1038_v12, %v1040_v18  ;;  %v1046_v22 = vcvt.f32.s32 %v1040_v18 }
0x11e3   : > { %v1042_v21 = vsel %vm1041_vm9, %v1037_v20, inf }
0x11e4   : > { %1043 = vmin.xlane.f32.xlu0 %v1042_v21  ;;  %v1047_v43 = vshll.u32 %v1046_v22, 16  ;;  %v1175_v21 = vstv %s4363_s7 }
0x126d   : > { %v1044_v23 = vpop.xlane.xlu0 %1043 }
0x126e   : > { %v1045_v25 = vcvt.f32.s32 %v1044_v23 }
0x1270   : > { %v1048_v28 = vadd.s32 %v1047_v43, %v1045_v25 }
0x1272   : > { %v1049_v29 = vrot.slane %v1048_v28, 4 }
0x1274   : > { %vm1050_vm4 = vcmp.lt.s32.totalorder %v1048_v28, %v1049_v29 }
0x1275   : > { %v1051_v30 = vsel %vm1050_vm4, %v1048_v28, %v1049_v29  ;;  %vm1192_vm4 = vcmp.eq.s32.totalorder %v1191_v58, 1 }
0x1276   : > { %v1052_v31 = vrot.slane %v1051_v30, 2 }
0x1278   : > { %vm1053_vm8 = vcmp.lt.s32.totalorder %v1051_v30, %v1052_v31 }
0x1279   : > { %v1054_v42 = vsel %vm1053_vm8, %v1051_v30, %v1052_v31 }
0x127a   : > { %v1055_v45 = vrot.slane %v1054_v42, 1 }
0x127c   : > { %vm1056_vm1 = vcmp.lt.s32.totalorder %v1054_v42, %v1055_v45 }
0x127d   : > { %v1057_v47 = vsel %vm1056_vm1, %v1054_v42, %v1055_v45 }
0x127e   : > { %3745 = vpush %v1057_v47 }
0x12af   : > { %s3746_s10 = spop %3745 }
0x12b0   : > { %v1059_v32 = vstv %s3746_s10 }
0x12b1   : > { %vm1061_vm9 = vcmp.eq.s32.totalorder %v4110_v46, %v1059_v32  ;;  %vm1060_vm6 = vcmp.eq.s32.totalorder %v4081_v14, %v1059_v32  ;;  %vm1168_vm1 = vcmp.eq.s32.totalorder %v4094_v24, %v1059_v32 }
0x12b2   : > { %3626 = vmatpush3.msk.msra.mxu0 %vm1061_vm9, %v3956_v48 }
0x12b3   : > { %3627 = vmatprep.subr.mxu0 %v3953_v4 }
0x12b4   : > { %3628 = vmatpush3.msk.msra.mxu0 %vm1060_vm6, %v3956_v48  ;;  %vm5253_vm6 = vcmp.eq.s32.totalorder %v4094_v24, 4 }
0x12b5   : > { %3630 = vmatmul.mubr.msk.f32.vlgmr.msra.gmra.mxu0 %vm281_vm15, %v4115_v49  ;;  %3639 = vmatprep.subr.mxu0 %v3953_v4  ;;  %vm4388_vm8 = vmand %vm5253_vm6, %vm1192_vm4  ;;  %vm1176_vm6 = vcmp.eq.s32.totalorder %v4081_v14, %v1175_v21 }
0x12b6   : > { %3643 = vmatprep.mubr.msk.f32.mxu0 %vm3954_vm10, %v3953_v4 }
0x1375   : > { %v1132_v33 = vpop.f32.mrf.mxu0 }
0x1376   : > { %v1152_v5 = vrot.slane %v1132_v33, 6  ;;  %1138 = vperm.xlu0 %3883, %v1132_v33  }
0x1377   : > { %v3631_v36 = vpop.f32.mrf.mxu0 }
0x1378   : > { %v1154_v37 = vsub.f32 %v1132_v33, %v1152_v5 }
0x137a   : > { %v1156_v38 = vrot.slane %v1154_v37, 1 }
0x137c   : > { %v1158_v40 = vmul.f32 %v1156_v38, %v1154_v37 }
0x137e   : > { %1161 = vperm.xlu0 %3883, %v1158_v40  }
0x13f1   : > { %v4392_v50 = vpop.permute.xlu0 %1138 }
0x13f2   : > { %v1141_v51 = vmax.f32 %v4115_v49, %v4392_v50  ;;  %v1196_v52 = vsel %vm4388_vm8, %v4392_v50, %v4336_v19  ;;  %v1142_v53 = vmin.f32 %v4115_v49, %v4392_v50 }
0x13f4   : > { %v1144_v27 = vrot.slane %v1141_v51, 6 }
0x13f6   : > { %v1146_v55 = vsub.f32 %v1142_v53, %v1144_v27 }
0x13f8   : > { %v1147_v56 = vmax.f32 %v1146_v55, 0.0 }
0x13f9   : > { %v1162_v13 = vpop.permute.xlu0 %1161 }
0x13fa   : > { %v1149_v59 = vrot.slane %v1147_v56, 1  ;;  %v1164_v61 = vadd.f32 %v1162_v13, %v4133_v2 }
0x13fc   : > { %v1151_v60 = vmul.f32 %v1149_v59, %v1147_v56 }
0x13fe   : > { %v1165_v62 = vsub.f32 %v1164_v61, %v1151_v60 }
0x1400   : > { %v1166_v0 = vmul.f32 %v1165_v62, %v4136_v9 }
0x1402   : > { %vm1167_vm9 = vcmp.gt.f32.partialorder %v1151_v60, %v1166_v0 }
0x1403   : > { %vm1169_vm4 = vmor %vm1167_vm9, %vm1168_vm1 }
0x1404   : > { %v1173_v49 = vsel %vm1169_vm4, -1e+30, %v1171_v3 }
0x1405   : > { %v1177_v6 = vsel %vm5258_vm5, %v1173_v49, -inf  ;;  %1174 = vst.msk [vmem:[%s1030_s9 - $0x2] sm:$0x4] %vm5258_vm5, %v1173_v49  ;;  %s3457_s9 = sshll.u32 %s3448_s0, 1 }
0x1406   : > { %1178 = vmax.xlane.f32.xlu0 %v1177_v6  ;;  %p190_p6 = scmp.lt.s32.totalorder %s3457_s9, 3 }
0x1408   : > { %s5329_s9 = smov (!%p190_p6, %s3457_s9), 3 }
0x1409   : > { %s3458_s19 = sshll.u32 %s5329_s9, 3 }
0x148f   : > { %v1179_v8 = vpop.xlane.xlu0 %1178 }
0x1490   : > { %v1180_v10 = vrot.slane %v1179_v8, 4 }
0x1492   : > { %v1181_v11 = vmax.f32 %v1179_v8, %v1180_v10 }
0x1494   : > { %v1182_v12 = vrot.slane %v1181_v11, 2 }
0x1496   : > { %v1183_v16 = vmax.f32 %v1181_v11, %v1182_v12 }
0x1498   : > { %v1184_v18 = vrot.slane %v1183_v16, 1 }
0x149a   : > { %v1185_v20 = vmax.f32 %v1183_v16, %v1184_v18  ;;  %v4443_v16 = vld [vmem:[%s4061_s27] sm:$0xf] }
0x149c   : > { %3747 = vpush %v1185_v20 }
0x14cd   : > { %s3748_s12 = spop %3747 }
0x14ce   : > { %v1187_v7 = vstv %s3748_s12 }
0x14cf   : > { %v4413_v22 = vsel %vm1176_vm6, %v1187_v7, %v4350_v17 }
0x14d0   : > { %v1202_v23 = vsel %vm220_vm2, %v4413_v22, -inf }
0x14d1   : > { %v1203_v43 = vrot.slane %v1202_v23, 4 }
0x14d3   : > { %v1204_v25 = vmax.f32 %v1202_v23, %v1203_v43 }
0x14d5   : > { %v1205_v28 = vrot.slane %v1204_v25, 2 }
0x14d7   : > { %v1206_v29 = vmax.f32 %v1204_v25, %v1205_v28 }
0x14d9   : > { %v1207_v30 = vrot.slane %v1206_v29, 1 }
0x14db   : > { %v1208_v31 = vmax.f32 %v1206_v29, %v1207_v30 }
0x14dd   : > { %3749 = vpush %v1208_v31 }
0x150e   : > { %s4417_s14 = spop %3749 }
0x150f   : > { %v4420_v42 = vstv %s4417_s14  ;;  %p1210_p4 = scmp.gt.f32.partialorder %s4417_s14, -1e+29  ;;  %s4584_s14 = scalar_lea.vmem %s5248_s3, %s3458_s19 }
0x1510   : > { %vm1212_vm1 = vcmp.ge.f32.partialorder %v4413_v22, %v4420_v42 }
0x1511   : > { %v1213_v17 = vsel %vm1212_vm1, %v4081_v14, 4  ;;  %s1385_s21 = scalar_select %p1210_p4, 1, 0 }
0x1512   : > { %v1214_v45 = vsel %vm220_vm2, %v1213_v17, 2147483647 }
0x1513   : > { %v1215_v47 = vrot.slane %v1214_v45, 4  ;;  %v1386_v25 = vstv %s1385_s21  ;;  %s808_s21 = scvt.s32.f32 %s4212_s13 }
0x1515   : > { %vm1216_vm6 = vcmp.lt.s32.totalorder %v1214_v45, %v1215_v47 }
0x1516   : > { %v1217_v32 = vsel %vm1216_vm6, %v1214_v45, %v1215_v47 }
0x1517   : > { %v1218_v33 = vrot.slane %v1217_v32, 2 }
0x1519   : > { %vm1219_vm9 = vcmp.lt.s32.totalorder %v1217_v32, %v1218_v33 }
0x151a   : > { %v1220_v5 = vsel %vm1219_vm9, %v1217_v32, %v1218_v33 }
0x151b   : > { %v1221_v36 = vrot.slane %v1220_v5, 1 }
0x151d   : > { %vm1222_vm4 = vcmp.lt.s32.totalorder %v1220_v5, %v1221_v36 }
0x151e   : > { %v1223_v37 = vsel %vm1222_vm4, %v1220_v5, %v1221_v36 }
0x151f   : > { %3751 = vpush %v1223_v37 }
0x1550   : > { %s4426_s15 = spop %3751 }
0x1551   : > { %s1225_s16 = scalar_lea.vmem [#allocation2], %s4426_s15 }
0x1552   : > { %v4431_v38 = vld [vmem:[%s1225_s16] sm:$0x1] }
0x1553   : > { %vm1227_vm1 = vcmp.ge.f32.partialorder %v4431_v38, %v4420_v42  ;;  %v1366_v19 = vrot.slane %v4431_v38, 6 }
0x1554   : > { %v1228_v40 = vsel %vm1227_vm1, %v4094_v24, 16 }
0x1555   : > { %v1229_v58 = vsel %vm248_vm7, %v1228_v40, 2147483647 }
0x1556   : > { %v1231_v51 = vshra.s32 %v1229_v58, 16  ;;  %v1230_v27 = vand.u32 65535, %v1229_v58 }
0x1558   : > { %v1233_v53 = vcvt.s32.f32 %v1231_v51  ;;  %v1232_v56 = vcvt.s32.f32 %v1230_v27 }
0x155a   : > { %1234 = vmin.xlane.f32.xlu1 %v1233_v53 }
0x15e3   : > { %v1235_v55 = vpop.xlane.xlu1 %1234 }
0x15e4   : > { %vm1236_vm6 = vcmp.eq.f32.partialorder %v1233_v53, %v1235_v55  ;;  %v1241_v59 = vcvt.f32.s32 %v1235_v55 }
0x15e5   : > { %v1237_v13 = vsel %vm1236_vm6, %v1232_v56, inf }
0x15e6   : > { %1238 = vmin.xlane.f32.xlu1 %v1237_v13  ;;  %v1242_v61 = vshll.u32 %v1241_v59, 16 }
0x166f   : > { %v1239_v60 = vpop.xlane.xlu1 %1238 }
0x1670   : > { %v1240_v62 = vcvt.f32.s32 %v1239_v60  ;;  %v1370_v60 = vstv %s4426_s15 }
0x1672   : > { %v1243_v0 = vadd.s32 %v1242_v61, %v1240_v62 }
0x1674   : > { %v1244_v3 = vrot.slane %v1243_v0, 4 }
0x1676   : > { %vm1245_vm9 = vcmp.lt.s32.totalorder %v1243_v0, %v1244_v3 }
0x1677   : > { %v1246_v49 = vsel %vm1245_vm9, %v1243_v0, %v1244_v3  ;;  %vm1387_vm9 = vcmp.eq.s32.totalorder %v1386_v25, 1 }
0x1678   : > { %v1247_v6 = vrot.slane %v1246_v49, 2 }
0x167a   : > { %vm1248_vm4 = vcmp.lt.s32.totalorder %v1246_v49, %v1247_v6 }
0x167b   : > { %v1249_v8 = vsel %vm1248_vm4, %v1246_v49, %v1247_v6 }
0x167c   : > { %v1250_v10 = vrot.slane %v1249_v8, 1 }
0x167e   : > { %vm1251_vm1 = vcmp.lt.s32.totalorder %v1249_v8, %v1250_v10 }
0x167f   : > { %v1252_v11 = vsel %vm1251_vm1, %v1249_v8, %v1250_v10 }
0x1680   : > { %3753 = vpush %v1252_v11 }
0x16b1   : > { %s3754_s20 = spop %3753 }
0x16b2   : > { %v1254_v12 = vstv %s3754_s20  ;;  %s613_s20 = scvt.s32.f32 %s4161_s8 }
0x16b3   : > { %vm1256_vm6 = vcmp.eq.s32.totalorder %v4110_v46, %v1254_v12  ;;  %vm1255_vm3 = vcmp.eq.s32.totalorder %v4081_v14, %v1254_v12  ;;  %vm1363_vm1 = vcmp.eq.s32.totalorder %v4094_v24, %v1254_v12 }
0x16b4   : > { %3633 = vmatpush3.msk.msra.mxu1 %vm1256_vm6, %v3956_v48 }
0x16b5   : > { %3634 = vmatprep.subr.mxu1 %v3953_v4 }
0x16b6   : > { %3635 = vmatpush3.msk.msra.mxu1 %vm1255_vm3, %v3956_v48  ;;  %vm5255_vm3 = vcmp.eq.s32.totalorder %v4094_v24, 5 }
0x16b7   : > { %3637 = vmatmul.mubr.msk.f32.vlgmr.msra.gmra.mxu1 %vm281_vm15, %v4443_v16  ;;  %3646 = vmatprep.subr.mxu1 %v3953_v4  ;;  %vm4454_vm4 = vmand %vm5255_vm3, %vm1387_vm9  ;;  %vm1371_vm3 = vcmp.eq.s32.totalorder %v4081_v14, %v1370_v60 }
0x16b8   : > { %3650 = vmatprep.mubr.msk.f32.mxu1 %vm3954_vm10, %v3953_v4 }
0x1777   : > { %v1327_v18 = vpop.f32.mrf.mxu1 }
0x1778   : > { %v1347_v20 = vrot.slane %v1327_v18, 6  ;;  %1333 = vperm.xlu1 %3882, %v1327_v18  }
0x1779   : > { %v3638_v21 = vpop.f32.mrf.mxu1 }
0x177a   : > { %v1349_v7 = vsub.f32 %v1327_v18, %v1347_v20 }
0x177c   : > { %v1351_v23 = vrot.slane %v1349_v7, 1 }
0x177e   : > { %v1353_v43 = vmul.f32 %v1351_v23, %v1349_v7 }
0x1780   : > { %1356 = vperm.xlu1 %3882, %v1353_v43  }
0x17f3   : > { %v1334_v29 = vpop.permute.xlu1 %1333 }
0x17f4   : > { %v1336_v30 = vmax.f32 %v4443_v16, %v1334_v29  ;;  %v4466_v31 = vsel %vm4454_vm4, %v1334_v29, %v1196_v52  ;;  %v1337_v17 = vmin.f32 %v4443_v16, %v1334_v29 }
0x17f6   : > { %v1339_v45 = vrot.slane %v1336_v30, 6 }
0x17f8   : > { %v1341_v47 = vsub.f32 %v1337_v17, %v1339_v45 }
0x17fa   : > { %v1342_v32 = vmax.f32 %v1341_v47, 0.0 }
0x17fb   : > { %v1357_v33 = vpop.permute.xlu1 %1356 }
0x17fc   : > { %v1344_v5 = vrot.slane %v1342_v32, 1  ;;  %v1359_v37 = vadd.f32 %v1357_v33, %v4133_v2 }
0x17fe   : > { %v1346_v36 = vmul.f32 %v1344_v5, %v1342_v32 }
0x1800   : > { %v1360_v40 = vsub.f32 %v1359_v37, %v1346_v36 }
0x1802   : > { %v1361_v58 = vmul.f32 %v1360_v40, %v4136_v9 }
0x1804   : > { %vm1362_vm6 = vcmp.gt.f32.partialorder %v1346_v36, %v1361_v58 }
0x1805   : > { %vm1364_vm9 = vmor %vm1362_vm6, %vm1363_vm1 }
0x1806   : > { %v1368_v50 = vsel %vm1364_vm9, -1e+30, %v1366_v19 }
0x1807   : > { %v1372_v52 = vsel %vm5258_vm5, %v1368_v50, -inf  ;;  %1369 = vst.msk [vmem:[%s1225_s16 - $0x2] sm:$0x4] %vm5258_vm5, %v1368_v50  ;;  %s418_s16 = scvt.s32.f32 %s4092_s29 }
0x1808   : > { %1373 = vmax.xlane.f32.xlu1 %v1372_v52 }
0x1891   : > { %v1374_v51 = vpop.xlane.xlu1 %1373 }
0x1892   : > { %v1375_v53 = vrot.slane %v1374_v51, 4 }
0x1894   : > { %v1376_v27 = vmax.f32 %v1374_v51, %v1375_v53 }
0x1896   : > { %v1377_v55 = vrot.slane %v1376_v27, 2 }
0x1898   : > { %v1378_v56 = vmax.f32 %v1376_v27, %v1377_v55 }
0x189a   : > { %v1379_v13 = vrot.slane %v1378_v56, 1 }
0x189c   : > { %v1380_v59 = vmax.f32 %v1378_v56, %v1379_v13 }
0x189e   : > { %3755 = vpush %v1380_v59 }
0x18cf   : > { %s3756_s24 = spop %3755 }
0x18d0   : > { %v1382_v38 = vstv %s3756_s24  ;;  %s1003_s24 = scvt.s32.f32 %s4299_s26 }
0x18d1   : > { %v4480_v61 = vsel %vm1371_vm3, %v1382_v38, %v4413_v22 }
0x18d2   : > { %v1397_v62 = vsel %vm220_vm2, %v4480_v61, -inf }
0x18d3   : > { %v1398_v0 = vrot.slane %v1397_v62, 4 }
0x18d5   : > { %v1399_v3 = vmax.f32 %v1397_v62, %v1398_v0 }
0x18d7   : > { %v1400_v49 = vrot.slane %v1399_v3, 2 }
0x18d9   : > { %v1401_v6 = vmax.f32 %v1399_v3, %v1400_v49 }
0x18db   : > { %v1402_v8 = vrot.slane %v1401_v6, 1 }
0x18dd   : > { %v1403_v10 = vmax.f32 %v1401_v6, %v1402_v8 }
0x18df   : > { %3757 = vpush %v1403_v10 }
0x1910   : > { %s4484_s25 = spop %3757 }
0x1911   : > { %v4487_v11 = vstv %s4484_s25  ;;  %p1405_p5 = scmp.gt.f32.partialorder %s4484_s25, -1e+29  ;;  %s1198_s25 = scvt.s32.f32 %s4363_s7 }
0x1912   : > { %vm1407_vm1 = vcmp.ge.f32.partialorder %v4480_v61, %v4487_v11 }
0x1913   : > { %v1408_v22 = vsel %vm1407_vm1, %v4081_v14, 4  ;;  %s1580_s5 = scalar_select %p1405_p5, 1, 0 }
0x1914   : > { %v1409_v12 = vsel %vm220_vm2, %v1408_v22, 2147483647 }
0x1915   : > { %v1410_v18 = vrot.slane %v1409_v12, 4  ;;  %v1581_v3 = vstv %s1580_s5 }
0x1917   : > { %vm1411_vm3 = vcmp.lt.s32.totalorder %v1409_v12, %v1410_v18 }
0x1918   : > { %v1412_v20 = vsel %vm1411_vm3, %v1409_v12, %v1410_v18 }
0x1919   : > { %v1413_v21 = vrot.slane %v1412_v20, 2 }
0x191b   : > { %vm1414_vm6 = vcmp.lt.s32.totalorder %v1412_v20, %v1413_v21 }
0x191c   : > { %v1415_v7 = vsel %vm1414_vm6, %v1412_v20, %v1413_v21 }
0x191d   : > { %v1416_v23 = vrot.slane %v1415_v7, 1 }
0x191f   : > { %vm1417_vm9 = vcmp.lt.s32.totalorder %v1415_v7, %v1416_v23 }
0x1920   : > { %v1418_v43 = vsel %vm1417_vm9, %v1415_v7, %v1416_v23 }
0x1921   : > { %3759 = vpush %v1418_v43 }
0x1952   : > { %s4493_s23 = spop %3759 }
0x1953   : > { %s1420_s30 = scalar_lea.vmem [#allocation2], %s4493_s23 }
0x1954   : > { %v4498_v25 = vld [vmem:[%s1420_s30] sm:$0x1] }
0x1955   : > { %vm1422_vm1 = vcmp.ge.f32.partialorder %v4498_v25, %v4487_v11 }
0x1956   : > { %v1423_v29 = vsel %vm1422_vm1, %v4094_v24, 16 }
0x1957   : > { %v1424_v30 = vsel %vm248_vm7, %v1423_v29, 2147483647 }
0x1958   : > { %v1426_v17 = vshra.s32 %v1424_v30, 16  ;;  %v1425_v47 = vand.u32 65535, %v1424_v30 }
0x195a   : > { %v1428_v45 = vcvt.s32.f32 %v1426_v17  ;;  %v1427_v33 = vcvt.s32.f32 %v1425_v47  ;;  %v1561_v17 = vrot.slane %v4498_v25, 6 }
0x195c   : > { %1429 = vmin.xlane.f32.xlu0 %v1428_v45 }
0x19e5   : > { %v1430_v32 = vpop.xlane.xlu0 %1429 }
0x19e6   : > { %vm1431_vm3 = vcmp.eq.f32.partialorder %v1428_v45, %v1430_v32  ;;  %v1436_v36 = vcvt.f32.s32 %v1430_v32 }
0x19e7   : > { %v1432_v5 = vsel %vm1431_vm3, %v1427_v33, inf }
0x19e8   : > { %1433 = vmin.xlane.f32.xlu0 %v1432_v5  ;;  %v1437_v40 = vshll.u32 %v1436_v36, 16 }
0x1a71   : > { %v1434_v37 = vpop.xlane.xlu0 %1433 }
0x1a72   : > { %v1435_v58 = vcvt.f32.s32 %v1434_v37 }
0x1a74   : > { %v1438_v19 = vadd.s32 %v1437_v40, %v1435_v58 }
0x1a76   : > { %v1439_v50 = vrot.slane %v1438_v19, 4 }
0x1a78   : > { %vm1440_vm6 = vcmp.lt.s32.totalorder %v1438_v19, %v1439_v50 }
0x1a79   : > { %v1441_v52 = vsel %vm1440_vm6, %v1438_v19, %v1439_v50  ;;  %vm1582_vm6 = vcmp.eq.s32.totalorder %v1581_v3, 1  ;;  %v1565_v19 = vstv %s4493_s23 }
0x1a7a   : > { %v1442_v51 = vrot.slane %v1441_v52, 2 }
0x1a7c   : > { %vm1443_vm9 = vcmp.lt.s32.totalorder %v1441_v52, %v1442_v51 }
0x1a7d   : > { %v1444_v53 = vsel %vm1443_vm9, %v1441_v52, %v1442_v51 }
0x1a7e   : > { %v1445_v27 = vrot.slane %v1444_v53, 1 }
0x1a80   : > { %vm1446_vm1 = vcmp.lt.s32.totalorder %v1444_v53, %v1445_v27 }
0x1a81   : > { %v1447_v55 = vsel %vm1446_vm1, %v1444_v53, %v1445_v27 }
0x1a82   : > { %3761 = vpush %v1447_v55 }
0x1ab3   : > { %s3762_s4 = spop %3761 }
0x1ab4   : > { %v1449_v56 = vstv %s3762_s4  ;;  %s1588_s4 = scvt.s32.f32 %s4493_s23 }
0x1ab5   : > { %vm1451_vm3 = vcmp.eq.s32.totalorder %v4110_v46, %v1449_v56  ;;  %vm1450_vm0 = vcmp.eq.s32.totalorder %v4081_v14, %v1449_v56  ;;  %vm1558_vm1 = vcmp.eq.s32.totalorder %v4094_v24, %v1449_v56 }
0x1ab6   : > { %3640 = vmatpush3.msk.msra.mxu0 %vm1451_vm3, %v3956_v48 }
0x1ab7   : > { %3641 = vmatprep.subr.mxu0 %v3953_v4 }
0x1ab8   : > { %3642 = vmatpush3.msk.msra.mxu0 %vm1450_vm0, %v3956_v48  ;;  %vm5257_vm0 = vcmp.eq.s32.totalorder %v4094_v24, 6 }
0x1ab9   : > { %3644 = vmatmul.mubr.msk.f32.vlgmr.msra.gmra.mxu0 %vm281_vm15, %v4443_v16  ;;  %3653 = vmatprep.subr.mxu0 %v3953_v4  ;;  %vm4518_vm9 = vmand %vm5257_vm0, %vm1582_vm6 }
0x1aba   : > { %3657 = vmatprep.mubr.msk.f32.mxu0 %vm3954_vm10, %v3953_v4 }
0x1b79   : > { %v1522_v13 = vpop.f32.mrf.mxu0 }
0x1b7a   : > { %v1542_v59 = vrot.slane %v1522_v13, 6  ;;  %1528 = vperm.xlu0 %3883, %v1522_v13  }
0x1b7b   : > { %v3645_v60 = vpop.f32.mrf.mxu0 }
0x1b7c   : > { %v1544_v38 = vsub.f32 %v1522_v13, %v1542_v59  ;;  %v417_v59 = vsel %vm4241_vm12, %v4086_v15, 0.0 }
0x1b7e   : > { %v1546_v62 = vrot.slane %v1544_v38, 1 }
0x1b80   : > { %v1548_v0 = vmul.f32 %v1546_v62, %v1544_v38  ;;  %v612_v38 = vsel %vm4250_vm13, %v4155_v35, %v417_v59 }
0x1b81   : > { %v807_v15 = vsel %vm4261_vm14, %v4206_v54, %v612_v38 }
0x1b82   : > { %1551 = vperm.xlu0 %3883, %v1548_v0   ;;  %v1002_v35 = vsel %vm4324_vm11, %v4293_v26, %v807_v15 }
0x1b83   : > { %v1197_v54 = vsel %vm4388_vm8, %v4357_v57, %v1002_v35 }
0x1b84   : > { %v1392_v26 = vsel %vm4454_vm4, %v4420_v42, %v1197_v54 }
0x1bf5   : > { %v4522_v6 = vpop.permute.xlu0 %1528 }
0x1bf6   : > { %v1531_v8 = vmax.f32 %v4443_v16, %v4522_v6  ;;  %v1586_v10 = vsel %vm4518_vm9, %v4522_v6, %v4466_v31  ;;  %v1532_v22 = vmin.f32 %v4443_v16, %v4522_v6 }
0x1bf8   : > { %v1534_v12 = vrot.slane %v1531_v8, 6 }
0x1bfa   : > { %v1536_v18 = vsub.f32 %v1532_v22, %v1534_v12 }
0x1bfc   : > { %v1537_v20 = vmax.f32 %v1536_v18, 0.0 }
0x1bfd   : > { %v1552_v21 = vpop.permute.xlu0 %1551 }
0x1bfe   : > { %v1539_v7 = vrot.slane %v1537_v20, 1  ;;  %v1554_v43 = vadd.f32 %v1552_v21, %v4133_v2  ;;  %v1587_v21 = vsel %vm4518_vm9, %v4487_v11, %v1392_v26 }
0x1c00   : > { %v1541_v23 = vmul.f32 %v1539_v7, %v1537_v20 }
0x1c02   : > { %v1555_v29 = vsub.f32 %v1554_v43, %v1541_v23 }
0x1c04   : > { %v1556_v30 = vmul.f32 %v1555_v29, %v4136_v9 }
0x1c06   : > { %vm1557_vm3 = vcmp.gt.f32.partialorder %v1541_v23, %v1556_v30 }
0x1c07   : > { %vm1559_vm6 = vmor %vm1557_vm3, %vm1558_vm1  ;;  %vm1566_vm1 = vcmp.eq.s32.totalorder %v4081_v14, %v1565_v19 }
0x1c08   : > { %v1563_v45 = vsel %vm1559_vm6, -1e+30, %v1561_v17  ;;  %vm5259_vm6 = vcmp.eq.s32.totalorder %v4094_v24, 7 }
0x1c09   : > { %v1567_v47 = vsel %vm5258_vm5, %v1563_v45, -inf  ;;  %1564 = vst.msk [vmem:[%s1420_s30 - $0x2] sm:$0x4] %vm5258_vm5, %v1563_v45  ;;  %s1393_s30 = scvt.s32.f32 %s4426_s15 }
0x1c0a   : > { %1568 = vmax.xlane.f32.xlu0 %v1567_v47  ;;  %v419_v47 = vstv %s418_s16 }
0x1c0b   : > { %v1394_v19 = vstv %s1393_s30 }
0x1c93   : > { %v1569_v32 = vpop.xlane.xlu0 %1568 }
0x1c94   : > { %v1570_v33 = vrot.slane %v1569_v32, 4 }
0x1c96   : > { %v1571_v5 = vmax.f32 %v1569_v32, %v1570_v33  ;;  %v614_v32 = vstv %s613_s20  ;;  %v809_v33 = vstv %s808_s21 }
0x1c98   : > { %v1572_v36 = vrot.slane %v1571_v5, 2 }
0x1c9a   : > { %v1573_v37 = vmax.f32 %v1571_v5, %v1572_v36  ;;  %v420_v5 = vsel %vm4241_vm12, %v419_v47, -1.0  ;;  %v1004_v36 = vstv %s1003_s24 }
0x1c9c   : > { %v1574_v40 = vrot.slane %v1573_v37, 1 }
0x1c9e   : > { %v1575_v58 = vmax.f32 %v1573_v37, %v1574_v40  ;;  %v615_v37 = vsel %vm4250_vm13, %v614_v32, %v420_v5  ;;  %v1199_v40 = vstv %s1198_s25 }
0x1ca0   : > { %3763 = vpush %v1575_v58  ;;  %v810_v58 = vsel %vm4261_vm14, %v809_v33, %v615_v37 }
0x1cd1   : > { %s3764_s6 = spop %3763 }
0x1cd2   : > { %v1577_v25 = vstv %s3764_s6 }
0x1cd3   : > { %v1578_v50 = vsel %vm1566_vm1, %v1577_v25, %v4480_v61  ;;  %v421_v61 = vsel %vm4241_vm12, 1.0, %v3953_v4  ;;  %v1005_v25 = vsel %vm4324_vm11, %v1004_v36, %v810_v58 }
0x1cd4   : > { %v1592_v52 = vsel %vm220_vm2, %v1578_v50, -inf  ;;  %v616_v62 = vsel %vm4250_vm13, 1.0, %v421_v61  ;;  %v1200_v39 = vsel %vm4388_vm8, %v1199_v40, %v1005_v25 }
0x1cd5   : > { %v1593_v51 = vrot.slane %v1592_v52, 4  ;;  %v811_v3 = vsel %vm4261_vm14, 1.0, %v616_v62  ;;  %v1395_v41 = vsel %vm4454_vm4, %v1394_v19, %v1200_v39  ;;  %vm5281_vm14 = vcmask 125952  }
0x1cd6   : > { %v1006_v22 = vsel %vm4324_vm11, 1.0, %v811_v3 }
0x1cd7   : > { %v1594_v53 = vmax.f32 %v1592_v52, %v1593_v51  ;;  %v1201_v20 = vsel %vm4388_vm8, 1.0, %v1006_v22 }
0x1cd8   : > { %v1396_v57 = vsel %vm4454_vm4, 1.0, %v1201_v20 }
0x1cd9   : > { %v1595_v27 = vrot.slane %v1594_v53, 2  ;;  %v1591_v7 = vsel %vm4518_vm9, 1.0, %v1396_v57 }
0x1cdb   : > { %v1596_v55 = vmax.f32 %v1594_v53, %v1595_v27 }
0x1cdd   : > { %v1597_v56 = vrot.slane %v1596_v55, 1 }
0x1cdf   : > { %v1598_v13 = vmax.f32 %v1596_v55, %v1597_v56  ;;  %v3500_v55 = vld [vmem:[%s4061_s27 + $0xc] sm:$0xf] }
0x1ce0   : > { %vm1802_vm12 = vcmp.gt.f32.partialorder %v3500_v55, %v212_v1 }
0x1ce1   : > { %3765 = vpush %v1598_v13  ;;  %v4648_v61 = vsel %vm1802_vm12, %v3500_v55, -1e+30 }
0x1ce2   : > { %v1805_v38 = vsel %vm5281_vm14, %v4648_v61, -inf }
0x1d12   : > { %s3766_s10 = spop %3765 }
0x1d13   : > { %p1600_p10 = scmp.gt.f32.partialorder %s3766_s10, -1e+29  ;;  %v4552_v60 = vstv %s3766_s10 }
0x1d14   : > { %vm1602_vm3 = vcmp.ge.f32.partialorder %v1578_v50, %v4552_v60  ;;  %v1589_v50 = vstv %s1588_s4 }
0x1d15   : > { %v1603_v0 = vsel %vm1602_vm3, %v4081_v14, 4  ;;  %s1761_s0 = scalar_select %p1600_p10, 1, 0  ;;  %vm1775_vm3 = vcmask 57344   ;;  %v1590_v63 = vsel %vm4518_vm9, %v1589_v50, %v1395_v41 }
0x1d16   : > { %v1604_v8 = vsel %vm220_vm2, %v1603_v0, 2147483647 }
0x1d17   : > { %v1605_v12 = vrot.slane %v1604_v8, 4  ;;  %v1762_v18 = vstv %s1761_s0 }
0x1d18   : > { %vm1763_vm1 = vcmp.eq.s32.totalorder %v1762_v18, 1 }
0x1d19   : > { %vm4593_vm0 = vmand %vm5259_vm6, %vm1763_vm1  ;;  %vm1606_vm5 = vcmp.lt.s32.totalorder %v1604_v8, %v1605_v12 }
0x1d1a   : > { %v1768_v23 = vsel %vm4593_vm0, %v4552_v60, %v1587_v21  ;;  %v1607_v43 = vsel %vm1606_vm5, %v1604_v8, %v1605_v12  ;;  %v1772_v11 = vsel %vm4593_vm0, 1.0, %v1591_v7 }
0x1d1b   : > { %1776 = vst.msk [vmem:[%s4584_s14 + $0x4] sm:$0x1] %vm1775_vm3, %v1768_v23  ;;  %v1608_v29 = vrot.slane %v1607_v43, 2  ;;  %1778 = vst.msk [vmem:[%s4584_s14 + $0x6] sm:$0x1] %vm1775_vm3, %v1772_v11  ;;  %v1779_v62 = vsel %vm1775_vm3, %v1772_v11, 0.0 }
0x1d1d   : > { %vm1609_vm1 = vcmp.lt.s32.totalorder %v1607_v43, %v1608_v29 }
0x1d1e   : > { %v1610_v30 = vsel %vm1609_vm1, %v1607_v43, %v1608_v29 }
0x1d1f   : > { %v1611_v17 = vrot.slane %v1610_v30, 1 }
0x1d21   : > { %vm1612_vm6 = vcmp.lt.s32.totalorder %v1610_v30, %v1611_v17 }
0x1d22   : > { %v1613_v45 = vsel %vm1612_vm6, %v1610_v30, %v1611_v17 }
0x1d23   : > { %3767 = vpush %v1613_v45 }
0x1d54   : > { %s4623_s29 = spop %3767 }
0x1d55   : > { %s1769_s8 = scvt.s32.f32 %s4623_s29  ;;  %s1615_s13 = scalar_lea.vmem [#allocation2], %s4623_s29 }
0x1d56   : > { %v4633_v44 = vld [vmem:[%s1615_s13] sm:$0x1] }
0x1d57   : > { %v1770_v52 = vstv %s1769_s8  ;;  %vm1617_vm5 = vcmp.ge.f32.partialorder %v4633_v44, %v4552_v60  ;;  %v1756_v31 = vrot.slane %v4633_v44, 6 }
0x1d58   : > { %v1771_v34 = vsel %vm4593_vm0, %v1770_v52, %v1590_v63  ;;  %v1618_v51 = vsel %vm1617_vm5, %v4094_v24, 16 }
0x1d59   : > { %1777 = vst.msk [vmem:[%s4584_s14 + $0x5] sm:$0x1] %vm1775_vm3, %v1771_v34  ;;  %v1619_v28 = vsel %vm248_vm7, %v1618_v51, 2147483647 }
0x1d5a   : > { %v1621_v53 = vshra.s32 %v1619_v28, 16  ;;  %v1620_v56 = vand.u32 65535, %v1619_v28 }
0x1d5c   : > { %v1623_v27 = vcvt.s32.f32 %v1621_v53  ;;  %v1622_v59 = vcvt.s32.f32 %v1620_v56 }
0x1d5e   : > { %1624 = vmin.xlane.f32.xlu1 %v1623_v27 }
0x1de7   : > { %v1625_v13 = vpop.xlane.xlu1 %1624 }
0x1de8   : > { %vm1626_vm13 = vcmp.eq.f32.partialorder %v1623_v27, %v1625_v13  ;;  %v1631_v15 = vcvt.f32.s32 %v1625_v13 }
0x1de9   : > { %v1627_v60 = vsel %vm1626_vm13, %v1622_v59, inf }
0x1dea   : > { %1628 = vmin.xlane.f32.xlu1 %v1627_v60  ;;  %v1632_v3 = vshll.u32 %v1631_v15, 16 }
0x1dee   : > { %1806 = vmax.xlane.f32.xlu1 %v1805_v38 }
0x1df2   : > { %1780 = vadd.xlane.f32.xlu1 %v1779_v62 }
0x1e73   : > { %v1629_v0 = vpop.xlane.xlu1 %1628 }
0x1e74   : > { %v1630_v35 = vcvt.f32.s32 %v1629_v0 }
0x1e76   : > { %v1633_v8 = vadd.s32 %v1632_v3, %v1630_v35 }
0x1e77   : > { %v4653_v1 = vpop.xlane.xlu1 %1806 }
0x1e78   : > { %v1634_v22 = vrot.slane %v1633_v8, 4  ;;  %v1808_v54 = vsel %vm220_vm2, %v4653_v1, -inf }
0x1e79   : > { %v1809_v12 = vrot.slane %v1808_v54, 4 }
0x1e7a   : > { %vm1635_vm11 = vcmp.lt.s32.totalorder %v1633_v8, %v1634_v22 }
0x1e7b   : > { %v1810_v18 = vmax.f32 %v1808_v54, %v1809_v12  ;;  %v1781_v20 = vpop.xlane.xlu1 %1780  ;;  %v1636_v26 = vsel %vm1635_vm11, %v1633_v8, %v1634_v22  ;;  %vm5260_vm11 = vcmask 60416  }
0x1e7c   : > { %v1782_v57 = vrot.slane %v1781_v20, 4  ;;  %v1637_v21 = vrot.slane %v1636_v26, 2 }
0x1e7d   : > { %v1811_v7 = vrot.slane %v1810_v18, 2 }
0x1e7e   : > { %v1783_v23 = vadd.f32 %v1782_v57, %v1781_v20  ;;  %vm1638_vm8 = vcmp.lt.s32.totalorder %v1636_v26, %v1637_v21 }
0x1e7f   : > { %v1639_v43 = vsel %vm1638_vm8, %v1636_v26, %v1637_v21  ;;  %v1812_v11 = vmax.f32 %v1810_v18, %v1811_v7 }
0x1e80   : > { %v1784_v29 = vrot.slane %v1783_v23, 2  ;;  %v1640_v30 = vrot.slane %v1639_v43, 1 }
0x1e81   : > { %v1813_v17 = vrot.slane %v1812_v11, 1 }
0x1e82   : > { %vm1641_vm4 = vcmp.lt.s32.totalorder %v1639_v43, %v1640_v30  ;;  %v1785_v45 = vadd.f32 %v1784_v29, %v1783_v23 }
0x1e83   : > { %v1642_v47 = vsel %vm1641_vm4, %v1639_v43, %v1640_v30  ;;  %v1814_v33 = vmax.f32 %v1812_v11, %v1813_v17  ;;  %vm5282_vm4 = vcmask 124930  }
0x1e84   : > { %3769 = vpush %v1642_v47  ;;  %v1786_v32 = vrot.slane %v1785_v45, 1  ;;  %v4712_v47 = vld [vmem:[%s4061_s27 + $0x8] sm:$0xf] }
0x1e86   : > { %v1787_v5 = vadd.f32 %v1786_v32, %v1785_v45 }
0x1e88   : > { %3771 = vpush %v1787_v5 }
0x1e89   : > { %3773 = vpush %v1814_v33 }
0x1eb5   : > { %s3770_s28 = spop %3769 }
0x1eb6   : > { %v1644_v36 = vstv %s3770_s28 }
0x1eb7   : > { %vm1646_vm6 = vcmp.eq.s32.totalorder %v4110_v46, %v1644_v36  ;;  %vm1645_vm1 = vcmp.eq.s32.totalorder %v4081_v14, %v1644_v36  ;;  %vm1753_vm9 = vcmp.eq.s32.totalorder %v4094_v24, %v1644_v36 }
0x1eb8   : > { %3647 = vmatpush3.msk.msra.mxu1 %vm1646_vm6, %v3956_v48  ;;  %vm5283_vm6 = vcmask 125952  }
0x1eb9   : > { %3648 = vmatprep.subr.mxu1 %v3953_v4  ;;  %s3772_s26 = spop %3771 }
0x1eba   : > { %v1789_v37 = vstv %s3772_s26  ;;  %3649 = vmatpush3.msk.msra.mxu1 %vm1645_vm1, %v3956_v48  ;;  %s4669_s7 = spop %3773 }
0x1ebb   : > { %1790 = vst.msk [vmem:[%s4584_s14 + $0x7] sm:$0x1] %vm1775_vm3, %v1789_v37  ;;  %3651 = vmatmul.mubr.msk.f32.vlgmr.msra.gmra.mxu1 %vm281_vm15, %v4443_v16  ;;  %3660 = vmatprep.subr.mxu1 %v3953_v4  ;;  %v4672_v40 = vstv %s4669_s7  ;;  %p1816_p12 = scmp.gt.f32.partialorder %s4669_s7, -1e+29 }
0x1ebc   : > { %3664 = vmatprep.mubr.msk.f32.mxu1 %vm3954_vm10, %v3953_v4  ;;  %vm1818_vm5 = vcmp.ge.f32.partialorder %v4653_v1, %v4672_v40 }
0x1ebd   : > { %v1819_v58 = vsel %vm1818_vm5, %v4081_v14, 4 }
0x1ebe   : > { %v1820_v19 = vsel %vm220_vm2, %v1819_v58, 2147483647 }
0x1ebf   : > { %v1821_v25 = vrot.slane %v1820_v19, 4 }
0x1ec1   : > { %vm1822_vm12 = vcmp.lt.s32.totalorder %v1820_v19, %v1821_v25 }
0x1ec2   : > { %v1823_v50 = vsel %vm1822_vm12, %v1820_v19, %v1821_v25  ;;  %v1795_v19 = vrot.slane %v4712_v47, 6 }
0x1ec3   : > { %v1824_v39 = vrot.slane %v1823_v50, 2 }
0x1ec4   : > { %v1797_v25 = vsub.f32 %v4712_v47, %v1795_v19 }
0x1ec5   : > { %vm1825_vm13 = vcmp.lt.s32.totalorder %v1823_v50, %v1824_v39 }
0x1ec6   : > { %v1826_v41 = vsel %vm1825_vm13, %v1823_v50, %v1824_v39 }
0x1ec7   : > { %v1827_v63 = vrot.slane %v1826_v41, 1 }
0x1ec9   : > { %vm1828_vm14 = vcmp.lt.s32.totalorder %v1826_v41, %v1827_v63 }
0x1eca   : > { %v1829_v52 = vsel %vm1828_vm14, %v1826_v41, %v1827_v63 }
0x1ecb   : > { %3775 = vpush %v1829_v52  ;;  %v1799_v52 = vrot.slane %v1797_v25, 1 }
0x1efc   : > { %s4698_s15 = spop %3775 }
0x1efd   : > { %s1831_s23 = scalar_lea.vmem [#allocation2], %s4698_s15 }
0x1f7b   : > { %v1717_v34 = vpop.f32.mrf.mxu1 }
0x1f7c   : > { %v1737_v51 = vrot.slane %v1717_v34, 6  ;;  %1723 = vperm.xlu1 %3882, %v1717_v34  }
0x1f7d   : > { %v3652_v28 = vpop.f32.mrf.mxu1 }
0x1f7e   : > { %v1739_v53 = vsub.f32 %v1717_v34, %v1737_v51  ;;  %v4730_v28 = vmul.f32 %v1799_v52, %v1797_v25 }
0x1f80   : > { %v1741_v27 = vrot.slane %v1739_v53, 1 }
0x1f82   : > { %v1743_v55 = vmul.f32 %v1741_v27, %v1739_v53 }
0x1f84   : > { %1746 = vperm.xlu0 %3883, %v1743_v55  }
0x1ff7   : > { %v1724_v56 = vpop.permute.xlu1 %1723 }
0x1ff8   : > { %v1726_v13 = vmax.f32 %v4443_v16, %v1724_v56  ;;  %v1767_v59 = vsel %vm4593_vm0, %v1724_v56, %v1586_v10  ;;  %v1727_v60 = vmin.f32 %v4443_v16, %v1724_v56 }
0x1ff9   : > { %1774 = vst.msk [vmem:[%s4584_s14] sm:$0xf] %vm5260_vm11, %v1767_v59 }
0x1ffa   : > { %v1729_v38 = vrot.slane %v1726_v13, 6 }
0x1ffc   : > { %v1731_v62 = vsub.f32 %v1727_v60, %v1729_v38 }
0x1ffe   : > { %v1732_v15 = vmax.f32 %v1731_v62, 0.0 }
0x1fff   : > { %v1747_v0 = vpop.permute.xlu0 %1746 }
0x2000   : > { %v1734_v3 = vrot.slane %v1732_v15, 1  ;;  %v1749_v8 = vadd.f32 %v1747_v0, %v4133_v2 }
0x2002   : > { %v1736_v35 = vmul.f32 %v1734_v3, %v1732_v15 }
0x2004   : > { %v1750_v49 = vsub.f32 %v1749_v8, %v1736_v35 }
0x2006   : > { %v1751_v22 = vmul.f32 %v1750_v49, %v4136_v9 }
0x2008   : > { %vm1752_vm0 = vcmp.gt.f32.partialorder %v1736_v35, %v1751_v22 }
0x2009   : > { %vm1754_vm8 = vmor %vm1752_vm0, %vm1753_vm9 }
0x200a   : > { %v1758_v6 = vsel %vm1754_vm8, -1e+30, %v1756_v31  ;;  %v1978_v31 = vstv %s4698_s15 }
0x200b   : > { %1759 = vst.msk [vmem:[%s1615_s13 - $0x2] sm:$0x4] %vm5282_vm4, %v1758_v6 }
0x200c   : > { %1804 = vst.msk [vmem:[#allocation2] sm:$0xf] %vm5283_vm6, %v4648_v61 }
0x2013   : > { %v4703_v2 = vld [vmem:[%s1831_s23] sm:$0x1] }
0x2014   : > { %vm1833_vm1 = vcmp.ge.f32.partialorder %v4703_v2, %v4672_v40  ;;  %v1974_v60 = vrot.slane %v4703_v2, 6 }
0x2015   : > { %v1834_v16 = vsel %vm1833_vm1, %v4094_v24, 16  ;;  %vm5284_vm1 = vcmask 124930  }
0x2016   : > { %v1835_v10 = vsel %vm248_vm7, %v1834_v16, 2147483647 }
0x2017   : > { %v1837_v42 = vshra.s32 %v1835_v10, 16  ;;  %v1836_v54 = vand.u32 65535, %v1835_v10 }
0x2019   : > { %v1839_v44 = vcvt.s32.f32 %v1837_v42  ;;  %v1838_v12 = vcvt.s32.f32 %v1836_v54 }
0x201b   : > { %1840 = vmin.xlane.f32.xlu1 %v1839_v44 }
0x20a4   : > { %v1841_v61 = vpop.xlane.xlu1 %1840 }
0x20a5   : > { %vm1842_vm5 = vcmp.eq.f32.partialorder %v1839_v44, %v1841_v61  ;;  %v1847_v20 = vcvt.f32.s32 %v1841_v61 }
0x20a6   : > { %v1843_v18 = vsel %vm1842_vm5, %v1838_v12, inf  ;;  %vm5285_vm5 = vmmov %vm5284_vm1 }
0x20a7   : > { %1844 = vmin.xlane.f32.xlu0 %v1843_v18  ;;  %v1848_v57 = vshll.u32 %v1847_v20, 16 }
0x2130   : > { %v1845_v26 = vpop.xlane.xlu0 %1844 }
0x2131   : > { %v1846_v21 = vcvt.f32.s32 %v1845_v26 }
0x2133   : > { %v1849_v7 = vadd.s32 %v1848_v57, %v1846_v21 }
0x2135   : > { %v1850_v23 = vrot.slane %v1849_v7, 4 }
0x2137   : > { %vm1851_vm12 = vcmp.lt.s32.totalorder %v1849_v7, %v1850_v23 }
0x2138   : > { %v1852_v43 = vsel %vm1851_vm12, %v1849_v7, %v1850_v23  ;;  %vm1979_vm12 = vcmp.eq.s32.totalorder %v4081_v14, %v1978_v31 }
0x2139   : > { %v1853_v11 = vrot.slane %v1852_v43, 2 }
0x213b   : > { %vm1854_vm13 = vcmp.lt.s32.totalorder %v1852_v43, %v1853_v11 }
0x213c   : > { %v1855_v29 = vsel %vm1854_vm13, %v1852_v43, %v1853_v11 }
0x213d   : > { %v1856_v30 = vrot.slane %v1855_v29, 1 }
0x213f   : > { %vm1857_vm14 = vcmp.lt.s32.totalorder %v1855_v29, %v1856_v30 }
0x2140   : > { %v1858_v17 = vsel %vm1857_vm14, %v1855_v29, %v1856_v30 }
0x2141   : > { %3777 = vpush %v1858_v17 }
0x2172   : > { %s3778_s5 = spop %3777 }
0x2173   : > { %v1860_v45 = vstv %s3778_s5 }
0x2174   : > { %vm1862_vm9 = vcmp.eq.s32.totalorder %v4110_v46, %v1860_v45  ;;  %vm1861_vm0 = vcmp.eq.s32.totalorder %v4081_v14, %v1860_v45  ;;  %vm1971_vm8 = vcmp.eq.s32.totalorder %v4094_v24, %v1860_v45 }
0x2175   : > { %3654 = vmatpush3.msk.msra.mxu0 %vm1862_vm9, %v3956_v48 }
0x2176   : > { %3655 = vmatprep.subr.mxu0 %v3953_v4 }
0x2177   : > { %3656 = vmatpush3.msk.msra.mxu0 %vm1861_vm0, %v3956_v48 }
0x2178   : > { %3658 = vmatmul.mubr.msk.f32.vlgmr.msra.gmra.mxu0 %vm281_vm15, %v4712_v47  ;;  %3667 = vmatprep.subr.mxu0 %v3953_v4 }
0x2179   : > { %3671 = vmatprep.mubr.msk.f32.mxu0 %vm3954_vm10, %v3953_v4 }
0x2238   : > { %v1935_v32 = vpop.f32.mrf.mxu0 }
0x2239   : > { %v1955_v33 = vrot.slane %v1935_v32, 6  ;;  %1941 = vperm.xlu1 %3882, %v1935_v32  }
0x223a   : > { %v3659_v5 = vpop.f32.mrf.mxu0 }
0x223b   : > { %v1957_v36 = vsub.f32 %v1935_v32, %v1955_v33 }
0x223d   : > { %v1959_v37 = vrot.slane %v1957_v36, 1 }
0x223f   : > { %v1961_v58 = vmul.f32 %v1959_v37, %v1957_v36 }
0x2241   : > { %1964 = vperm.xlu0 %3883, %v1961_v58  }
0x22b4   : > { %v4724_v50 = vpop.permute.xlu1 %1941 }
0x22b5   : > { %v1944_v39 = vmax.f32 %v4712_v47, %v4724_v50  ;;  %v1945_v41 = vmin.f32 %v4712_v47, %v4724_v50 }
0x22b7   : > { %v1947_v63 = vrot.slane %v1944_v39, 6 }
0x22b9   : > { %v1949_v34 = vsub.f32 %v1945_v41, %v1947_v63 }
0x22bb   : > { %v1950_v51 = vmax.f32 %v1949_v34, 0.0 }
0x22bc   : > { %v1965_v53 = vpop.permute.xlu0 %1964 }
0x22bd   : > { %v1952_v27 = vrot.slane %v1950_v51, 1  ;;  %v1967_v56 = vadd.f32 %v1965_v53, %v4730_v28 }
0x22bf   : > { %v1954_v55 = vmul.f32 %v1952_v27, %v1950_v51 }
0x22c1   : > { %v1968_v13 = vsub.f32 %v1967_v56, %v1954_v55 }
0x22c3   : > { %v1969_v59 = vmul.f32 %v1968_v13, %v4136_v9 }
0x22c5   : > { %vm1970_vm4 = vcmp.gt.f32.partialorder %v1954_v55, %v1969_v59 }
0x22c6   : > { %vm1972_vm6 = vmor %vm1970_vm4, %vm1971_vm8 }
0x22c7   : > { %v1976_v38 = vsel %vm1972_vm6, -1e+30, %v1974_v60 }
0x22c8   : > { %v1980_v62 = vsel %vm5284_vm1, %v1976_v38, -inf  ;;  %1977 = vst.msk [vmem:[%s1831_s23 - $0x2] sm:$0x4] %vm5285_vm5, %v1976_v38 }
0x22c9   : > { %1981 = vmax.xlane.f32.xlu1 %v1980_v62 }
0x2352   : > { %v1982_v15 = vpop.xlane.xlu1 %1981 }
0x2353   : > { %v1983_v0 = vrot.slane %v1982_v15, 4 }
0x2355   : > { %v1984_v3 = vmax.f32 %v1982_v15, %v1983_v0 }
0x2357   : > { %v1985_v35 = vrot.slane %v1984_v3, 2 }
0x2359   : > { %v1986_v8 = vmax.f32 %v1984_v3, %v1985_v35 }
0x235b   : > { %v1987_v49 = vrot.slane %v1986_v8, 1 }
0x235d   : > { %v1988_v22 = vmax.f32 %v1986_v8, %v1987_v49 }
0x235f   : > { %3779 = vpush %v1988_v22 }
0x2390   : > { %s3780_s6 = spop %3779 }
0x2391   : > { %v1990_v6 = vstv %s3780_s6 }
0x2392   : > { %v4743_v2 = vsel %vm1979_vm12, %v1990_v6, %v4653_v1 }
0x2393   : > { %v2004_v16 = vsel %vm220_vm2, %v4743_v2, -inf }
0x2394   : > { %v2005_v10 = vrot.slane %v2004_v16, 4 }
0x2396   : > { %v2006_v42 = vmax.f32 %v2004_v16, %v2005_v10 }
0x2398   : > { %v2007_v44 = vrot.slane %v2006_v42, 2 }
0x239a   : > { %v2008_v54 = vmax.f32 %v2006_v42, %v2007_v44 }
0x239c   : > { %v2009_v61 = vrot.slane %v2008_v54, 1 }
0x239e   : > { %v2010_v12 = vmax.f32 %v2008_v54, %v2009_v61 }
0x23a0   : > { %3781 = vpush %v2010_v12 }
0x23d1   : > { %s4747_s9 = spop %3781 }
0x23d2   : > { %v4750_v18 = vstv %s4747_s9  ;;  %p2012_p11 = scmp.gt.f32.partialorder %s4747_s9, -1e+29 }
0x23d3   : > { %vm2014_vm13 = vcmp.ge.f32.partialorder %v4743_v2, %v4750_v18 }
0x23d4   : > { %v2015_v1 = vsel %vm2014_vm13, %v4081_v14, 4 }
0x23d5   : > { %v2016_v20 = vsel %vm220_vm2, %v2015_v1, 2147483647 }
0x23d6   : > { %v2017_v26 = vrot.slane %v2016_v20, 4 }
0x23d8   : > { %vm2018_vm14 = vcmp.lt.s32.totalorder %v2016_v20, %v2017_v26 }
0x23d9   : > { %v2019_v57 = vsel %vm2018_vm14, %v2016_v20, %v2017_v26 }
0x23da   : > { %v2020_v21 = vrot.slane %v2019_v57, 2 }
0x23dc   : > { %vm2021_vm9 = vcmp.lt.s32.totalorder %v2019_v57, %v2020_v21 }
0x23dd   : > { %v2022_v7 = vsel %vm2021_vm9, %v2019_v57, %v2020_v21 }
0x23de   : > { %v2023_v23 = vrot.slane %v2022_v7, 1 }
0x23e0   : > { %vm2024_vm0 = vcmp.lt.s32.totalorder %v2022_v7, %v2023_v23 }
0x23e1   : > { %v2025_v43 = vsel %vm2024_vm0, %v2022_v7, %v2023_v23 }
0x23e2   : > { %3783 = vpush %v2025_v43 }
0x2413   : > { %s4756_s10 = spop %3783 }
0x2414   : > { %s2027_s19 = scalar_lea.vmem [#allocation2], %s4756_s10  ;;  %v2172_v7 = vstv %s4756_s10 }
0x2415   : > { %v4761_v11 = vld [vmem:[%s2027_s19] sm:$0x1] }
0x2416   : > { %vm2029_vm8 = vcmp.ge.f32.partialorder %v4761_v11, %v4750_v18  ;;  %v2168_v42 = vrot.slane %v4761_v11, 6 }
0x2417   : > { %v2030_v29 = vsel %vm2029_vm8, %v4094_v24, 16  ;;  %vm5286_vm8 = vcmask 124930  }
0x2418   : > { %v2031_v30 = vsel %vm248_vm7, %v2030_v29, 2147483647 }
0x2419   : > { %v2033_v17 = vshra.s32 %v2031_v30, 16  ;;  %v2032_v32 = vand.u32 65535, %v2031_v30 }
0x241b   : > { %v2035_v45 = vcvt.s32.f32 %v2033_v17  ;;  %v2034_v5 = vcvt.s32.f32 %v2032_v32 }
0x241d   : > { %2036 = vmin.xlane.f32.xlu0 %v2035_v45 }
0x24a6   : > { %v2037_v33 = vpop.xlane.xlu0 %2036 }
0x24a7   : > { %vm2038_vm4 = vcmp.eq.f32.partialorder %v2035_v45, %v2037_v33  ;;  %v2043_v37 = vcvt.f32.s32 %v2037_v33 }
0x24a8   : > { %v2039_v36 = vsel %vm2038_vm4, %v2034_v5, inf  ;;  %vm5287_vm4 = vmmov %vm5286_vm8 }
0x24a9   : > { %2040 = vmin.xlane.f32.xlu1 %v2039_v36  ;;  %v2044_v19 = vshll.u32 %v2043_v37, 16 }
0x2532   : > { %v2041_v58 = vpop.xlane.xlu1 %2040 }
0x2533   : > { %v2042_v25 = vcvt.f32.s32 %v2041_v58 }
0x2535   : > { %v2045_v39 = vadd.s32 %v2044_v19, %v2042_v25 }
0x2537   : > { %v2046_v41 = vrot.slane %v2045_v39, 4 }
0x2539   : > { %vm2047_vm6 = vcmp.lt.s32.totalorder %v2045_v39, %v2046_v41 }
0x253a   : > { %v2048_v63 = vsel %vm2047_vm6, %v2045_v39, %v2046_v41  ;;  %vm2173_vm6 = vcmp.eq.s32.totalorder %v4081_v14, %v2172_v7 }
0x253b   : > { %v2049_v52 = vrot.slane %v2048_v63, 2 }
0x253d   : > { %vm2050_vm1 = vcmp.lt.s32.totalorder %v2048_v63, %v2049_v52 }
0x253e   : > { %v2051_v34 = vsel %vm2050_vm1, %v2048_v63, %v2049_v52 }
0x253f   : > { %v2052_v51 = vrot.slane %v2051_v34, 1 }
0x2541   : > { %vm2053_vm5 = vcmp.lt.s32.totalorder %v2051_v34, %v2052_v51 }
0x2542   : > { %v2054_v53 = vsel %vm2053_vm5, %v2051_v34, %v2052_v51 }
0x2543   : > { %3785 = vpush %v2054_v53 }
0x2574   : > { %s3786_s0 = spop %3785 }
0x2575   : > { %v2056_v27 = vstv %s3786_s0 }
0x2576   : > { %vm2058_vm12 = vcmp.eq.s32.totalorder %v4110_v46, %v2056_v27  ;;  %vm2057_vm13 = vcmp.eq.s32.totalorder %v4081_v14, %v2056_v27  ;;  %vm2165_vm14 = vcmp.eq.s32.totalorder %v4094_v24, %v2056_v27 }
0x2577   : > { %3661 = vmatpush3.msk.msra.mxu1 %vm2058_vm12, %v3956_v48 }
0x2578   : > { %3662 = vmatprep.subr.mxu1 %v3953_v4 }
0x2579   : > { %3663 = vmatpush3.msk.msra.mxu1 %vm2057_vm13, %v3956_v48 }
0x257a   : > { %3665 = vmatmul.mubr.msk.f32.vlgmr.msra.gmra.mxu1 %vm281_vm15, %v4712_v47  ;;  %3674 = vmatprep.subr.mxu1 %v3953_v4 }
0x257b   : > { %3678 = vmatprep.mubr.msk.f32.mxu1 %vm3954_vm10, %v3953_v4 }
0x263a   : > { %v2129_v55 = vpop.f32.mrf.mxu1 }
0x263b   : > { %v2149_v56 = vrot.slane %v2129_v55, 6  ;;  %2135 = vperm.xlu1 %3882, %v2129_v55  }
0x263c   : > { %v3666_v13 = vpop.f32.mrf.mxu1 }
0x263d   : > { %v2151_v59 = vsub.f32 %v2129_v55, %v2149_v56 }
0x263f   : > { %v2153_v60 = vrot.slane %v2151_v59, 1 }
0x2641   : > { %v2155_v38 = vmul.f32 %v2153_v60, %v2151_v59 }
0x2643   : > { %2158 = vperm.xlu0 %3883, %v2155_v38  }
0x26b6   : > { %v4777_v62 = vpop.permute.xlu1 %2135 }
0x26b7   : > { %v2138_v15 = vmax.f32 %v4712_v47, %v4777_v62  ;;  %v2139_v0 = vmin.f32 %v4712_v47, %v4777_v62 }
0x26b9   : > { %v2141_v3 = vrot.slane %v2138_v15, 6 }
0x26bb   : > { %v2143_v35 = vsub.f32 %v2139_v0, %v2141_v3 }
0x26bd   : > { %v2144_v8 = vmax.f32 %v2143_v35, 0.0 }
0x26be   : > { %v2159_v49 = vpop.permute.xlu0 %2158 }
0x26bf   : > { %v2146_v22 = vrot.slane %v2144_v8, 1  ;;  %v2161_v6 = vadd.f32 %v2159_v49, %v4730_v28 }
0x26c1   : > { %v2148_v31 = vmul.f32 %v2146_v22, %v2144_v8 }
0x26c3   : > { %v2162_v16 = vsub.f32 %v2161_v6, %v2148_v31 }
0x26c5   : > { %v2163_v10 = vmul.f32 %v2162_v16, %v4136_v9 }
0x26c7   : > { %vm2164_vm9 = vcmp.gt.f32.partialorder %v2148_v31, %v2163_v10 }
0x26c8   : > { %vm2166_vm0 = vmor %vm2164_vm9, %vm2165_vm14 }
0x26c9   : > { %v2170_v44 = vsel %vm2166_vm0, -1e+30, %v2168_v42 }
0x26ca   : > { %v2174_v54 = vsel %vm5286_vm8, %v2170_v44, -inf  ;;  %2171 = vst.msk [vmem:[%s2027_s19 - $0x2] sm:$0x4] %vm5287_vm4, %v2170_v44 }
0x26cb   : > { %2175 = vmax.xlane.f32.xlu1 %v2174_v54 }
0x2754   : > { %v2176_v61 = vpop.xlane.xlu1 %2175 }
0x2755   : > { %v2177_v12 = vrot.slane %v2176_v61, 4 }
0x2757   : > { %v2178_v1 = vmax.f32 %v2176_v61, %v2177_v12 }
0x2759   : > { %v2179_v20 = vrot.slane %v2178_v1, 2 }
0x275b   : > { %v2180_v26 = vmax.f32 %v2178_v1, %v2179_v20 }
0x275d   : > { %v2181_v57 = vrot.slane %v2180_v26, 1 }
0x275f   : > { %v2182_v21 = vmax.f32 %v2180_v26, %v2181_v57 }
0x2761   : > { %3787 = vpush %v2182_v21 }
0x2792   : > { %s3788_s11 = spop %3787 }
0x2793   : > { %v2184_v23 = vstv %s3788_s11 }
0x2794   : > { %v4794_v43 = vsel %vm2173_vm6, %v2184_v23, %v4743_v2 }
0x2795   : > { %v2198_v11 = vsel %vm220_vm2, %v4794_v43, -inf }
0x2796   : > { %v2199_v29 = vrot.slane %v2198_v11, 4 }
0x2798   : > { %v2200_v30 = vmax.f32 %v2198_v11, %v2199_v29 }
0x279a   : > { %v2201_v17 = vrot.slane %v2200_v30, 2 }
0x279c   : > { %v2202_v45 = vmax.f32 %v2200_v30, %v2201_v17 }
0x279e   : > { %v2203_v32 = vrot.slane %v2202_v45, 1 }
0x27a0   : > { %v2204_v33 = vmax.f32 %v2202_v45, %v2203_v32 }
0x27a2   : > { %3789 = vpush %v2204_v33 }
0x27d3   : > { %s4798_s12 = spop %3789 }
0x27d4   : > { %v4801_v5 = vstv %s4798_s12  ;;  %p2206_p13 = scmp.gt.f32.partialorder %s4798_s12, -1e+29  ;;  %s2000_s12 = scvt.s32.f32 %s4698_s15 }
0x27d5   : > { %vm2208_vm1 = vcmp.ge.f32.partialorder %v4794_v43, %v4801_v5 }
0x27d6   : > { %v2209_v2 = vsel %vm2208_vm1, %v4081_v14, 4 }
0x27d7   : > { %v2210_v36 = vsel %vm220_vm2, %v2209_v2, 2147483647 }
0x27d8   : > { %v2211_v37 = vrot.slane %v2210_v36, 4 }
0x27da   : > { %vm2212_vm5 = vcmp.lt.s32.totalorder %v2210_v36, %v2211_v37 }
0x27db   : > { %v2213_v58 = vsel %vm2212_vm5, %v2210_v36, %v2211_v37 }
0x27dc   : > { %v2214_v19 = vrot.slane %v2213_v58, 2 }
0x27de   : > { %vm2215_vm12 = vcmp.lt.s32.totalorder %v2213_v58, %v2214_v19 }
0x27df   : > { %v2216_v25 = vsel %vm2215_vm12, %v2213_v58, %v2214_v19 }
0x27e0   : > { %v2217_v39 = vrot.slane %v2216_v25, 1 }
0x27e2   : > { %vm2218_vm13 = vcmp.lt.s32.totalorder %v2216_v25, %v2217_v39 }
0x27e3   : > { %v2219_v41 = vsel %vm2218_vm13, %v2216_v25, %v2217_v39 }
0x27e4   : > { %3791 = vpush %v2219_v41 }
0x2815   : > { %s4807_s16 = spop %3791 }
0x2816   : > { %s2221_s20 = scalar_lea.vmem [#allocation2], %s4807_s16  ;;  %v2366_v41 = vstv %s4807_s16 }
0x2817   : > { %v4812_v63 = vld [vmem:[%s2221_s20] sm:$0x1] }
0x2818   : > { %vm2223_vm14 = vcmp.ge.f32.partialorder %v4812_v63, %v4801_v5  ;;  %v2362_v45 = vrot.slane %v4812_v63, 6 }
0x2819   : > { %v2224_v52 = vsel %vm2223_vm14, %v4094_v24, 16  ;;  %vm5288_vm14 = vcmask 124930  }
0x281a   : > { %v2225_v34 = vsel %vm248_vm7, %v2224_v52, 2147483647 }
0x281b   : > { %v2227_v51 = vshra.s32 %v2225_v34, 16  ;;  %v2226_v27 = vand.u32 65535, %v2225_v34 }
0x281d   : > { %v2229_v53 = vcvt.s32.f32 %v2227_v51  ;;  %v2228_v56 = vcvt.s32.f32 %v2226_v27 }
0x281f   : > { %2230 = vmin.xlane.f32.xlu0 %v2229_v53 }
0x28a8   : > { %v2231_v55 = vpop.xlane.xlu0 %2230 }
0x28a9   : > { %vm2232_vm9 = vcmp.eq.f32.partialorder %v2229_v53, %v2231_v55  ;;  %v2237_v59 = vcvt.f32.s32 %v2231_v55 }
0x28aa   : > { %v2233_v13 = vsel %vm2232_vm9, %v2228_v56, inf  ;;  %vm5289_vm9 = vmmov %vm5288_vm14 }
0x28ab   : > { %2234 = vmin.xlane.f32.xlu1 %v2233_v13  ;;  %v2238_v38 = vshll.u32 %v2237_v59, 16 }
0x2934   : > { %v2235_v60 = vpop.xlane.xlu1 %2234 }
0x2935   : > { %v2236_v15 = vcvt.f32.s32 %v2235_v60 }
0x2937   : > { %v2239_v0 = vadd.s32 %v2238_v38, %v2236_v15 }
0x2939   : > { %v2240_v3 = vrot.slane %v2239_v0, 4 }
0x293b   : > { %vm2241_vm0 = vcmp.lt.s32.totalorder %v2239_v0, %v2240_v3 }
0x293c   : > { %v2242_v35 = vsel %vm2241_vm0, %v2239_v0, %v2240_v3  ;;  %vm2367_vm0 = vcmp.eq.s32.totalorder %v4081_v14, %v2366_v41 }
0x293d   : > { %v2243_v8 = vrot.slane %v2242_v35, 2 }
0x293f   : > { %vm2244_vm8 = vcmp.lt.s32.totalorder %v2242_v35, %v2243_v8 }
0x2940   : > { %v2245_v49 = vsel %vm2244_vm8, %v2242_v35, %v2243_v8 }
0x2941   : > { %v2246_v22 = vrot.slane %v2245_v49, 1 }
0x2943   : > { %vm2247_vm4 = vcmp.lt.s32.totalorder %v2245_v49, %v2246_v22 }
0x2944   : > { %v2248_v31 = vsel %vm2247_vm4, %v2245_v49, %v2246_v22 }
0x2945   : > { %3793 = vpush %v2248_v31 }
0x2976   : > { %s3794_s21 = spop %3793 }
0x2977   : > { %v2250_v6 = vstv %s3794_s21 }
0x2978   : > { %vm2252_vm6 = vcmp.eq.s32.totalorder %v4110_v46, %v2250_v6  ;;  %vm2251_vm1 = vcmp.eq.s32.totalorder %v4081_v14, %v2250_v6  ;;  %vm2359_vm5 = vcmp.eq.s32.totalorder %v4094_v24, %v2250_v6 }
0x2979   : > { %3668 = vmatpush3.msk.msra.mxu0 %vm2252_vm6, %v3956_v48 }
0x297a   : > { %3669 = vmatprep.subr.mxu0 %v3953_v4 }
0x297b   : > { %3670 = vmatpush3.msk.msra.mxu0 %vm2251_vm1, %v3956_v48 }
0x297c   : > { %3672 = vmatmul.mubr.msk.f32.vlgmr.msra.gmra.mxu0 %vm281_vm15, %v4712_v47  ;;  %3681 = vmatprep.subr.mxu0 %v3953_v4 }
0x297d   : > { %3685 = vmatprep.mubr.msk.f32.mxu0 %vm3954_vm10, %v3953_v4 }
0x2a3c   : > { %v2323_v16 = vpop.f32.mrf.mxu0 }
0x2a3d   : > { %v2343_v10 = vrot.slane %v2323_v16, 6  ;;  %2329 = vperm.xlu1 %3882, %v2323_v16  }
0x2a3e   : > { %v3673_v42 = vpop.f32.mrf.mxu0 }
0x2a3f   : > { %v2345_v44 = vsub.f32 %v2323_v16, %v2343_v10 }
0x2a41   : > { %v2347_v54 = vrot.slane %v2345_v44, 1 }
0x2a43   : > { %v2349_v61 = vmul.f32 %v2347_v54, %v2345_v44 }
0x2a45   : > { %2352 = vperm.xlu0 %3883, %v2349_v61  }
0x2ab8   : > { %v4828_v12 = vpop.permute.xlu1 %2329 }
0x2ab9   : > { %v2332_v1 = vmax.f32 %v4712_v47, %v4828_v12  ;;  %v2333_v20 = vmin.f32 %v4712_v47, %v4828_v12 }
0x2abb   : > { %v2335_v26 = vrot.slane %v2332_v1, 6 }
0x2abd   : > { %v2337_v57 = vsub.f32 %v2333_v20, %v2335_v26 }
0x2abf   : > { %v2338_v21 = vmax.f32 %v2337_v57, 0.0 }
0x2ac0   : > { %v2353_v7 = vpop.permute.xlu0 %2352 }
0x2ac1   : > { %v2340_v23 = vrot.slane %v2338_v21, 1  ;;  %v2355_v29 = vadd.f32 %v2353_v7, %v4730_v28 }
0x2ac3   : > { %v2342_v11 = vmul.f32 %v2340_v23, %v2338_v21 }
0x2ac5   : > { %v2356_v30 = vsub.f32 %v2355_v29, %v2342_v11 }
0x2ac7   : > { %v2357_v17 = vmul.f32 %v2356_v30, %v4136_v9 }
0x2ac9   : > { %vm2358_vm12 = vcmp.gt.f32.partialorder %v2342_v11, %v2357_v17 }
0x2aca   : > { %vm2360_vm13 = vmor %vm2358_vm12, %vm2359_vm5 }
0x2acb   : > { %v2364_v32 = vsel %vm2360_vm13, -1e+30, %v2362_v45 }
0x2acc   : > { %v2368_v33 = vsel %vm5288_vm14, %v2364_v32, -inf  ;;  %2365 = vst.msk [vmem:[%s2221_s20 - $0x2] sm:$0x4] %vm5289_vm9, %v2364_v32 }
0x2acd   : > { %2369 = vmax.xlane.f32.xlu1 %v2368_v33 }
0x2b56   : > { %v2370_v2 = vpop.xlane.xlu1 %2369 }
0x2b57   : > { %v2371_v36 = vrot.slane %v2370_v2, 4 }
0x2b59   : > { %v2372_v37 = vmax.f32 %v2370_v2, %v2371_v36 }
0x2b5b   : > { %v2373_v58 = vrot.slane %v2372_v37, 2 }
0x2b5d   : > { %v2374_v19 = vmax.f32 %v2372_v37, %v2373_v58 }
0x2b5f   : > { %v2375_v25 = vrot.slane %v2374_v19, 1 }
0x2b61   : > { %v2376_v39 = vmax.f32 %v2374_v19, %v2375_v25 }
0x2b63   : > { %3795 = vpush %v2376_v39 }
0x2b94   : > { %s3796_s24 = spop %3795 }
0x2b95   : > { %v2378_v63 = vstv %s3796_s24 }
0x2b96   : > { %v4845_v52 = vsel %vm2367_vm0, %v2378_v63, %v4794_v43 }
0x2b97   : > { %v2392_v34 = vsel %vm220_vm2, %v4845_v52, -inf }
0x2b98   : > { %v2393_v51 = vrot.slane %v2392_v34, 4 }
0x2b9a   : > { %v2394_v53 = vmax.f32 %v2392_v34, %v2393_v51 }
0x2b9c   : > { %v2395_v27 = vrot.slane %v2394_v53, 2 }
0x2b9e   : > { %v2396_v55 = vmax.f32 %v2394_v53, %v2395_v27 }
0x2ba0   : > { %v2397_v56 = vrot.slane %v2396_v55, 1 }
0x2ba2   : > { %v2398_v13 = vmax.f32 %v2396_v55, %v2397_v56 }
0x2ba4   : > { %3797 = vpush %v2398_v13 }
0x2bd5   : > { %s4849_s25 = spop %3797 }
0x2bd6   : > { %v4852_v59 = vstv %s4849_s25  ;;  %p2400_p0 = scmp.gt.f32.partialorder %s4849_s25, -1e+29  ;;  %s2194_s25 = scvt.s32.f32 %s4756_s10 }
0x2bd7   : > { %vm2402_vm8 = vcmp.ge.f32.partialorder %v4845_v52, %v4852_v59 }
0x2bd8   : > { %v2403_v43 = vsel %vm2402_vm8, %v4081_v14, 4 }
0x2bd9   : > { %v2404_v60 = vsel %vm220_vm2, %v2403_v43, 2147483647 }
0x2bda   : > { %v2405_v38 = vrot.slane %v2404_v60, 4 }
0x2bdc   : > { %vm2406_vm4 = vcmp.lt.s32.totalorder %v2404_v60, %v2405_v38 }
0x2bdd   : > { %v2407_v15 = vsel %vm2406_vm4, %v2404_v60, %v2405_v38 }
0x2bde   : > { %v2408_v0 = vrot.slane %v2407_v15, 2 }
0x2be0   : > { %vm2409_vm6 = vcmp.lt.s32.totalorder %v2407_v15, %v2408_v0 }
0x2be1   : > { %v2410_v3 = vsel %vm2409_vm6, %v2407_v15, %v2408_v0 }
0x2be2   : > { %v2411_v35 = vrot.slane %v2410_v3, 1 }
0x2be4   : > { %vm2412_vm1 = vcmp.lt.s32.totalorder %v2410_v3, %v2411_v35 }
0x2be5   : > { %v2413_v8 = vsel %vm2412_vm1, %v2410_v3, %v2411_v35 }
0x2be6   : > { %3799 = vpush %v2413_v8 }
0x2c17   : > { %s4858_s30 = spop %3799 }
0x2c18   : > { %s2415_s4 = scalar_lea.vmem [#allocation2], %s4858_s30 }
0x2c19   : > { %v4863_v49 = vld [vmem:[%s2415_s4] sm:$0x1] }
0x2c1a   : > { %vm2417_vm5 = vcmp.ge.f32.partialorder %v4863_v49, %v4852_v59  ;;  %v2556_v13 = vrot.slane %v4863_v49, 6 }
0x2c1b   : > { %v2418_v22 = vsel %vm2417_vm5, %v4094_v24, 16  ;;  %vm5290_vm5 = vcmask 124930  }
0x2c1c   : > { %v2419_v31 = vsel %vm248_vm7, %v2418_v22, 2147483647 }
0x2c1d   : > { %v2421_v6 = vshra.s32 %v2419_v31, 16  ;;  %v2420_v10 = vand.u32 65535, %v2419_v31  ;;  %v2560_v31 = vstv %s4858_s30 }
0x2c1f   : > { %v2423_v16 = vcvt.s32.f32 %v2421_v6  ;;  %v2422_v44 = vcvt.s32.f32 %v2420_v10 }
0x2c21   : > { %2424 = vmin.xlane.f32.xlu0 %v2423_v16 }
0x2caa   : > { %v2425_v42 = vpop.xlane.xlu0 %2424 }
0x2cab   : > { %vm2426_vm12 = vcmp.eq.f32.partialorder %v2423_v16, %v2425_v42  ;;  %v2431_v61 = vcvt.f32.s32 %v2425_v42 }
0x2cac   : > { %v2427_v54 = vsel %vm2426_vm12, %v2422_v44, inf  ;;  %vm5291_vm12 = vmmov %vm5290_vm5 }
0x2cad   : > { %2428 = vmin.xlane.f32.xlu1 %v2427_v54  ;;  %v2432_v20 = vshll.u32 %v2431_v61, 16 }
0x2d36   : > { %v2429_v1 = vpop.xlane.xlu1 %2428 }
0x2d37   : > { %v2430_v26 = vcvt.f32.s32 %v2429_v1 }
0x2d39   : > { %v2433_v57 = vadd.s32 %v2432_v20, %v2430_v26 }
0x2d3b   : > { %v2434_v21 = vrot.slane %v2433_v57, 4 }
0x2d3d   : > { %vm2435_vm13 = vcmp.lt.s32.totalorder %v2433_v57, %v2434_v21 }
0x2d3e   : > { %v2436_v7 = vsel %vm2435_vm13, %v2433_v57, %v2434_v21  ;;  %vm2561_vm13 = vcmp.eq.s32.totalorder %v4081_v14, %v2560_v31 }
0x2d3f   : > { %v2437_v23 = vrot.slane %v2436_v7, 2 }
0x2d41   : > { %vm2438_vm14 = vcmp.lt.s32.totalorder %v2436_v7, %v2437_v23 }
0x2d42   : > { %v2439_v11 = vsel %vm2438_vm14, %v2436_v7, %v2437_v23 }
0x2d43   : > { %v2440_v29 = vrot.slane %v2439_v11, 1 }
0x2d45   : > { %vm2441_vm9 = vcmp.lt.s32.totalorder %v2439_v11, %v2440_v29 }
0x2d46   : > { %v2442_v30 = vsel %vm2441_vm9, %v2439_v11, %v2440_v29 }
0x2d47   : > { %3801 = vpush %v2442_v30 }
0x2d78   : > { %s3802_s29 = spop %3801 }
0x2d79   : > { %v2444_v17 = vstv %s3802_s29 }
0x2d7a   : > { %vm2446_vm0 = vcmp.eq.s32.totalorder %v4110_v46, %v2444_v17  ;;  %vm2445_vm8 = vcmp.eq.s32.totalorder %v4081_v14, %v2444_v17  ;;  %vm2553_vm4 = vcmp.eq.s32.totalorder %v4094_v24, %v2444_v17 }
0x2d7b   : > { %3675 = vmatpush3.msk.msra.mxu1 %vm2446_vm0, %v3956_v48 }
0x2d7c   : > { %3676 = vmatprep.subr.mxu1 %v3953_v4 }
0x2d7d   : > { %3677 = vmatpush3.msk.msra.mxu1 %vm2445_vm8, %v3956_v48 }
0x2d7e   : > { %3679 = vmatmul.mubr.msk.f32.vlgmr.msra.gmra.mxu1 %vm281_vm15, %v4712_v47  ;;  %3688 = vmatprep.subr.mxu1 %v3953_v4 }
0x2d7f   : > { %3692 = vmatprep.mubr.msk.f32.mxu1 %vm3954_vm10, %v3953_v4 }
0x2e3e   : > { %v2517_v45 = vpop.f32.mrf.mxu1 }
0x2e3f   : > { %v2537_v32 = vrot.slane %v2517_v45, 6  ;;  %2523 = vperm.xlu1 %3882, %v2517_v45  }
0x2e40   : > { %v3680_v33 = vpop.f32.mrf.mxu1 }
0x2e41   : > { %v2539_v2 = vsub.f32 %v2517_v45, %v2537_v32 }
0x2e43   : > { %v2541_v36 = vrot.slane %v2539_v2, 1 }
0x2e45   : > { %v2543_v37 = vmul.f32 %v2541_v36, %v2539_v2 }
0x2e47   : > { %2546 = vperm.xlu0 %3883, %v2543_v37  }
0x2eba   : > { %v4879_v58 = vpop.permute.xlu1 %2523 }
0x2ebb   : > { %v2526_v19 = vmax.f32 %v4712_v47, %v4879_v58  ;;  %v2527_v25 = vmin.f32 %v4712_v47, %v4879_v58 }
0x2ebd   : > { %v2529_v39 = vrot.slane %v2526_v19, 6 }
0x2ebf   : > { %v2531_v41 = vsub.f32 %v2527_v25, %v2529_v39 }
0x2ec1   : > { %v2532_v63 = vmax.f32 %v2531_v41, 0.0 }
0x2ec2   : > { %v2547_v34 = vpop.permute.xlu0 %2546 }
0x2ec3   : > { %v2534_v51 = vrot.slane %v2532_v63, 1  ;;  %v2549_v27 = vadd.f32 %v2547_v34, %v4730_v28 }
0x2ec5   : > { %v2536_v53 = vmul.f32 %v2534_v51, %v2532_v63 }
0x2ec7   : > { %v2550_v55 = vsub.f32 %v2549_v27, %v2536_v53 }
0x2ec9   : > { %v2551_v56 = vmul.f32 %v2550_v55, %v4136_v9 }
0x2ecb   : > { %vm2552_vm6 = vcmp.gt.f32.partialorder %v2536_v53, %v2551_v56 }
0x2ecc   : > { %vm2554_vm1 = vmor %vm2552_vm6, %vm2553_vm4 }
0x2ecd   : > { %v2558_v43 = vsel %vm2554_vm1, -1e+30, %v2556_v13 }
0x2ece   : > { %v2562_v60 = vsel %vm5290_vm5, %v2558_v43, -inf  ;;  %2559 = vst.msk [vmem:[%s2415_s4 - $0x2] sm:$0x4] %vm5291_vm12, %v2558_v43 }
0x2ecf   : > { %2563 = vmax.xlane.f32.xlu1 %v2562_v60 }
0x2f58   : > { %v2564_v38 = vpop.xlane.xlu1 %2563 }
0x2f59   : > { %v2565_v15 = vrot.slane %v2564_v38, 4 }
0x2f5b   : > { %v2566_v0 = vmax.f32 %v2564_v38, %v2565_v15 }
0x2f5d   : > { %v2567_v3 = vrot.slane %v2566_v0, 2 }
0x2f5f   : > { %v2568_v35 = vmax.f32 %v2566_v0, %v2567_v3 }
0x2f61   : > { %v2569_v8 = vrot.slane %v2568_v35, 1 }
0x2f63   : > { %v2570_v22 = vmax.f32 %v2568_v35, %v2569_v8 }
0x2f65   : > { %3803 = vpush %v2570_v22 }
0x2f96   : > { %s3804_s8 = spop %3803 }
0x2f97   : > { %v2572_v49 = vstv %s3804_s8  ;;  %s1992_s8 = scalar_select %p1816_p12, 1, 0 }
0x2f98   : > { %v4896_v6 = vsel %vm2561_vm13, %v2572_v49, %v4845_v52 }
0x2f99   : > { %v2586_v16 = vsel %vm220_vm2, %v4896_v6, -inf }
0x2f9a   : > { %v2587_v10 = vrot.slane %v2586_v16, 4 }
0x2f9c   : > { %v2588_v42 = vmax.f32 %v2586_v16, %v2587_v10 }
0x2f9e   : > { %v2589_v44 = vrot.slane %v2588_v42, 2 }
0x2fa0   : > { %v2590_v54 = vmax.f32 %v2588_v42, %v2589_v44 }
0x2fa2   : > { %v2591_v61 = vrot.slane %v2590_v54, 1 }
0x2fa4   : > { %v2592_v1 = vmax.f32 %v2590_v54, %v2591_v61 }
0x2fa6   : > { %3805 = vpush %v2592_v1 }
0x2fd7   : > { %s4900_s13 = spop %3805 }
0x2fd8   : > { %v4903_v20 = vstv %s4900_s13  ;;  %p2594_p7 = scmp.gt.f32.partialorder %s4900_s13, -1e+29  ;;  %s2388_s13 = scvt.s32.f32 %s4807_s16 }
0x2fd9   : > { %vm2596_vm14 = vcmp.ge.f32.partialorder %v4896_v6, %v4903_v20 }
0x2fda   : > { %v2597_v52 = vsel %vm2596_vm14, %v4081_v14, 4 }
0x2fdb   : > { %v2598_v26 = vsel %vm220_vm2, %v2597_v52, 2147483647 }
0x2fdc   : > { %v2599_v57 = vrot.slane %v2598_v26, 4 }
0x2fde   : > { %vm2600_vm9 = vcmp.lt.s32.totalorder %v2598_v26, %v2599_v57 }
0x2fdf   : > { %v2601_v21 = vsel %vm2600_vm9, %v2598_v26, %v2599_v57 }
0x2fe0   : > { %v2602_v7 = vrot.slane %v2601_v21, 2 }
0x2fe2   : > { %vm2603_vm0 = vcmp.lt.s32.totalorder %v2601_v21, %v2602_v7 }
0x2fe3   : > { %v2604_v23 = vsel %vm2603_vm0, %v2601_v21, %v2602_v7 }
0x2fe4   : > { %v2605_v11 = vrot.slane %v2604_v23, 1 }
0x2fe6   : > { %vm2606_vm8 = vcmp.lt.s32.totalorder %v2604_v23, %v2605_v11 }
0x2fe7   : > { %v2607_v29 = vsel %vm2606_vm8, %v2604_v23, %v2605_v11 }
0x2fe8   : > { %3807 = vpush %v2607_v29 }
0x3019   : > { %s4909_s28 = spop %3807 }
0x301a   : > { %s2609_s26 = scalar_lea.vmem [#allocation2], %s4909_s28 }
0x301b   : > { %v4914_v30 = vld [vmem:[%s2609_s26] sm:$0x1] }
0x301c   : > { %vm2611_vm4 = vcmp.ge.f32.partialorder %v4914_v30, %v4903_v20  ;;  %v2750_v26 = vrot.slane %v4914_v30, 6 }
0x301d   : > { %v2612_v17 = vsel %vm2611_vm4, %v4094_v24, 16  ;;  %vm5292_vm4 = vcmask 124930  }
0x301e   : > { %v2613_v45 = vsel %vm248_vm7, %v2612_v17, 2147483647 }
0x301f   : > { %v2615_v32 = vshra.s32 %v2613_v45, 16  ;;  %v2614_v2 = vand.u32 65535, %v2613_v45 }
0x3021   : > { %v2617_v33 = vcvt.s32.f32 %v2615_v32  ;;  %v2616_v37 = vcvt.s32.f32 %v2614_v2  ;;  %v2754_v32 = vstv %s4909_s28 }
0x3023   : > { %2618 = vmin.xlane.f32.xlu0 %v2617_v33 }
0x30ac   : > { %v2619_v36 = vpop.xlane.xlu0 %2618 }
0x30ad   : > { %vm2620_vm6 = vcmp.eq.f32.partialorder %v2617_v33, %v2619_v36  ;;  %v2625_v25 = vcvt.f32.s32 %v2619_v36 }
0x30ae   : > { %v2621_v19 = vsel %vm2620_vm6, %v2616_v37, inf  ;;  %vm5293_vm6 = vmmov %vm5292_vm4 }
0x30af   : > { %2622 = vmin.xlane.f32.xlu1 %v2621_v19  ;;  %v2626_v41 = vshll.u32 %v2625_v25, 16 }
0x3138   : > { %v2623_v39 = vpop.xlane.xlu1 %2622 }
0x3139   : > { %v2624_v63 = vcvt.f32.s32 %v2623_v39 }
0x313b   : > { %v2627_v34 = vadd.s32 %v2626_v41, %v2624_v63 }
0x313d   : > { %v2628_v51 = vrot.slane %v2627_v34, 4 }
0x313f   : > { %vm2629_vm1 = vcmp.lt.s32.totalorder %v2627_v34, %v2628_v51 }
0x3140   : > { %v2630_v53 = vsel %vm2629_vm1, %v2627_v34, %v2628_v51  ;;  %vm2755_vm1 = vcmp.eq.s32.totalorder %v4081_v14, %v2754_v32 }
0x3141   : > { %v2631_v27 = vrot.slane %v2630_v53, 2 }
0x3143   : > { %vm2632_vm5 = vcmp.lt.s32.totalorder %v2630_v53, %v2631_v27 }
0x3144   : > { %v2633_v55 = vsel %vm2632_vm5, %v2630_v53, %v2631_v27 }
0x3145   : > { %v2634_v56 = vrot.slane %v2633_v55, 1 }
0x3147   : > { %vm2635_vm12 = vcmp.lt.s32.totalorder %v2633_v55, %v2634_v56 }
0x3148   : > { %v2636_v13 = vsel %vm2635_vm12, %v2633_v55, %v2634_v56 }
0x3149   : > { %3809 = vpush %v2636_v13 }
0x317a   : > { %s3810_s23 = spop %3809 }
0x317b   : > { %v2638_v43 = vstv %s3810_s23  ;;  %s2380_s23 = scalar_select %p2206_p13, 1, 0 }
0x317c   : > { %vm2640_vm13 = vcmp.eq.s32.totalorder %v4110_v46, %v2638_v43  ;;  %vm2639_vm14 = vcmp.eq.s32.totalorder %v4081_v14, %v2638_v43  ;;  %vm2747_vm9 = vcmp.eq.s32.totalorder %v4094_v24, %v2638_v43 }
0x317d   : > { %3682 = vmatpush3.msk.msra.mxu0 %vm2640_vm13, %v3956_v48 }
0x317e   : > { %3683 = vmatprep.subr.mxu0 %v3953_v4 }
0x317f   : > { %3684 = vmatpush3.msk.msra.mxu0 %vm2639_vm14, %v3956_v48 }
0x3180   : > { %3686 = vmatmul.mubr.msk.f32.vlgmr.msra.gmra.mxu0 %vm281_vm15, %v4712_v47  ;;  %3695 = vmatprep.subr.mxu0 %v3953_v4 }
0x3181   : > { %3699 = vmatprep.mubr.msk.f32.mxu0 %vm3954_vm10, %v3953_v4 }
0x3240   : > { %v2711_v60 = vpop.f32.mrf.mxu0 }
0x3241   : > { %v2731_v38 = vrot.slane %v2711_v60, 6  ;;  %2717 = vperm.xlu0 %3883, %v2711_v60  }
0x3242   : > { %v3687_v15 = vpop.f32.mrf.mxu0 }
0x3243   : > { %v2733_v0 = vsub.f32 %v2711_v60, %v2731_v38 }
0x3245   : > { %v2735_v3 = vrot.slane %v2733_v0, 1 }
0x3247   : > { %v2737_v35 = vmul.f32 %v2735_v3, %v2733_v0 }
0x3249   : > { %2740 = vperm.xlu1 %3882, %v2737_v35  }
0x32bc   : > { %v4930_v8 = vpop.permute.xlu0 %2717 }
0x32bd   : > { %v2720_v22 = vmax.f32 %v4712_v47, %v4930_v8  ;;  %v2721_v31 = vmin.f32 %v4712_v47, %v4930_v8 }
0x32bf   : > { %v2723_v49 = vrot.slane %v2720_v22, 6 }
0x32c1   : > { %v2725_v16 = vsub.f32 %v2721_v31, %v2723_v49 }
0x32c3   : > { %v2726_v10 = vmax.f32 %v2725_v16, 0.0 }
0x32c4   : > { %v2741_v42 = vpop.permute.xlu1 %2740 }
0x32c5   : > { %v2728_v44 = vrot.slane %v2726_v10, 1  ;;  %v2743_v61 = vadd.f32 %v2741_v42, %v4730_v28 }
0x32c7   : > { %v2730_v54 = vmul.f32 %v2728_v44, %v2726_v10 }
0x32c9   : > { %v2744_v1 = vsub.f32 %v2743_v61, %v2730_v54 }
0x32cb   : > { %v2745_v52 = vmul.f32 %v2744_v1, %v4136_v9 }
0x32cd   : > { %vm2746_vm0 = vcmp.gt.f32.partialorder %v2730_v54, %v2745_v52 }
0x32ce   : > { %vm2748_vm8 = vmor %vm2746_vm0, %vm2747_vm9 }
0x32cf   : > { %v2752_v47 = vsel %vm2748_vm8, -1e+30, %v2750_v26 }
0x32d0   : > { %v2756_v57 = vsel %vm5292_vm4, %v2752_v47, -inf  ;;  %2753 = vst.msk [vmem:[%s2609_s26 - $0x2] sm:$0x4] %vm5293_vm6, %v2752_v47  ;;  %s2186_s26 = scalar_select %p2012_p11, 1, 0 }
0x32d1   : > { %2757 = vmax.xlane.f32.xlu1 %v2756_v57 }
0x335a   : > { %v2758_v21 = vpop.xlane.xlu1 %2757 }
0x335b   : > { %v2759_v7 = vrot.slane %v2758_v21, 4 }
0x335d   : > { %v2760_v23 = vmax.f32 %v2758_v21, %v2759_v7  ;;  %v4977_v21 = vld [vmem:[%s4061_s27 + $0x8] sm:$0xf] }
0x335f   : > { %v2761_v11 = vrot.slane %v2760_v23, 2 }
0x3361   : > { %v2762_v29 = vmax.f32 %v2760_v23, %v2761_v11 }
0x3363   : > { %v2763_v17 = vrot.slane %v2762_v29, 1 }
0x3365   : > { %v2764_v45 = vmax.f32 %v2762_v29, %v2763_v17 }
0x3367   : > { %3811 = vpush %v2764_v45 }
0x3398   : > { %s3812_s5 = spop %3811 }
0x3399   : > { %v2766_v30 = vstv %s3812_s5  ;;  %s2574_s5 = scalar_select %p2400_p0, 1, 0 }
0x339a   : > { %v4947_v33 = vsel %vm2755_vm1, %v2766_v30, %v4896_v6 }
0x339b   : > { %v2780_v2 = vsel %vm220_vm2, %v4947_v33, -inf }
0x339c   : > { %v2781_v36 = vrot.slane %v2780_v2, 4 }
0x339e   : > { %v2782_v37 = vmax.f32 %v2780_v2, %v2781_v36 }
0x33a0   : > { %v2783_v19 = vrot.slane %v2782_v37, 2 }
0x33a2   : > { %v2784_v25 = vmax.f32 %v2782_v37, %v2783_v19 }
0x33a4   : > { %v2785_v39 = vrot.slane %v2784_v25, 1 }
0x33a6   : > { %v2786_v41 = vmax.f32 %v2784_v25, %v2785_v39 }
0x33a8   : > { %3813 = vpush %v2786_v41 }
0x33d9   : > { %s4951_s6 = spop %3813 }
0x33da   : > { %v4954_v63 = vstv %s4951_s6  ;;  %p2788_p8 = scmp.gt.f32.partialorder %s4951_s6, -1e+29  ;;  %s2582_s6 = scvt.s32.f32 %s4858_s30 }
0x33db   : > { %vm2790_vm5 = vcmp.ge.f32.partialorder %v4947_v33, %v4954_v63 }
0x33dc   : > { %v2791_v6 = vsel %vm2790_vm5, %v4081_v14, 4 }
0x33dd   : > { %v2792_v34 = vsel %vm220_vm2, %v2791_v6, 2147483647 }
0x33de   : > { %v2793_v51 = vrot.slane %v2792_v34, 4 }
0x33e0   : > { %vm2794_vm12 = vcmp.lt.s32.totalorder %v2792_v34, %v2793_v51 }
0x33e1   : > { %v2795_v53 = vsel %vm2794_vm12, %v2792_v34, %v2793_v51 }
0x33e2   : > { %v2796_v27 = vrot.slane %v2795_v53, 2 }
0x33e4   : > { %vm2797_vm13 = vcmp.lt.s32.totalorder %v2795_v53, %v2796_v27 }
0x33e5   : > { %v2798_v55 = vsel %vm2797_vm13, %v2795_v53, %v2796_v27 }
0x33e6   : > { %v2799_v56 = vrot.slane %v2798_v55, 1 }
0x33e8   : > { %vm2800_vm14 = vcmp.lt.s32.totalorder %v2798_v55, %v2799_v56 }
0x33e9   : > { %v2801_v13 = vsel %vm2800_vm14, %v2798_v55, %v2799_v56  ;;  %vm5294_vm14 = vcmask 124930  }
0x33ea   : > { %3815 = vpush %v2801_v13 }
0x341b   : > { %s4960_s19 = spop %3815 }
0x341c   : > { %s2803_s0 = scalar_lea.vmem [#allocation2], %s4960_s19 }
0x341d   : > { %v4965_v43 = vld [vmem:[%s2803_s0] sm:$0x1] }
0x341e   : > { %vm2805_vm9 = vcmp.ge.f32.partialorder %v4965_v43, %v4954_v63  ;;  %v2944_v53 = vrot.slane %v4965_v43, 6 }
0x341f   : > { %v2806_v60 = vsel %vm2805_vm9, %v4094_v24, 16  ;;  %vm5295_vm9 = vmmov %vm5294_vm14 }
0x3420   : > { %v2807_v38 = vsel %vm248_vm7, %v2806_v60, 2147483647 }
0x3421   : > { %v2809_v15 = vshra.s32 %v2807_v38, 16  ;;  %v2808_v3 = vand.u32 65535, %v2807_v38 }
0x3423   : > { %v2811_v0 = vcvt.s32.f32 %v2809_v15  ;;  %v2810_v22 = vcvt.s32.f32 %v2808_v3 }
0x3425   : > { %2812 = vmin.xlane.f32.xlu0 %v2811_v0 }
0x34ae   : > { %v2813_v35 = vpop.xlane.xlu0 %2812 }
0x34af   : > { %vm2814_vm0 = vcmp.eq.f32.partialorder %v2811_v0, %v2813_v35  ;;  %v2819_v49 = vcvt.f32.s32 %v2813_v35  ;;  %v2948_v35 = vstv %s4960_s19 }
0x34b0   : > { %v2815_v31 = vsel %vm2814_vm0, %v2810_v22, inf  ;;  %vm2949_vm0 = vcmp.eq.s32.totalorder %v4081_v14, %v2948_v35 }
0x34b1   : > { %2816 = vmin.xlane.f32.xlu0 %v2815_v31  ;;  %v2820_v10 = vshll.u32 %v2819_v49, 16 }
0x353a   : > { %v2817_v16 = vpop.xlane.xlu0 %2816 }
0x353b   : > { %v2818_v42 = vcvt.f32.s32 %v2817_v16 }
0x353d   : > { %v2821_v44 = vadd.s32 %v2820_v10, %v2818_v42 }
0x353f   : > { %v2822_v54 = vrot.slane %v2821_v44, 4 }
0x3541   : > { %vm2823_vm8 = vcmp.lt.s32.totalorder %v2821_v44, %v2822_v54 }
0x3542   : > { %v2824_v61 = vsel %vm2823_vm8, %v2821_v44, %v2822_v54 }
0x3543   : > { %v2825_v1 = vrot.slane %v2824_v61, 2 }
0x3545   : > { %vm2826_vm4 = vcmp.lt.s32.totalorder %v2824_v61, %v2825_v1 }
0x3546   : > { %v2827_v52 = vsel %vm2826_vm4, %v2824_v61, %v2825_v1 }
0x3547   : > { %v2828_v26 = vrot.slane %v2827_v52, 1 }
0x3549   : > { %vm2829_vm6 = vcmp.lt.s32.totalorder %v2827_v52, %v2828_v26 }
0x354a   : > { %v2830_v47 = vsel %vm2829_vm6, %v2827_v52, %v2828_v26 }
0x354b   : > { %3817 = vpush %v2830_v47 }
0x357c   : > { %s3818_s11 = spop %3817 }
0x357d   : > { %v2832_v57 = vstv %s3818_s11  ;;  %s2962_s11 = scalar_select %p2788_p8, 1, 0 }
0x357e   : > { %vm2834_vm1 = vcmp.eq.s32.totalorder %v4110_v46, %v2832_v57  ;;  %vm2833_vm5 = vcmp.eq.s32.totalorder %v4081_v14, %v2832_v57 }
0x357f   : > { %3689 = vmatpush3.msk.msra.mxu1 %vm2834_vm1, %v3956_v48 }
0x3580   : > { %3690 = vmatprep.subr.mxu1 %v3953_v4 }
0x3581   : > { %3691 = vmatpush3.msk.msra.mxu1 %vm2833_vm5, %v3956_v48 }
0x3582   : > { %3693 = vmatmul.mubr.msk.f32.vlgmr.msra.gmra.mxu1 %vm281_vm15, %v4977_v21  ;;  %3702 = vmatprep.subr.mxu1 %v3953_v4 }
0x3583   : > { %3706 = vmatprep.mubr.msk.f32.mxu1 %vm3954_vm10, %v3953_v4  ;;  %vm2941_vm10 = vcmp.eq.s32.totalorder %v4094_v24, %v2832_v57 }
0x3642   : > { %v2905_v7 = vpop.f32.mrf.mxu1 }
0x3643   : > { %v2925_v23 = vrot.slane %v2905_v7, 6  ;;  %2911 = vperm.xlu1 %3882, %v2905_v7  }
0x3644   : > { %v3694_v11 = vpop.f32.mrf.mxu1 }
0x3645   : > { %v2927_v29 = vsub.f32 %v2905_v7, %v2925_v23 }
0x3647   : > { %v2929_v17 = vrot.slane %v2927_v29, 1 }
0x3649   : > { %v2931_v45 = vmul.f32 %v2929_v17, %v2927_v29 }
0x364b   : > { %2934 = vperm.xlu0 %3883, %v2931_v45  }
0x36be   : > { %v4984_v32 = vpop.permute.xlu1 %2911 }
0x36bf   : > { %v2914_v30 = vmax.f32 %v4977_v21, %v4984_v32  ;;  %v2915_v2 = vmin.f32 %v4977_v21, %v4984_v32 }
0x36c1   : > { %v2917_v36 = vrot.slane %v2914_v30, 6 }
0x36c3   : > { %v2919_v37 = vsub.f32 %v2915_v2, %v2917_v36 }
0x36c5   : > { %v2920_v19 = vmax.f32 %v2919_v37, 0.0 }
0x36c6   : > { %v2935_v25 = vpop.permute.xlu0 %2934 }
0x36c7   : > { %v2922_v39 = vrot.slane %v2920_v19, 1  ;;  %v2937_v6 = vadd.f32 %v2935_v25, %v4730_v28 }
0x36c9   : > { %v2924_v41 = vmul.f32 %v2922_v39, %v2920_v19 }
0x36cb   : > { %v2938_v34 = vsub.f32 %v2937_v6, %v2924_v41 }
0x36cd   : > { %v2939_v51 = vmul.f32 %v2938_v34, %v4136_v9 }
0x36cf   : > { %vm2940_vm12 = vcmp.gt.f32.partialorder %v2924_v41, %v2939_v51 }
0x36d0   : > { %vm2942_vm13 = vmor %vm2940_vm12, %vm2941_vm10 }
0x36d1   : > { %v2946_v27 = vsel %vm2942_vm13, -1e+30, %v2944_v53 }
0x36d2   : > { %v2950_v55 = vsel %vm5294_vm14, %v2946_v27, -inf  ;;  %2947 = vst.msk [vmem:[%s2803_s0 - $0x2] sm:$0x4] %vm5295_vm9, %v2946_v27  ;;  %s2768_s0 = scalar_select %p2594_p7, 1, 0 }
0x36d3   : > { %2951 = vmax.xlane.f32.xlu1 %v2950_v55 }
0x375c   : > { %v2952_v56 = vpop.xlane.xlu1 %2951 }
0x375d   : > { %v2953_v13 = vrot.slane %v2952_v56, 4 }
0x375f   : > { %v2954_v60 = vmax.f32 %v2952_v56, %v2953_v13 }
0x3761   : > { %v2955_v38 = vrot.slane %v2954_v60, 2 }
0x3763   : > { %v2956_v15 = vmax.f32 %v2954_v60, %v2955_v38 }
0x3765   : > { %v2957_v0 = vrot.slane %v2956_v15, 1 }
0x3767   : > { %v2958_v3 = vmax.f32 %v2956_v15, %v2957_v0 }
0x3769   : > { %3819 = vpush %v2958_v3 }
0x379a   : > { %s3820_s27 = spop %3819 }
0x379b   : > { %v2960_v43 = vstv %s3820_s27 }
0x379c   : > { %v5001_v22 = vsel %vm2949_vm0, %v2960_v43, %v4947_v33 }
0x379d   : > { %v2974_v31 = vsel %vm220_vm2, %v5001_v22, -inf }
0x379e   : > { %v2975_v49 = vrot.slane %v2974_v31, 4 }
0x37a0   : > { %v2976_v16 = vmax.f32 %v2974_v31, %v2975_v49 }
0x37a2   : > { %v2977_v10 = vrot.slane %v2976_v16, 2 }
0x37a4   : > { %v2978_v42 = vmax.f32 %v2976_v16, %v2977_v10 }
0x37a6   : > { %v2979_v44 = vrot.slane %v2978_v42, 1 }
0x37a8   : > { %v2980_v54 = vmax.f32 %v2978_v42, %v2979_v44 }
0x37aa   : > { %3821 = vpush %v2980_v54 }
0x37db   : > { %s5005_s20 = spop %3821 }
0x37dc   : > { %v5008_v61 = vstv %s5005_s20  ;;  %p2982_p9 = scmp.gt.f32.partialorder %s5005_s20, -1e+29  ;;  %s2776_s20 = scvt.s32.f32 %s4909_s28 }
0x37dd   : > { %vm2984_vm8 = vcmp.ge.f32.partialorder %v5001_v22, %v5008_v61 }
0x37de   : > { %v2985_v33 = vsel %vm2984_vm8, %v4081_v14, 4  ;;  %s3156_s27 = scalar_select %p2982_p9, 1, 0 }
0x37df   : > { %v2986_v1 = vsel %vm220_vm2, %v2985_v33, 2147483647 }
0x37e0   : > { %v2987_v52 = vrot.slane %v2986_v1, 4 }
0x37e2   : > { %vm2988_vm4 = vcmp.lt.s32.totalorder %v2986_v1, %v2987_v52 }
0x37e3   : > { %v2989_v26 = vsel %vm2988_vm4, %v2986_v1, %v2987_v52 }
0x37e4   : > { %v2990_v47 = vrot.slane %v2989_v26, 2 }
0x37e6   : > { %vm2991_vm6 = vcmp.lt.s32.totalorder %v2989_v26, %v2990_v47 }
0x37e7   : > { %v2992_v57 = vsel %vm2991_vm6, %v2989_v26, %v2990_v47 }
0x37e8   : > { %v2993_v7 = vrot.slane %v2992_v57, 1 }
0x37ea   : > { %vm2994_vm1 = vcmp.lt.s32.totalorder %v2992_v57, %v2993_v7 }
0x37eb   : > { %v2995_v23 = vsel %vm2994_vm1, %v2992_v57, %v2993_v7  ;;  %vm5296_vm1 = vcmask 124930  }
0x37ec   : > { %3823 = vpush %v2995_v23 }
0x381d   : > { %s5014_s21 = spop %3823 }
0x381e   : > { %s2997_s24 = scalar_lea.vmem [#allocation2], %s5014_s21 }
0x381f   : > { %v2998_v11 = vld [vmem:[%s2997_s24] sm:$0x1] }
0x3820   : > { %vm2999_vm5 = vcmp.ge.f32.partialorder %v2998_v11, %v5008_v61  ;;  %v3138_v57 = vrot.slane %v2998_v11, 6  ;;  %v3142_v11 = vstv %s5014_s21 }
0x3821   : > { %v3000_v29 = vsel %vm2999_vm5, %v4094_v24, 16  ;;  %vm5297_vm5 = vmmov %vm5296_vm1 }
0x3822   : > { %v3001_v17 = vsel %vm248_vm7, %v3000_v29, 2147483647 }
0x3823   : > { %v3003_v45 = vshra.s32 %v3001_v17, 16  ;;  %v3002_v2 = vand.u32 65535, %v3001_v17 }
0x3825   : > { %v3005_v30 = vcvt.s32.f32 %v3003_v45  ;;  %v3004_v37 = vcvt.s32.f32 %v3002_v2 }
0x3827   : > { %3006 = vmin.xlane.f32.xlu0 %v3005_v30 }
0x38b0   : > { %v3007_v36 = vpop.xlane.xlu0 %3006 }
0x38b1   : > { %vm3008_vm10 = vcmp.eq.f32.partialorder %v3005_v30, %v3007_v36  ;;  %v3013_v25 = vcvt.f32.s32 %v3007_v36 }
0x38b2   : > { %v3009_v19 = vsel %vm3008_vm10, %v3004_v37, inf  ;;  %vm3143_vm10 = vcmp.eq.s32.totalorder %v4081_v14, %v3142_v11 }
0x38b3   : > { %3010 = vmin.xlane.f32.xlu1 %v3009_v19  ;;  %v3014_v41 = vshll.u32 %v3013_v25, 16 }
0x393c   : > { %v3011_v39 = vpop.xlane.xlu1 %3010 }
0x393d   : > { %v3012_v6 = vcvt.f32.s32 %v3011_v39 }
0x393f   : > { %v3015_v34 = vadd.s32 %v3014_v41, %v3012_v6 }
0x3941   : > { %v3016_v51 = vrot.slane %v3015_v34, 4 }
0x3943   : > { %vm3017_vm12 = vcmp.lt.s32.totalorder %v3015_v34, %v3016_v51 }
0x3944   : > { %v3018_v53 = vsel %vm3017_vm12, %v3015_v34, %v3016_v51 }
0x3945   : > { %v3019_v27 = vrot.slane %v3018_v53, 2 }
0x3947   : > { %vm3020_vm13 = vcmp.lt.s32.totalorder %v3018_v53, %v3019_v27 }
0x3948   : > { %v3021_v55 = vsel %vm3020_vm13, %v3018_v53, %v3019_v27 }
0x3949   : > { %v3022_v56 = vrot.slane %v3021_v55, 1 }
0x394b   : > { %vm3023_vm14 = vcmp.lt.s32.totalorder %v3021_v55, %v3022_v56 }
0x394c   : > { %v3024_v13 = vsel %vm3023_vm14, %v3021_v55, %v3022_v56  ;;  %v2187_v55 = vstv %s2186_s26  ;;  %v2381_v56 = vstv %s2380_s23 }
0x394d   : > { %3825 = vpush %v3024_v13  ;;  %v2575_v13 = vstv %s2574_s5  ;;  %vm2188_vm13 = vcmp.eq.s32.totalorder %v2187_v55, 1  ;;  %vm2382_vm14 = vcmp.eq.s32.totalorder %v2381_v56, 1 }
0x397e   : > { %s3826_s4 = spop %3825 }
0x397f   : > { %v3026_v60 = vstv %s3826_s4  ;;  %s3164_s4 = scvt.s32.f32 %s5014_s21 }
0x3980   : > { %vm3028_vm9 = vcmp.eq.s32.totalorder %v4110_v46, %v3026_v60  ;;  %vm3027_vm0 = vcmp.eq.s32.totalorder %v4081_v14, %v3026_v60  ;;  %vm3135_vm8 = vcmp.eq.s32.totalorder %v4094_v24, %v3026_v60  ;;  %v2769_v60 = vstv %s2768_s0 }
0x3981   : > { %3696 = vmatpush3.msk.msra.mxu0 %vm3028_vm9, %v3956_v48  ;;  %vm5298_vm9 = vcmp.eq.s32.totalorder %v4094_v24, 0 }
0x3982   : > { %3697 = vmatprep.subr.mxu0 %v3953_v4 }
0x3983   : > { %3698 = vmatpush3.msk.msra.mxu0 %vm3027_vm0, %v3956_v48 }
0x3984   : > { %3700 = vmatmul.mubr.msk.f32.vlgmr.msra.gmra.mxu0 %vm281_vm15, %v4977_v21 }
0x3a44   : > { %v3099_v38 = vpop.f32.mrf.mxu0 }
0x3a45   : > { %v3119_v15 = vrot.slane %v3099_v38, 6  ;;  %3105 = vperm.xlu0 %3883, %v3099_v38  }
0x3a46   : > { %v3701_v0 = vpop.f32.mrf.mxu0 }
0x3a47   : > { %v3121_v3 = vsub.f32 %v3099_v38, %v3119_v15  ;;  %v2963_v38 = vstv %s2962_s11  ;;  %v3157_v0 = vstv %s3156_s27 }
0x3a48   : > { %vm2964_vm11 = vcmp.eq.s32.totalorder %v2963_v38, 1 }
0x3a49   : > { %v3123_v35 = vrot.slane %v3121_v3, 1 }
0x3a4b   : > { %v3125_v43 = vmul.f32 %v3123_v35, %v3121_v3 }
0x3a4d   : > { %3128 = vperm.xlu1 %3882, %v3125_v43  }
0x3ac0   : > { %v5029_v31 = vpop.permute.xlu0 %3105 }
0x3ac1   : > { %v3108_v49 = vmax.f32 %v4977_v21, %v5029_v31  ;;  %v3109_v16 = vmin.f32 %v4977_v21, %v5029_v31 }
0x3ac3   : > { %v3111_v10 = vrot.slane %v3108_v49, 6 }
0x3ac5   : > { %v3113_v42 = vsub.f32 %v3109_v16, %v3111_v10 }
0x3ac7   : > { %v3114_v44 = vmax.f32 %v3113_v42, 0.0 }
0x3ac8   : > { %v3129_v54 = vpop.permute.xlu1 %3128 }
0x3ac9   : > { %v3116_v33 = vrot.slane %v3114_v44, 1  ;;  %v3131_v52 = vadd.f32 %v3129_v54, %v4730_v28 }
0x3acb   : > { %v3118_v1 = vmul.f32 %v3116_v33, %v3114_v44 }
0x3acd   : > { %v3132_v26 = vsub.f32 %v3131_v52, %v3118_v1 }
0x3acf   : > { %v3133_v47 = vmul.f32 %v3132_v26, %v4136_v9 }
0x3ad1   : > { %vm3134_vm4 = vcmp.gt.f32.partialorder %v3118_v1, %v3133_v47 }
0x3ad2   : > { %vm3136_vm6 = vmor %vm3134_vm4, %vm3135_vm8  ;;  %vm2576_vm8 = vcmp.eq.s32.totalorder %v2575_v13, 1  ;;  %vm5301_vm4 = vcmp.eq.s32.totalorder %v4094_v24, 1  ;;  %v3165_v13 = vstv %s3164_s4 }
0x3ad3   : > { %v3140_v7 = vsel %vm3136_vm6, -1e+30, %v3138_v57  ;;  %vm5061_vm6 = vmand %vm5301_vm4, %vm2188_vm13 }
0x3ad4   : > { %v3144_v23 = vsel %vm5296_vm1, %v3140_v7, -inf  ;;  %3141 = vst.msk [vmem:[%s2997_s24 - $0x2] sm:$0x4] %vm5297_vm5, %v3140_v7  ;;  %vm2770_vm1 = vcmp.eq.s32.totalorder %v2769_v60, 1  ;;  %vm5304_vm5 = vcmp.eq.s32.totalorder %v4094_v24, 2  ;;  %s2970_s24 = scvt.s32.f32 %s4960_s19 }
0x3ad5   : > { %3145 = vmax.xlane.f32.xlu1 %v3144_v23 }
0x3ad6   : > { %v2971_v55 = vstv %s2970_s24 }
0x3b5e   : > { %v3146_v29 = vpop.xlane.xlu1 %3145 }
0x3b5f   : > { %v3147_v17 = vrot.slane %v3146_v29, 4 }
0x3b61   : > { %v3148_v45 = vmax.f32 %v3146_v29, %v3147_v17 }
0x3b63   : > { %v3149_v30 = vrot.slane %v3148_v45, 2 }
0x3b65   : > { %v3150_v2 = vmax.f32 %v3148_v45, %v3149_v30 }
0x3b67   : > { %v3151_v36 = vrot.slane %v3150_v2, 1 }
0x3b69   : > { %v3152_v37 = vmax.f32 %v3150_v2, %v3151_v36 }
0x3b6b   : > { %3827 = vpush %v3152_v37 }
0x3b9c   : > { %s3828_s29 = spop %3827 }
0x3b9d   : > { %v3154_v19 = vstv %s3828_s29 }
0x3b9e   : > { %v3155_v25 = vsel %vm3143_vm10, %v3154_v19, %v5001_v22  ;;  %v1993_v22 = vstv %s1992_s8  ;;  %vm5067_vm10 = vmand %vm5304_vm5, %vm2382_vm14  ;;  %vm3158_vm14 = vcmp.eq.s32.totalorder %v3157_v0, 1 }
0x3b9f   : > { %v3168_v39 = vsel %vm220_vm2, %v3155_v25, -inf  ;;  %vm1994_vm12 = vcmp.eq.s32.totalorder %v1993_v22, 1 }
0x3ba0   : > { %v3169_v41 = vrot.slane %v3168_v39, 4  ;;  %vm5055_vm0 = vmand %vm5298_vm9, %vm1994_vm12  ;;  %vm5307_vm12 = vcmp.eq.s32.totalorder %v4094_v24, 3  ;;  %vm5310_vm9 = vcmp.eq.s32.totalorder %v4094_v24, 4 }
0x3ba1   : > { %v1999_v43 = vsel %vm5055_vm0, %v4672_v40, 0.0  ;;  %v2003_v49 = vsel %vm5055_vm0, 1.0, %v3953_v4  ;;  %vm5079_vm13 = vmand %vm5307_vm12, %vm2576_vm8  ;;  %vm5313_vm8 = vcmp.eq.s32.totalorder %v4094_v24, 5 }
0x3ba2   : > { %v3170_v6 = vmax.f32 %v3168_v39, %v3169_v41  ;;  %v2193_v42 = vsel %vm5061_vm6, %v4750_v18, %v1999_v43  ;;  %vm5090_vm4 = vmand %vm5310_vm9, %vm2770_vm1  ;;  %v2197_v44 = vsel %vm5061_vm6, 1.0, %v2003_v49  ;;  %vm5316_vm1 = vcmp.eq.s32.totalorder %v4094_v24, 6 }
0x3ba3   : > { %v2387_v54 = vsel %vm5067_vm10, %v4801_v5, %v2193_v42  ;;  %vm5102_vm12 = vmand %vm5313_vm8, %vm2964_vm11  ;;  %v2391_v1 = vsel %vm5067_vm10, 1.0, %v2197_v44  ;;  %v2001_v39 = vstv %s2000_s12  ;;  %v2195_v41 = vstv %s2194_s25 }
0x3ba4   : > { %v3171_v34 = vrot.slane %v3170_v6, 2  ;;  %v2581_v52 = vsel %vm5079_vm13, %v4852_v59, %v2387_v54  ;;  %vm5114_vm9 = vmand %vm5316_vm1, %vm3158_vm14  ;;  %v2585_v47 = vsel %vm5079_vm13, 1.0, %v2391_v1 }
0x3ba5   : > { %v2775_v57 = vsel %vm5090_vm4, %v4903_v20, %v2581_v52  ;;  %v2779_v59 = vsel %vm5090_vm4, 1.0, %v2585_v47 }
0x3ba6   : > { %v3172_v51 = vmax.f32 %v3170_v6, %v3171_v34  ;;  %v2969_v29 = vsel %vm5102_vm12, %v4954_v63, %v2775_v57  ;;  %v2973_v17 = vsel %vm5102_vm12, 1.0, %v2779_v59  ;;  %v2389_v6 = vstv %s2388_s13 }
0x3ba7   : > { %v3163_v45 = vsel %vm5114_vm9, %v5008_v61, %v2969_v29  ;;  %v3167_v30 = vsel %vm5114_vm9, 1.0, %v2973_v17  ;;  %v2002_v34 = vsel %vm5055_vm0, %v2001_v39, -1.0 }
0x3ba8   : > { %v3173_v53 = vrot.slane %v3172_v51, 1 }
0x3baa   : > { %v3174_v27 = vmax.f32 %v3172_v51, %v3173_v53  ;;  %v2583_v51 = vstv %s2582_s6  ;;  %v2196_v53 = vsel %vm5061_vm6, %v2195_v41, %v2002_v34 }
0x3bab   : > { %v2390_v22 = vsel %vm5067_vm10, %v2389_v6, %v2196_v53 }
0x3bac   : > { %3829 = vpush %v3174_v27  ;;  %v2777_v27 = vstv %s2776_s20  ;;  %v2584_v56 = vsel %vm5079_vm13, %v2583_v51, %v2390_v22 }
0x3bad   : > { %v2778_v60 = vsel %vm5090_vm4, %v2777_v27, %v2584_v56 }
0x3bae   : > { %v2972_v38 = vsel %vm5102_vm12, %v2971_v55, %v2778_v60 }
0x3baf   : > { %v3166_v43 = vsel %vm5114_vm9, %v3165_v13, %v2972_v38 }
0x3bdd   : > { %s3830_s7 = spop %3829 }
0x3bde   : > { %p3176_p1 = scmp.gt.f32.partialorder %s3830_s7, -1e+29  ;;  %v5083_v10 = vstv %s3830_s7 }
0x3bdf   : > { %vm3178_vm5 = vcmp.ge.f32.partialorder %v3155_v25, %v5083_v10 }
0x3be0   : > { %v3179_v18 = vsel %vm3178_vm5, %v4081_v14, 4  ;;  %s3336_s9 = scalar_select %p3176_p1, 1, 0 }
0x3be1   : > { %v3180_v26 = vsel %vm220_vm2, %v3179_v18, 2147483647  ;;  %vm5319_vm2 = vcmp.eq.s32.totalorder %v4094_v24, 7 }
0x3be2   : > { %v3181_v7 = vrot.slane %v3180_v26, 4  ;;  %v3337_v23 = vstv %s3336_s9 }
0x3be3   : > { %vm3338_vm11 = vcmp.eq.s32.totalorder %v3337_v23, 1 }
0x3be4   : > { %vm5136_vm14 = vmand %vm5319_vm2, %vm3338_vm11  ;;  %vm3182_vm5 = vcmp.lt.s32.totalorder %v3180_v26, %v3181_v7 }
0x3be5   : > { %v3343_v63 = vsel %vm5136_vm14, %v5083_v10, %v3163_v45  ;;  %v3347_v61 = vsel %vm5136_vm14, 1.0, %v3167_v30  ;;  %v3183_v2 = vsel %vm3182_vm5, %v3180_v26, %v3181_v7 }
0x3be6   : > { %3542 = vst.msk [vmem:[%s4584_s14 + $0xc] sm:$0x1] %vm1775_vm3, %v3343_v63  ;;  %v3353_v36 = vsel %vm1775_vm3, %v3347_v61, 0.0  ;;  %3544 = vst.msk [vmem:[%s4584_s14 + $0xe] sm:$0x1] %vm1775_vm3, %v3347_v61  ;;  %v3184_v37 = vrot.slane %v3183_v2, 2 }
0x3be7   : > { %3354 = vadd.xlane.f32.xlu1 %v3353_v36 }
0x3be8   : > { %vm3185_vm8 = vcmp.lt.s32.totalorder %v3183_v2, %v3184_v37 }
0x3be9   : > { %v3186_v11 = vsel %vm3185_vm8, %v3183_v2, %v3184_v37 }
0x3bea   : > { %v3187_v19 = vrot.slane %v3186_v11, 1 }
0x3bec   : > { %vm3188_vm1 = vcmp.lt.s32.totalorder %v3186_v11, %v3187_v19 }
0x3bed   : > { %v3189_v25 = vsel %vm3188_vm1, %v3186_v11, %v3187_v19 }
0x3bee   : > { %3831 = vpush %v3189_v25 }
0x3c1f   : > { %s5167_s15 = spop %3831 }
0x3c20   : > { %s3344_s10 = scvt.s32.f32 %s5167_s15  ;;  %s3191_s16 = scalar_lea.vmem [#allocation2], %s5167_s15 }
0x3c21   : > { %v5177_v0 = vld [vmem:[%s3191_s16] sm:$0x1] }
0x3c22   : > { %v3345_v49 = vstv %s3344_s10  ;;  %vm3193_vm11 = vcmp.ge.f32.partialorder %v5177_v0, %v5083_v10  ;;  %v3332_v38 = vrot.slane %v5177_v0, 6 }
0x3c23   : > { %v3346_v42 = vsel %vm5136_vm14, %v3345_v49, %v3166_v43  ;;  %v3194_v44 = vsel %vm3193_vm11, %v4094_v24, 16 }
0x3c24   : > { %3543 = vst.msk [vmem:[%s4584_s14 + $0xd] sm:$0x1] %vm1775_vm3, %v3346_v42  ;;  %v3195_v54 = vsel %vm248_vm7, %v3194_v44, 2147483647 }
0x3c25   : > { %v3197_v18 = vshra.s32 %v3195_v54, 16  ;;  %v3196_v52 = vand.u32 65535, %v3195_v54 }
0x3c27   : > { %v3199_v1 = vcvt.s32.f32 %v3197_v18  ;;  %v3198_v47 = vcvt.s32.f32 %v3196_v52 }
0x3c29   : > { %3200 = vmin.xlane.f32.xlu0 %v3199_v1 }
0x3c70   : > { %v3355_v7 = vpop.xlane.xlu1 %3354 }
0x3c71   : > { %v3356_v10 = vrot.slane %v3355_v7, 4 }
0x3c73   : > { %v3357_v59 = vadd.f32 %v3356_v10, %v3355_v7 }
0x3c75   : > { %v3358_v63 = vrot.slane %v3357_v59, 2 }
0x3c77   : > { %v3359_v36 = vadd.f32 %v3358_v63, %v3357_v59 }
0x3c79   : > { %v3360_v19 = vrot.slane %v3359_v36, 1 }
0x3c7b   : > { %v3361_v41 = vadd.f32 %v3360_v19, %v3359_v36 }
0x3cb2   : > { %v3201_v26 = vpop.xlane.xlu0 %3200 }
0x3cb3   : > { %vm3202_vm2 = vcmp.eq.f32.partialorder %v3199_v1, %v3201_v26  ;;  %v3207_v23 = vcvt.f32.s32 %v3201_v26 }
0x3cb4   : > { %v3203_v57 = vsel %vm3202_vm2, %v3198_v47, inf }
0x3cb5   : > { %3204 = vmin.xlane.f32.xlu0 %v3203_v57  ;;  %v3208_v17 = vshll.u32 %v3207_v23, 16 }
0x3d3e   : > { %v3205_v29 = vpop.xlane.xlu0 %3204 }
0x3d3f   : > { %v3206_v45 = vcvt.f32.s32 %v3205_v29 }
0x3d41   : > { %v3209_v30 = vadd.s32 %v3208_v17, %v3206_v45 }
0x3d43   : > { %v3210_v61 = vrot.slane %v3209_v30, 4 }
0x3d45   : > { %vm3211_vm7 = vcmp.lt.s32.totalorder %v3209_v30, %v3210_v61 }
0x3d46   : > { %v3212_v2 = vsel %vm3211_vm7, %v3209_v30, %v3210_v61 }
0x3d47   : > { %v3213_v37 = vrot.slane %v3212_v2, 2 }
0x3d49   : > { %vm3214_vm5 = vcmp.lt.s32.totalorder %v3212_v2, %v3213_v37 }
0x3d4a   : > { %v3215_v11 = vsel %vm3214_vm5, %v3212_v2, %v3213_v37 }
0x3d4b   : > { %v3216_v25 = vrot.slane %v3215_v11, 1 }
0x3d4d   : > { %vm3217_vm8 = vcmp.lt.s32.totalorder %v3215_v11, %v3216_v25 }
0x3d4e   : > { %v3218_v39 = vsel %vm3217_vm8, %v3215_v11, %v3216_v25 }
0x3d4f   : > { %3833 = vpush %v3218_v39 }
0x3d50   : > { %3835 = vpush %v3361_v41 }
0x3d80   : > { %s3834_s30 = spop %3833 }
0x3d81   : > { %v3220_v6 = vstv %s3834_s30  ;;  %s3836_s28 = spop %3835 }
0x3d82   : > { %vm3222_vm1 = vcmp.eq.s32.totalorder %v4110_v46, %v3220_v6  ;;  %v3363_v34 = vstv %s3836_s28  ;;  %vm3221_vm11 = vcmp.eq.s32.totalorder %v4081_v14, %v3220_v6  ;;  %v1998_v14 = vsel %vm5055_vm0, %v4724_v50, 0.0 }
0x3d83   : > { %3545 = vst.msk [vmem:[%s4584_s14 + $0xf] sm:$0x1] %vm1775_vm3, %v3363_v34  ;;  %3703 = vmatpush3.msk.msra.mxu1 %vm3222_vm1, %v3956_v48  ;;  %vm3329_vm3 = vcmp.eq.s32.totalorder %v4094_v24, %v3220_v6 }
0x3d84   : > { %3704 = vmatprep.subr.mxu1 %v3953_v4  ;;  %v2192_v4 = vsel %vm5061_vm6, %v4777_v62, %v1998_v14 }
0x3d85   : > { %3705 = vmatpush3.msk.msra.mxu1 %vm3221_vm11, %v3956_v48  ;;  %v2386_v48 = vsel %vm5067_vm10, %v4828_v12, %v2192_v4  ;;  %vm5323_vm10 = vcmask 124930  }
0x3d86   : > { %3707 = vmatmul.mubr.msk.f32.vlgmr.msra.gmra.mxu1 %vm281_vm15, %v4977_v21  ;;  %v2580_v56 = vsel %vm5079_vm13, %v4879_v58, %v2386_v48  ;;  %vm5322_vm15 = vcmask 60416  }
0x3d87   : > { %v2774_v13 = vsel %vm5090_vm4, %v4930_v8, %v2580_v56 }
0x3d88   : > { %v2968_v50 = vsel %vm5102_vm12, %v4984_v32, %v2774_v13 }
0x3d89   : > { %v3162_v62 = vsel %vm5114_vm9, %v5029_v31, %v2968_v50 }
0x3e46   : > { %v3293_v51 = vpop.f32.mrf.mxu1 }
0x3e47   : > { %v3313_v53 = vrot.slane %v3293_v51, 6  ;;  %3299 = vperm.xlu0 %3883, %v3293_v51  }
0x3e48   : > { %v3708_v27 = vpop.f32.mrf.mxu1 }
0x3e49   : > { %v3315_v46 = vsub.f32 %v3293_v51, %v3313_v53 }
0x3e4b   : > { %v3317_v22 = vrot.slane %v3315_v46, 1 }
0x3e4d   : > { %v3319_v55 = vmul.f32 %v3317_v22, %v3315_v46 }
0x3e4f   : > { %3322 = vperm.xlu1 %3882, %v3319_v55  }
0x3ec2   : > { %v3300_v15 = vpop.permute.xlu0 %3299 }
0x3ec3   : > { %v3302_v3 = vmax.f32 %v4977_v21, %v3300_v15  ;;  %v3342_v12 = vsel %vm5136_vm14, %v3300_v15, %v3162_v62  ;;  %v3303_v58 = vmin.f32 %v4977_v21, %v3300_v15 }
0x3ec4   : > { %3541 = vst.msk [vmem:[%s4584_s14 + $0x8] sm:$0xf] %vm5322_vm15, %v3342_v12 }
0x3ec5   : > { %v3305_v8 = vrot.slane %v3302_v3, 6 }
0x3ec7   : > { %v3307_v35 = vsub.f32 %v3303_v58, %v3305_v8 }
0x3ec9   : > { %v3308_v16 = vmax.f32 %v3307_v35, 0.0 }
0x3eca   : > { %v3323_v40 = vpop.permute.xlu1 %3322 }
0x3ecb   : > { %v3310_v32 = vrot.slane %v3308_v16, 1  ;;  %v3325_v5 = vadd.f32 %v3323_v40, %v4730_v28 }
0x3ecd   : > { %v3312_v33 = vmul.f32 %v3310_v32, %v3308_v16 }
0x3ecf   : > { %v3326_v31 = vsub.f32 %v3325_v5, %v3312_v33 }
0x3ed1   : > { %v3327_v60 = vmul.f32 %v3326_v31, %v4136_v9 }
0x3ed3   : > { %vm3328_vm0 = vcmp.gt.f32.partialorder %v3312_v33, %v3327_v60 }
0x3ed4   : > { %vm3330_vm6 = vmor %vm3328_vm0, %vm3329_vm3 }
0x3ed5   : > { %v3334_v20 = vsel %vm3330_vm6, -1e+30, %v3332_v38 }
0x3ed6   : > { %3335 = vst.msk [vmem:[%s3191_s16 - $0x2] sm:$0x4] %vm5323_vm10, %v3334_v20 }
0x3ed7 PF: > { %p15_p2 = scmp.ge.s32.totalorder %s4003_s1, 4   ;;  %s5324_s16 = smov %s3940_s17 }
0x3ed8   : > { %s5325_s17 = smov %s3944_s18  ;;  %s5326_s18 = smov %s4013_s22 }
0x3ed9   : > { %s5327_s19 = smov %s4003_s1  ;;  %17 = sbr.rel (!%p15_p2) target bundleno = 6 (0x6), region = 90 }
0x3ede   :  { %3387 = vsyncpa [#allocation6], 1 }
0x3edf   :  { %3389 = vsyncpa [#allocation6 + $0x1], 1 }

</bundles_post_ra>
